<compile_context>
chip_gen: v7x
topology: tpu7x:2x2x1
jax: 0.10.0
libtpu: 0.0.40
codegen_flags: <defaults>
</compile_context>

<pallas_src>
from functools import partial

import jax
import jax.numpy as jnp
from jax import lax
from jax.experimental import pallas as pl
from jax.experimental.pallas import tpu as pltpu

D = 50          # logical hidden size (nn.LSTMCell(2, 50), nn.LSTMCell(50, 50))
IN = 2          # input / output feature size (nn.Linear(50, 2))
DP = 128        # hidden size padded to one full 128-lane register
G = 4 * DP      # fused gate width (i, f, g, o), each gate lane-aligned to 128
HI = lax.Precision.HIGHEST


# ----------------------------------------------------------------------------
# Kernel: single invocation, in-kernel time loops, fused-gate LSTM cells.
# ----------------------------------------------------------------------------
def _seq_kernel(T, future, unroll_t, unroll_f,
                xproj_ref, whh1_ref, w2_ref, b2_ref, wfb_ref, bfb_ref,
                h2out_ref):
    f32 = jnp.float32
    B = h2out_ref.shape[1]

    # Hoist only the small bias broadcasts (JAX does not CSE broadcast_in_dim
    # inside loops).  The big (128/256, 512) weight loads stay at point of use
    # to avoid vreg pressure / spills across the recurrence.
    b2b = jnp.broadcast_to(b2_ref[...], (B, G))

    def gates(z, c):
        # z: (B, 4*DP) fused pre-activation; gate k lives in lanes [k*DP, k*DP+D).
        # Padded lanes carry exactly zero (zero-padded weights/biases), so the
        # padded part of h/c stays identically zero through the recurrence.
        i = jax.nn.sigmoid(z[:, 0 * DP:1 * DP])
        f = jax.nn.sigmoid(z[:, 1 * DP:2 * DP])
        g = jnp.tanh(z[:, 2 * DP:3 * DP])
        o = jax.nn.sigmoid(z[:, 3 * DP:4 * DP])
        c_new = f * c + i * g
        h_new = o * jnp.tanh(c_new)
        return h_new, c_new

    def step(z1_pre, state):
        h1, c1, h2, c2 = state
        # layer 1: input projection (z1_pre) already computed; only the
        # recurrent h1@Whh1 matmul sits on the serial critical path.
        z1 = z1_pre + jnp.dot(h1, whh1_ref[...], preferred_element_type=f32)
        h1, c1 = gates(z1, c1)
        # layer 2: single K=256 dot against stacked [Wih2; Whh2].
        hcat = jnp.concatenate([h1, h2], axis=1)           # (B, 2*DP), lane-aligned
        z2 = jnp.dot(hcat, w2_ref[...], preferred_element_type=f32) + b2b
        h2, c2 = gates(z2, c2)
        return (h1, c1, h2, c2)

    state0 = tuple(jnp.zeros((B, DP), f32) for _ in range(4))

    # ---- teacher-forced steps: input projection was hoisted into xproj -----
    def teacher_body(t, state):
        state = step(xproj_ref[t], state)
        h2out_ref[t] = state[2].astype(h2out_ref.dtype)     # lane-dense (B,128) store
        return state

    state = lax.fori_loop(0, T, teacher_body, state0, unroll=unroll_t)

    # ---- autoregressive "future" steps: feedback folded into W_fb / b_fb ---
    if future > 0:
        bfbb = jnp.broadcast_to(bfb_ref[...], (B, G))

        def future_body(s, state):
            h1, c1, h2, c2 = state
            # z1_pre = y_prev @ Wih1 + b1 = h2_prev @ (Wlin@Wih1) + (blin@Wih1 + b1)
            z1_pre = jnp.dot(h2, wfb_ref[...], preferred_element_type=f32) + bfbb
            state = step(z1_pre, state)
            h2out_ref[T + s] = state[2].astype(h2out_ref.dtype)
            return state

        lax.fori_loop(0, future, future_body, state, unroll=unroll_f)


# ----------------------------------------------------------------------------
# Wrapper
# ----------------------------------------------------------------------------
def sequence_forward(x, packed, future=0):
    """x: (B, T, 2) float32, packed = pack_params(logical params).
    Returns (B, T + future, 2) float32."""
    B, T, _ = x.shape
    total = T + future
    (wih1_f, b1_f, whh1_f, w2_f, b2_f, wlin_f, blin_f, wfb_f, bfb_f) = packed

    # Hoisted teacher-forced input projection (+ fused bias b1), time-major,
    # at HIGHEST precision so it matches the in-kernel f32 path.
    xproj = (jnp.einsum('bti,ig->tbg', x.astype(jnp.float32), wih1_f,
                        precision=HI) + b1_f)                # (T, B, 4*DP)

    vmem = pl.BlockSpec(memory_space=pltpu.MemorySpace.VMEM)
    unroll_t = max(1, min(T, 8))
    unroll_f = max(1, min(future, 8))

    # Whole-array VMEM residency; budget explicitly (v7x has 64 MiB physical).
    vmem_bytes = 4 * (xproj.size + whh1_f.size + w2_f.size + b2_f.size
                      + wfb_f.size + bfb_f.size + total * B * DP)
    vmem_limit = int(min(max(2 * vmem_bytes + (4 << 20), 16 << 20), 48 << 20))

    h2_all = pl.pallas_call(
        partial(_seq_kernel, T, future, unroll_t, unroll_f),
        out_shape=jax.ShapeDtypeStruct((total, B, DP), jnp.float32),
        in_specs=[vmem] * 6,
        out_specs=vmem,
        compiler_params=pltpu.CompilerParams(vmem_limit_bytes=vmem_limit),
    )(xproj, whh1_f, w2_f, b2_f, wfb_f, bfb_f)

    # Deferred batched readout (one matmul, off the recurrence critical path).
    y = jnp.einsum('tbd,di->tbi', h2_all, wlin_f, precision=HI) + blin_f
    return jnp.transpose(y, (1, 0, 2))                       # (B, T + future, 2)


# ----------------------------------------------------------------------------
# Parameter handling
#   Logical params mirror PyTorch LSTMCell (gate order i, f, g, o; fused
#   bias_ih + bias_hh; weights pre-transposed). pack_params builds the padded,
#   gate-fused kernel layout: each gate occupies its own 128-lane block, layer-2
#   input/recurrent weights are stacked (K=256), and the autoregressive
#   feedback projection is folded into W_fb / b_fb.
# ----------------------------------------------------------------------------
def init_params(key):
    bound = 1.0 / (D ** 0.5)
    ks = jax.random.split(key, 10)

    def u(k, shape):
        return jax.random.uniform(k, shape, jnp.float32, -bound, bound)

    wih1 = u(ks[0], (4, IN, D))                        # lstm1 weight_ih (transposed, per gate)
    whh1 = u(ks[1], (4, D, D))                         # lstm1 weight_hh (transposed, per gate)
    b1 = u(ks[2], (4, 1, D)) + u(ks[3], (4, 1, D))     # bias_ih + bias_hh (fused)
    wih2 = u(ks[4], (4, D, D))                         # lstm2 weight_ih
    whh2 = u(ks[5], (4, D, D))                         # lstm2 weight_hh
    b2 = u(ks[6], (4, 1, D)) + u(ks[7], (4, 1, D))
    wlin = u(ks[8], (D, IN))                           # linear weight (transposed)
    blin = u(ks[9], (1, IN))                           # linear bias
    return (wih1, whh1, b1, wih2, whh2, b2, wlin, blin)


def pack_params(params):
    """Build the padded, gate-fused kernel parameter layout."""
    wih1, whh1, b1, wih2, whh2, b2, wlin, blin = params

    def fuse_w(w, rows_out):
        # w: (4, rows_in, D) -> (rows_out, 4*DP), gate k at lanes [k*DP, k*DP+D)
        rows_in = w.shape[1]
        out = jnp.zeros((rows_out, G), jnp.float32)
        for k in range(4):
            out = out.at[:rows_in, k * DP:k * DP + D].set(w[k])
        return out

    def fuse_b(b):
        out = jnp.zeros((1, G), jnp.float32)
        for k in range(4):
            out = out.at[:, k * DP:k * DP + D].set(b[k, 0])
        return out

    wih1_f = fuse_w(wih1, IN)                          # (2, 512)
    whh1_f = fuse_w(whh1, DP)                          # (128, 512), rows >= D are zero
    wih2_f = fuse_w(wih2, DP)
    whh2_f = fuse_w(whh2, DP)
    w2_f = jnp.concatenate([wih2_f, whh2_f], axis=0)   # (256, 512) stacked layer-2 weight
    b1_f = fuse_b(b1)                                  # (1, 512)
    b2_f = fuse_b(b2)
    wlin_f = jnp.zeros((DP, IN), jnp.float32).at[:D, :].set(wlin)
    blin_f = blin.astype(jnp.float32)

    # Fold the autoregressive feedback (y = h2@Wlin + blin, then y@Wih1 + b1)
    # into a single h2 -> z1 projection.
    wfb_f = jnp.dot(wlin_f, wih1_f, precision=HI)      # (128, 512)
    bfb_f = jnp.dot(blin_f, wih1_f, precision=HI) + b1_f   # (1, 512)

    return (wih1_f, b1_f, whh1_f, w2_f, b2_f, wlin_f, blin_f, wfb_f, bfb_f)


# ----------------------------------------------------------------------------
# Pure-JAX reference (direct transcription of the torch forward) for checking
# ----------------------------------------------------------------------------
def sequence_ref(x, params, future=0):
    wih1, whh1, b1, wih2, whh2, b2, wlin, blin = params
    B, T, _ = x.shape
    h1 = jnp.zeros((B, D)); c1 = jnp.zeros((B, D))
    h2 = jnp.zeros((B, D)); c2 = jnp.zeros((B, D))

    def cell(xx, h, c, wih, whh, b):
        i = jax.nn.sigmoid(xx @ wih[0] + h @ whh[0] + b[0])
        f = jax.nn.sigmoid(xx @ wih[1] + h @ whh[1] + b[1])
        g = jnp.tanh(xx @ wih[2] + h @ whh[2] + b[2])
        o = jax.nn.sigmoid(xx @ wih[3] + h @ whh[3] + b[3])
        c = f * c + i * g
        h = o * jnp.tanh(c)
        return h, c

    outs, out = [], None
    for t in range(T):
        h1, c1 = cell(x[:, t, :], h1, c1, wih1, whh1, b1)
        h2, c2 = cell(h1, h2, c2, wih2, whh2, b2)
        out = h2 @ wlin + blin
        outs.append(out)
    for _ in range(future):
        h1, c1 = cell(out, h1, c1, wih1, whh1, b1)
        h2, c2 = cell(h1, h2, c2, wih2, whh2, b2)
        out = h2 @ wlin + blin
        outs.append(out)
    return jnp.stack(outs, axis=1)


# ----------------------------------------------------------------------------
if __name__ == "__main__":
    key = jax.random.PRNGKey(0)
    k_par, k_x = jax.random.split(key)

    B, T = 2, 8
    params = init_params(k_par)
    packed = pack_params(params)
    x = jax.random.normal(k_x, (B, T, IN), dtype=jnp.float32)

    # future = 0 (the module's default call)
    out0 = jax.block_until_ready(sequence_forward(x, packed, future=0))
    ref0 = sequence_ref(x, params, future=0)
    assert out0.shape == (B, T, IN)
    assert jnp.allclose(out0, ref0, rtol=1e-4, atol=1e-4), \
        f"max err {float(jnp.max(jnp.abs(out0 - ref0)))}"

    # future > 0 (autoregressive tail of the torch forward)
    out3 = jax.block_until_ready(sequence_forward(x, packed, future=3))
    ref3 = sequence_ref(x, params, future=3)
    assert out3.shape == (B, T + 3, IN)
    assert jnp.allclose(out3, ref3, rtol=1e-4, atol=1e-4), \
        f"max err {float(jnp.max(jnp.abs(out3 - ref3)))}"

    print("KERNEL_OK")
</pallas_src>

<mosaic_0001>
module attributes {stable_mosaic.version = 11 : i64} {
  func.func @_seq_kernel(%arg0: memref<8x2x512xf32, #tpu.memory_space<vmem>>, %arg1: memref<128x512xf32, #tpu.memory_space<vmem>>, %arg2: memref<256x512xf32, #tpu.memory_space<vmem>>, %arg3: memref<1x512xf32, #tpu.memory_space<vmem>>, %arg4: memref<128x512xf32, #tpu.memory_space<vmem>>, %arg5: memref<1x512xf32, #tpu.memory_space<vmem>>, %arg6: memref<8x2x128xf32, #tpu.memory_space<vmem>>) attributes {dimension_semantics = [], scalar_prefetch = 0 : i64, scratch_operands = 0 : i64, tpu.core_type = #tpu.core_type<tc>} {
    %c0 = arith.constant 0 : index
    %c0_0 = arith.constant 0 : index
    %0 = vector.load %arg3[%c0, %c0_0] : memref<1x512xf32, #tpu.memory_space<vmem>>, vector<1x512xf32>
    %1 = vector.shape_cast %0 : vector<1x512xf32> to vector<1x512xf32>
    %2 = vector.broadcast %1 : vector<1x512xf32> to vector<2x512xf32>
    %cst = arith.constant 0.000000e+00 : f32
    %3 = vector.broadcast %cst : f32 to vector<2x128xf32>
    %cst_1 = arith.constant 0.000000e+00 : f32
    %4 = vector.broadcast %cst_1 : f32 to vector<2x128xf32>
    %cst_2 = arith.constant 0.000000e+00 : f32
    %5 = vector.broadcast %cst_2 : f32 to vector<2x128xf32>
    %cst_3 = arith.constant 0.000000e+00 : f32
    %6 = vector.broadcast %cst_3 : f32 to vector<2x128xf32>
    %c0_i32 = arith.constant 0 : i32
    %7 = arith.index_cast %c0_i32 : i32 to index
    %c0_4 = arith.constant 0 : index
    %c0_5 = arith.constant 0 : index
    %8 = vector.load %arg0[%7, %c0_4, %c0_5] : memref<8x2x512xf32, #tpu.memory_space<vmem>>, vector<1x2x512xf32>
    %9 = vector.shape_cast %8 : vector<1x2x512xf32> to vector<2x512xf32>
    %c0_6 = arith.constant 0 : index
    %c0_7 = arith.constant 0 : index
    %10 = vector.load %arg1[%c0_6, %c0_7] : memref<128x512xf32, #tpu.memory_space<vmem>>, vector<128x512xf32>
    %cst_8 = arith.constant dense<0.000000e+00> : vector<2x512xf32>
    %11 = tpu.matmul %3, %10, %cst_8 {dimension_numbers = #tpu.dot_dimension_numbers<[1], [0], [0], [1], [0, 0, 1, 1], [], []>} : vector<2x128xf32>, vector<128x512xf32>, vector<2x512xf32> -> vector<2x512xf32>
    %12 = arith.addf %9, %11 : vector<2x512xf32>
    %13 = vector.extract_strided_slice %12 {offsets = [0, 0], sizes = [2, 128], strides = [1, 1]} : vector<2x512xf32> to vector<2x128xf32>
    %14 = arith.negf %13 : vector<2x128xf32>
    %15 = math.exp %14 : vector<2x128xf32>
    %cst_9 = arith.constant 1.000000e+00 : f32
    %16 = vector.broadcast %cst_9 : f32 to vector<2x128xf32>
    %17 = arith.addf %16, %15 : vector<2x128xf32>
    %18 = arith.divf %16, %17 : vector<2x128xf32>
    %19 = vector.extract_strided_slice %12 {offsets = [0, 128], sizes = [2, 128], strides = [1, 1]} : vector<2x512xf32> to vector<2x128xf32>
    %20 = arith.negf %19 : vector<2x128xf32>
    %21 = math.exp %20 : vector<2x128xf32>
    %cst_10 = arith.constant 1.000000e+00 : f32
    %22 = vector.broadcast %cst_10 : f32 to vector<2x128xf32>
    %23 = arith.addf %22, %21 : vector<2x128xf32>
    %24 = arith.divf %22, %23 : vector<2x128xf32>
    %25 = vector.extract_strided_slice %12 {offsets = [0, 256], sizes = [2, 128], strides = [1, 1]} : vector<2x512xf32> to vector<2x128xf32>
    %26 = math.tanh %25 : vector<2x128xf32>
    %27 = vector.extract_strided_slice %12 {offsets = [0, 384], sizes = [2, 128], strides = [1, 1]} : vector<2x512xf32> to vector<2x128xf32>
    %28 = arith.negf %27 : vector<2x128xf32>
    %29 = math.exp %28 : vector<2x128xf32>
    %cst_11 = arith.constant 1.000000e+00 : f32
    %30 = vector.broadcast %cst_11 : f32 to vector<2x128xf32>
    %31 = arith.addf %30, %29 : vector<2x128xf32>
    %32 = arith.divf %30, %31 : vector<2x128xf32>
    %33 = arith.mulf %24, %4 : vector<2x128xf32>
    %34 = arith.mulf %18, %26 : vector<2x128xf32>
    %35 = arith.addf %33, %34 : vector<2x128xf32>
    %36 = math.tanh %35 : vector<2x128xf32>
    %37 = arith.mulf %32, %36 : vector<2x128xf32>
    %38 = tpu.concatenate %37, %5 in 1 : vector<2x128xf32>, vector<2x128xf32> -> vector<2x256xf32>
    %c0_12 = arith.constant 0 : index
    %c0_13 = arith.constant 0 : index
    %39 = vector.load %arg2[%c0_12, %c0_13] : memref<256x512xf32, #tpu.memory_space<vmem>>, vector<256x512xf32>
    %cst_14 = arith.constant dense<0.000000e+00> : vector<2x512xf32>
    %40 = tpu.matmul %38, %39, %cst_14 {dimension_numbers = #tpu.dot_dimension_numbers<[1], [0], [0], [1], [0, 0, 1, 1], [], []>} : vector<2x256xf32>, vector<256x512xf32>, vector<2x512xf32> -> vector<2x512xf32>
    %41 = arith.addf %40, %2 : vector<2x512xf32>
    %42 = vector.extract_strided_slice %41 {offsets = [0, 0], sizes = [2, 128], strides = [1, 1]} : vector<2x512xf32> to vector<2x128xf32>
    %43 = arith.negf %42 : vector<2x128xf32>
    %44 = math.exp %43 : vector<2x128xf32>
    %cst_15 = arith.constant 1.000000e+00 : f32
    %45 = vector.broadcast %cst_15 : f32 to vector<2x128xf32>
    %46 = arith.addf %45, %44 : vector<2x128xf32>
    %47 = arith.divf %45, %46 : vector<2x128xf32>
    %48 = vector.extract_strided_slice %41 {offsets = [0, 128], sizes = [2, 128], strides = [1, 1]} : vector<2x512xf32> to vector<2x128xf32>
    %49 = arith.negf %48 : vector<2x128xf32>
    %50 = math.exp %49 : vector<2x128xf32>
    %cst_16 = arith.constant 1.000000e+00 : f32
    %51 = vector.broadcast %cst_16 : f32 to vector<2x128xf32>
    %52 = arith.addf %51, %50 : vector<2x128xf32>
    %53 = arith.divf %51, %52 : vector<2x128xf32>
    %54 = vector.extract_strided_slice %41 {offsets = [0, 256], sizes = [2, 128], strides = [1, 1]} : vector<2x512xf32> to vector<2x128xf32>
    %55 = math.tanh %54 : vector<2x128xf32>
    %56 = vector.extract_strided_slice %41 {offsets = [0, 384], sizes = [2, 128], strides = [1, 1]} : vector<2x512xf32> to vector<2x128xf32>
    %57 = arith.negf %56 : vector<2x128xf32>
    %58 = math.exp %57 : vector<2x128xf32>
    %cst_17 = arith.constant 1.000000e+00 : f32
    %59 = vector.broadcast %cst_17 : f32 to vector<2x128xf32>
    %60 = arith.addf %59, %58 : vector<2x128xf32>
    %61 = arith.divf %59, %60 : vector<2x128xf32>
    %62 = arith.mulf %53, %6 : vector<2x128xf32>
    %63 = arith.mulf %47, %55 : vector<2x128xf32>
    %64 = arith.addf %62, %63 : vector<2x128xf32>
    %65 = math.tanh %64 : vector<2x128xf32>
    %66 = arith.mulf %61, %65 : vector<2x128xf32>
    %67 = arith.index_cast %c0_i32 : i32 to index
    %c0_18 = arith.constant 0 : index
    %c0_19 = arith.constant 0 : index
    %68 = vector.load %arg6[%67, %c0_18, %c0_19] : memref<8x2x128xf32, #tpu.memory_space<vmem>>, vector<1x2x128xf32>
    %69 = vector.shape_cast %68 : vector<1x2x128xf32> to vector<2x128xf32>
    %70 = vector.shape_cast %66 : vector<2x128xf32> to vector<1x2x128xf32>
    tpu.vector_store %arg6[%67, %c0_18, %c0_19], %70 {strides = array<i32>} : memref<8x2x128xf32, #tpu.memory_space<vmem>>, vector<1x2x128xf32>,
    %c1_i32 = arith.constant 1 : i32
    %71 = arith.index_cast %c1_i32 : i32 to index
    %c0_20 = arith.constant 0 : index
    %c0_21 = arith.constant 0 : index
    %72 = vector.load %arg0[%71, %c0_20, %c0_21] : memref<8x2x512xf32, #tpu.memory_space<vmem>>, vector<1x2x512xf32>
    %73 = vector.shape_cast %72 : vector<1x2x512xf32> to vector<2x512xf32>
    %c0_22 = arith.constant 0 : index
    %c0_23 = arith.constant 0 : index
    %74 = vector.load %arg1[%c0_22, %c0_23] : memref<128x512xf32, #tpu.memory_space<vmem>>, vector<128x512xf32>
    %cst_24 = arith.constant dense<0.000000e+00> : vector<2x512xf32>
    %75 = tpu.matmul %37, %74, %cst_24 {dimension_numbers = #tpu.dot_dimension_numbers<[1], [0], [0], [1], [0, 0, 1, 1], [], []>} : vector<2x128xf32>, vector<128x512xf32>, vector<2x512xf32> -> vector<2x512xf32>
    %76 = arith.addf %73, %75 : vector<2x512xf32>
    %77 = vector.extract_strided_slice %76 {offsets = [0, 0], sizes = [2, 128], strides = [1, 1]} : vector<2x512xf32> to vector<2x128xf32>
    %78 = arith.negf %77 : vector<2x128xf32>
    %79 = math.exp %78 : vector<2x128xf32>
    %cst_25 = arith.constant 1.000000e+00 : f32
    %80 = vector.broadcast %cst_25 : f32 to vector<2x128xf32>
    %81 = arith.addf %80, %79 : vector<2x128xf32>
    %82 = arith.divf %80, %81 : vector<2x128xf32>
    %83 = vector.extract_strided_slice %76 {offsets = [0, 128], sizes = [2, 128], strides = [1, 1]} : vector<2x512xf32> to vector<2x128xf32>
    %84 = arith.negf %83 : vector<2x128xf32>
    %85 = math.exp %84 : vector<2x128xf32>
    %cst_26 = arith.constant 1.000000e+00 : f32
    %86 = vector.broadcast %cst_26 : f32 to vector<2x128xf32>
    %87 = arith.addf %86, %85 : vector<2x128xf32>
    %88 = arith.divf %86, %87 : vector<2x128xf32>
    %89 = vector.extract_strided_slice %76 {offsets = [0, 256], sizes = [2, 128], strides = [1, 1]} : vector<2x512xf32> to vector<2x128xf32>
    %90 = math.tanh %89 : vector<2x128xf32>
    %91 = vector.extract_strided_slice %76 {offsets = [0, 384], sizes = [2, 128], strides = [1, 1]} : vector<2x512xf32> to vector<2x128xf32>
    %92 = arith.negf %91 : vector<2x128xf32>
    %93 = math.exp %92 : vector<2x128xf32>
    %cst_27 = arith.constant 1.000000e+00 : f32
    %94 = vector.broadcast %cst_27 : f32 to vector<2x128xf32>
    %95 = arith.addf %94, %93 : vector<2x128xf32>
    %96 = arith.divf %94, %95 : vector<2x128xf32>
    %97 = arith.mulf %88, %35 : vector<2x128xf32>
    %98 = arith.mulf %82, %90 : vector<2x128xf32>
    %99 = arith.addf %97, %98 : vector<2x128xf32>
    %100 = math.tanh %99 : vector<2x128xf32>
    %101 = arith.mulf %96, %100 : vector<2x128xf32>
    %102 = tpu.concatenate %101, %66 in 1 : vector<2x128xf32>, vector<2x128xf32> -> vector<2x256xf32>
    %c0_28 = arith.constant 0 : index
    %c0_29 = arith.constant 0 : index
    %103 = vector.load %arg2[%c0_28, %c0_29] : memref<256x512xf32, #tpu.memory_space<vmem>>, vector<256x512xf32>
    %cst_30 = arith.constant dense<0.000000e+00> : vector<2x512xf32>
    %104 = tpu.matmul %102, %103, %cst_30 {dimension_numbers = #tpu.dot_dimension_numbers<[1], [0], [0], [1], [0, 0, 1, 1], [], []>} : vector<2x256xf32>, vector<256x512xf32>, vector<2x512xf32> -> vector<2x512xf32>
    %105 = arith.addf %104, %2 : vector<2x512xf32>
    %106 = vector.extract_strided_slice %105 {offsets = [0, 0], sizes = [2, 128], strides = [1, 1]} : vector<2x512xf32> to vector<2x128xf32>
    %107 = arith.negf %106 : vector<2x128xf32>
    %108 = math.exp %107 : vector<2x128xf32>
    %cst_31 = arith.constant 1.000000e+00 : f32
    %109 = vector.broadcast %cst_31 : f32 to vector<2x128xf32>
    %110 = arith.addf %109, %108 : vector<2x128xf32>
    %111 = arith.divf %109, %110 : vector<2x128xf32>
    %112 = vector.extract_strided_slice %105 {offsets = [0, 128], sizes = [2, 128], strides = [1, 1]} : vector<2x512xf32> to vector<2x128xf32>
    %113 = arith.negf %112 : vector<2x128xf32>
    %114 = math.exp %113 : vector<2x128xf32>
    %cst_32 = arith.constant 1.000000e+00 : f32
    %115 = vector.broadcast %cst_32 : f32 to vector<2x128xf32>
    %116 = arith.addf %115, %114 : vector<2x128xf32>
    %117 = arith.divf %115, %116 : vector<2x128xf32>
    %118 = vector.extract_strided_slice %105 {offsets = [0, 256], sizes = [2, 128], strides = [1, 1]} : vector<2x512xf32> to vector<2x128xf32>
    %119 = math.tanh %118 : vector<2x128xf32>
    %120 = vector.extract_strided_slice %105 {offsets = [0, 384], sizes = [2, 128], strides = [1, 1]} : vector<2x512xf32> to vector<2x128xf32>
    %121 = arith.negf %120 : vector<2x128xf32>
    %122 = math.exp %121 : vector<2x128xf32>
    %cst_33 = arith.constant 1.000000e+00 : f32
    %123 = vector.broadcast %cst_33 : f32 to vector<2x128xf32>
    %124 = arith.addf %123, %122 : vector<2x128xf32>
    %125 = arith.divf %123, %124 : vector<2x128xf32>
    %126 = arith.mulf %117, %64 : vector<2x128xf32>
    %127 = arith.mulf %111, %119 : vector<2x128xf32>
    %128 = arith.addf %126, %127 : vector<2x128xf32>
    %129 = math.tanh %128 : vector<2x128xf32>
    %130 = arith.mulf %125, %129 : vector<2x128xf32>
    %131 = arith.index_cast %c1_i32 : i32 to index
    %c0_34 = arith.constant 0 : index
    %c0_35 = arith.constant 0 : index
    %132 = vector.load %arg6[%131, %c0_34, %c0_35] : memref<8x2x128xf32, #tpu.memory_space<vmem>>, vector<1x2x128xf32>
    %133 = vector.shape_cast %132 : vector<1x2x128xf32> to vector<2x128xf32>
    %134 = vector.shape_cast %130 : vector<2x128xf32> to vector<1x2x128xf32>
    tpu.vector_store %arg6[%131, %c0_34, %c0_35], %134 {strides = array<i32>} : memref<8x2x128xf32, #tpu.memory_space<vmem>>, vector<1x2x128xf32>,
    %c2_i32 = arith.constant 2 : i32
    %135 = arith.index_cast %c2_i32 : i32 to index
    %c0_36 = arith.constant 0 : index
    %c0_37 = arith.constant 0 : index
    %136 = vector.load %arg0[%135, %c0_36, %c0_37] : memref<8x2x512xf32, #tpu.memory_space<vmem>>, vector<1x2x512xf32>
    %137 = vector.shape_cast %136 : vector<1x2x512xf32> to vector<2x512xf32>
    %c0_38 = arith.constant 0 : index
    %c0_39 = arith.constant 0 : index
    %138 = vector.load %arg1[%c0_38, %c0_39] : memref<128x512xf32, #tpu.memory_space<vmem>>, vector<128x512xf32>
    %cst_40 = arith.constant dense<0.000000e+00> : vector<2x512xf32>
    %139 = tpu.matmul %101, %138, %cst_40 {dimension_numbers = #tpu.dot_dimension_numbers<[1], [0], [0], [1], [0, 0, 1, 1], [], []>} : vector<2x128xf32>, vector<128x512xf32>, vector<2x512xf32> -> vector<2x512xf32>
    %140 = arith.addf %137, %139 : vector<2x512xf32>
    %141 = vector.extract_strided_slice %140 {offsets = [0, 0], sizes = [2, 128], strides = [1, 1]} : vector<2x512xf32> to vector<2x128xf32>
    %142 = arith.negf %141 : vector<2x128xf32>
    %143 = math.exp %142 : vector<2x128xf32>
    %cst_41 = arith.constant 1.000000e+00 : f32
    %144 = vector.broadcast %cst_41 : f32 to vector<2x128xf32>
    %145 = arith.addf %144, %143 : vector<2x128xf32>
    %146 = arith.divf %144, %145 : vector<2x128xf32>
    %147 = vector.extract_strided_slice %140 {offsets = [0, 128], sizes = [2, 128], strides = [1, 1]} : vector<2x512xf32> to vector<2x128xf32>
    %148 = arith.negf %147 : vector<2x128xf32>
    %149 = math.exp %148 : vector<2x128xf32>
    %cst_42 = arith.constant 1.000000e+00 : f32
    %150 = vector.broadcast %cst_42 : f32 to vector<2x128xf32>
    %151 = arith.addf %150, %149 : vector<2x128xf32>
    %152 = arith.divf %150, %151 : vector<2x128xf32>
    %153 = vector.extract_strided_slice %140 {offsets = [0, 256], sizes = [2, 128], strides = [1, 1]} : vector<2x512xf32> to vector<2x128xf32>
    %154 = math.tanh %153 : vector<2x128xf32>
    %155 = vector.extract_strided_slice %140 {offsets = [0, 384], sizes = [2, 128], strides = [1, 1]} : vector<2x512xf32> to vector<2x128xf32>
    %156 = arith.negf %155 : vector<2x128xf32>
    %157 = math.exp %156 : vector<2x128xf32>
    %cst_43 = arith.constant 1.000000e+00 : f32
    %158 = vector.broadcast %cst_43 : f32 to vector<2x128xf32>
    %159 = arith.addf %158, %157 : vector<2x128xf32>
    %160 = arith.divf %158, %159 : vector<2x128xf32>
    %161 = arith.mulf %152, %99 : vector<2x128xf32>
    %162 = arith.mulf %146, %154 : vector<2x128xf32>
    %163 = arith.addf %161, %162 : vector<2x128xf32>
    %164 = math.tanh %163 : vector<2x128xf32>
    %165 = arith.mulf %160, %164 : vector<2x128xf32>
    %166 = tpu.concatenate %165, %130 in 1 : vector<2x128xf32>, vector<2x128xf32> -> vector<2x256xf32>
    %c0_44 = arith.constant 0 : index
    %c0_45 = arith.constant 0 : index
    %167 = vector.load %arg2[%c0_44, %c0_45] : memref<256x512xf32, #tpu.memory_space<vmem>>, vector<256x512xf32>
    %cst_46 = arith.constant dense<0.000000e+00> : vector<2x512xf32>
    %168 = tpu.matmul %166, %167, %cst_46 {dimension_numbers = #tpu.dot_dimension_numbers<[1], [0], [0], [1], [0, 0, 1, 1], [], []>} : vector<2x256xf32>, vector<256x512xf32>, vector<2x512xf32> -> vector<2x512xf32>
    %169 = arith.addf %168, %2 : vector<2x512xf32>
    %170 = vector.extract_strided_slice %169 {offsets = [0, 0], sizes = [2, 128], strides = [1, 1]} : vector<2x512xf32> to vector<2x128xf32>
    %171 = arith.negf %170 : vector<2x128xf32>
    %172 = math.exp %171 : vector<2x128xf32>
    %cst_47 = arith.constant 1.000000e+00 : f32
    %173 = vector.broadcast %cst_47 : f32 to vector<2x128xf32>
    %174 = arith.addf %173, %172 : vector<2x128xf32>
    %175 = arith.divf %173, %174 : vector<2x128xf32>
    %176 = vector.extract_strided_slice %169 {offsets = [0, 128], sizes = [2, 128], strides = [1, 1]} : vector<2x512xf32> to vector<2x128xf32>
    %177 = arith.negf %176 : vector<2x128xf32>
    %178 = math.exp %177 : vector<2x128xf32>
    %cst_48 = arith.constant 1.000000e+00 : f32
    %179 = vector.broadcast %cst_48 : f32 to vector<2x128xf32>
    %180 = arith.addf %179, %178 : vector<2x128xf32>
    %181 = arith.divf %179, %180 : vector<2x128xf32>
    %182 = vector.extract_strided_slice %169 {offsets = [0, 256], sizes = [2, 128], strides = [1, 1]} : vector<2x512xf32> to vector<2x128xf32>
    %183 = math.tanh %182 : vector<2x128xf32>
    %184 = vector.extract_strided_slice %169 {offsets = [0, 384], sizes = [2, 128], strides = [1, 1]} : vector<2x512xf32> to vector<2x128xf32>
    %185 = arith.negf %184 : vector<2x128xf32>
    %186 = math.exp %185 : vector<2x128xf32>
    %cst_49 = arith.constant 1.000000e+00 : f32
    %187 = vector.broadcast %cst_49 : f32 to vector<2x128xf32>
    %188 = arith.addf %187, %186 : vector<2x128xf32>
    %189 = arith.divf %187, %188 : vector<2x128xf32>
    %190 = arith.mulf %181, %128 : vector<2x128xf32>
    %191 = arith.mulf %175, %183 : vector<2x128xf32>
    %192 = arith.addf %190, %191 : vector<2x128xf32>
    %193 = math.tanh %192 : vector<2x128xf32>
    %194 = arith.mulf %189, %193 : vector<2x128xf32>
    %195 = arith.index_cast %c2_i32 : i32 to index
    %c0_50 = arith.constant 0 : index
    %c0_51 = arith.constant 0 : index
    %196 = vector.load %arg6[%195, %c0_50, %c0_51] : memref<8x2x128xf32, #tpu.memory_space<vmem>>, vector<1x2x128xf32>
    %197 = vector.shape_cast %196 : vector<1x2x128xf32> to vector<2x128xf32>
    %198 = vector.shape_cast %194 : vector<2x128xf32> to vector<1x2x128xf32>
    tpu.vector_store %arg6[%195, %c0_50, %c0_51], %198 {strides = array<i32>} : memref<8x2x128xf32, #tpu.memory_space<vmem>>, vector<1x2x128xf32>,
    %c3_i32 = arith.constant 3 : i32
    %199 = arith.index_cast %c3_i32 : i32 to index
    %c0_52 = arith.constant 0 : index
    %c0_53 = arith.constant 0 : index
    %200 = vector.load %arg0[%199, %c0_52, %c0_53] : memref<8x2x512xf32, #tpu.memory_space<vmem>>, vector<1x2x512xf32>
    %201 = vector.shape_cast %200 : vector<1x2x512xf32> to vector<2x512xf32>
    %c0_54 = arith.constant 0 : index
    %c0_55 = arith.constant 0 : index
    %202 = vector.load %arg1[%c0_54, %c0_55] : memref<128x512xf32, #tpu.memory_space<vmem>>, vector<128x512xf32>
    %cst_56 = arith.constant dense<0.000000e+00> : vector<2x512xf32>
    %203 = tpu.matmul %165, %202, %cst_56 {dimension_numbers = #tpu.dot_dimension_numbers<[1], [0], [0], [1], [0, 0, 1, 1], [], []>} : vector<2x128xf32>, vector<128x512xf32>, vector<2x512xf32> -> vector<2x512xf32>
    %204 = arith.addf %201, %203 : vector<2x512xf32>
    %205 = vector.extract_strided_slice %204 {offsets = [0, 0], sizes = [2, 128], strides = [1, 1]} : vector<2x512xf32> to vector<2x128xf32>
    %206 = arith.negf %205 : vector<2x128xf32>
    %207 = math.exp %206 : vector<2x128xf32>
    %cst_57 = arith.constant 1.000000e+00 : f32
    %208 = vector.broadcast %cst_57 : f32 to vector<2x128xf32>
    %209 = arith.addf %208, %207 : vector<2x128xf32>
    %210 = arith.divf %208, %209 : vector<2x128xf32>
    %211 = vector.extract_strided_slice %204 {offsets = [0, 128], sizes = [2, 128], strides = [1, 1]} : vector<2x512xf32> to vector<2x128xf32>
    %212 = arith.negf %211 : vector<2x128xf32>
    %213 = math.exp %212 : vector<2x128xf32>
    %cst_58 = arith.constant 1.000000e+00 : f32
    %214 = vector.broadcast %cst_58 : f32 to vector<2x128xf32>
    %215 = arith.addf %214, %213 : vector<2x128xf32>
    %216 = arith.divf %214, %215 : vector<2x128xf32>
    %217 = vector.extract_strided_slice %204 {offsets = [0, 256], sizes = [2, 128], strides = [1, 1]} : vector<2x512xf32> to vector<2x128xf32>
    %218 = math.tanh %217 : vector<2x128xf32>
    %219 = vector.extract_strided_slice %204 {offsets = [0, 384], sizes = [2, 128], strides = [1, 1]} : vector<2x512xf32> to vector<2x128xf32>
    %220 = arith.negf %219 : vector<2x128xf32>
    %221 = math.exp %220 : vector<2x128xf32>
    %cst_59 = arith.constant 1.000000e+00 : f32
    %222 = vector.broadcast %cst_59 : f32 to vector<2x128xf32>
    %223 = arith.addf %222, %221 : vector<2x128xf32>
    %224 = arith.divf %222, %223 : vector<2x128xf32>
    %225 = arith.mulf %216, %163 : vector<2x128xf32>
    %226 = arith.mulf %210, %218 : vector<2x128xf32>
    %227 = arith.addf %225, %226 : vector<2x128xf32>
    %228 = math.tanh %227 : vector<2x128xf32>
    %229 = arith.mulf %224, %228 : vector<2x128xf32>
    %230 = tpu.concatenate %229, %194 in 1 : vector<2x128xf32>, vector<2x128xf32> -> vector<2x256xf32>
    %c0_60 = arith.constant 0 : index
    %c0_61 = arith.constant 0 : index
    %231 = vector.load %arg2[%c0_60, %c0_61] : memref<256x512xf32, #tpu.memory_space<vmem>>, vector<256x512xf32>
    %cst_62 = arith.constant dense<0.000000e+00> : vector<2x512xf32>
    %232 = tpu.matmul %230, %231, %cst_62 {dimension_numbers = #tpu.dot_dimension_numbers<[1], [0], [0], [1], [0, 0, 1, 1], [], []>} : vector<2x256xf32>, vector<256x512xf32>, vector<2x512xf32> -> vector<2x512xf32>
    %233 = arith.addf %232, %2 : vector<2x512xf32>
    %234 = vector.extract_strided_slice %233 {offsets = [0, 0], sizes = [2, 128], strides = [1, 1]} : vector<2x512xf32> to vector<2x128xf32>
    %235 = arith.negf %234 : vector<2x128xf32>
    %236 = math.exp %235 : vector<2x128xf32>
    %cst_63 = arith.constant 1.000000e+00 : f32
    %237 = vector.broadcast %cst_63 : f32 to vector<2x128xf32>
    %238 = arith.addf %237, %236 : vector<2x128xf32>
    %239 = arith.divf %237, %238 : vector<2x128xf32>
    %240 = vector.extract_strided_slice %233 {offsets = [0, 128], sizes = [2, 128], strides = [1, 1]} : vector<2x512xf32> to vector<2x128xf32>
    %241 = arith.negf %240 : vector<2x128xf32>
    %242 = math.exp %241 : vector<2x128xf32>
    %cst_64 = arith.constant 1.000000e+00 : f32
    %243 = vector.broadcast %cst_64 : f32 to vector<2x128xf32>
    %244 = arith.addf %243, %242 : vector<2x128xf32>
    %245 = arith.divf %243, %244 : vector<2x128xf32>
    %246 = vector.extract_strided_slice %233 {offsets = [0, 256], sizes = [2, 128], strides = [1, 1]} : vector<2x512xf32> to vector<2x128xf32>
    %247 = math.tanh %246 : vector<2x128xf32>
    %248 = vector.extract_strided_slice %233 {offsets = [0, 384], sizes = [2, 128], strides = [1, 1]} : vector<2x512xf32> to vector<2x128xf32>
    %249 = arith.negf %248 : vector<2x128xf32>
    %250 = math.exp %249 : vector<2x128xf32>
    %cst_65 = arith.constant 1.000000e+00 : f32
    %251 = vector.broadcast %cst_65 : f32 to vector<2x128xf32>
    %252 = arith.addf %251, %250 : vector<2x128xf32>
    %253 = arith.divf %251, %252 : vector<2x128xf32>
    %254 = arith.mulf %245, %192 : vector<2x128xf32>
    %255 = arith.mulf %239, %247 : vector<2x128xf32>
    %256 = arith.addf %254, %255 : vector<2x128xf32>
    %257 = math.tanh %256 : vector<2x128xf32>
    %258 = arith.mulf %253, %257 : vector<2x128xf32>
    %259 = arith.index_cast %c3_i32 : i32 to index
    %c0_66 = arith.constant 0 : index
    %c0_67 = arith.constant 0 : index
    %260 = vector.load %arg6[%259, %c0_66, %c0_67] : memref<8x2x128xf32, #tpu.memory_space<vmem>>, vector<1x2x128xf32>
    %261 = vector.shape_cast %260 : vector<1x2x128xf32> to vector<2x128xf32>
    %262 = vector.shape_cast %258 : vector<2x128xf32> to vector<1x2x128xf32>
    tpu.vector_store %arg6[%259, %c0_66, %c0_67], %262 {strides = array<i32>} : memref<8x2x128xf32, #tpu.memory_space<vmem>>, vector<1x2x128xf32>,
    %c4_i32 = arith.constant 4 : i32
    %263 = arith.index_cast %c4_i32 : i32 to index
    %c0_68 = arith.constant 0 : index
    %c0_69 = arith.constant 0 : index
    %264 = vector.load %arg0[%263, %c0_68, %c0_69] : memref<8x2x512xf32, #tpu.memory_space<vmem>>, vector<1x2x512xf32>
    %265 = vector.shape_cast %264 : vector<1x2x512xf32> to vector<2x512xf32>
    %c0_70 = arith.constant 0 : index
    %c0_71 = arith.constant 0 : index
    %266 = vector.load %arg1[%c0_70, %c0_71] : memref<128x512xf32, #tpu.memory_space<vmem>>, vector<128x512xf32>
    %cst_72 = arith.constant dense<0.000000e+00> : vector<2x512xf32>
    %267 = tpu.matmul %229, %266, %cst_72 {dimension_numbers = #tpu.dot_dimension_numbers<[1], [0], [0], [1], [0, 0, 1, 1], [], []>} : vector<2x128xf32>, vector<128x512xf32>, vector<2x512xf32> -> vector<2x512xf32>
    %268 = arith.addf %265, %267 : vector<2x512xf32>
    %269 = vector.extract_strided_slice %268 {offsets = [0, 0], sizes = [2, 128], strides = [1, 1]} : vector<2x512xf32> to vector<2x128xf32>
    %270 = arith.negf %269 : vector<2x128xf32>
    %271 = math.exp %270 : vector<2x128xf32>
    %cst_73 = arith.constant 1.000000e+00 : f32
    %272 = vector.broadcast %cst_73 : f32 to vector<2x128xf32>
    %273 = arith.addf %272, %271 : vector<2x128xf32>
    %274 = arith.divf %272, %273 : vector<2x128xf32>
    %275 = vector.extract_strided_slice %268 {offsets = [0, 128], sizes = [2, 128], strides = [1, 1]} : vector<2x512xf32> to vector<2x128xf32>
    %276 = arith.negf %275 : vector<2x128xf32>
    %277 = math.exp %276 : vector<2x128xf32>
    %cst_74 = arith.constant 1.000000e+00 : f32
    %278 = vector.broadcast %cst_74 : f32 to vector<2x128xf32>
    %279 = arith.addf %278, %277 : vector<2x128xf32>
    %280 = arith.divf %278, %279 : vector<2x128xf32>
    %281 = vector.extract_strided_slice %268 {offsets = [0, 256], sizes = [2, 128], strides = [1, 1]} : vector<2x512xf32> to vector<2x128xf32>
    %282 = math.tanh %281 : vector<2x128xf32>
    %283 = vector.extract_strided_slice %268 {offsets = [0, 384], sizes = [2, 128], strides = [1, 1]} : vector<2x512xf32> to vector<2x128xf32>
    %284 = arith.negf %283 : vector<2x128xf32>
    %285 = math.exp %284 : vector<2x128xf32>
    %cst_75 = arith.constant 1.000000e+00 : f32
    %286 = vector.broadcast %cst_75 : f32 to vector<2x128xf32>
    %287 = arith.addf %286, %285 : vector<2x128xf32>
    %288 = arith.divf %286, %287 : vector<2x128xf32>
    %289 = arith.mulf %280, %227 : vector<2x128xf32>
    %290 = arith.mulf %274, %282 : vector<2x128xf32>
    %291 = arith.addf %289, %290 : vector<2x128xf32>
    %292 = math.tanh %291 : vector<2x128xf32>
    %293 = arith.mulf %288, %292 : vector<2x128xf32>
    %294 = tpu.concatenate %293, %258 in 1 : vector<2x128xf32>, vector<2x128xf32> -> vector<2x256xf32>
    %c0_76 = arith.constant 0 : index
    %c0_77 = arith.constant 0 : index
    %295 = vector.load %arg2[%c0_76, %c0_77] : memref<256x512xf32, #tpu.memory_space<vmem>>, vector<256x512xf32>
    %cst_78 = arith.constant dense<0.000000e+00> : vector<2x512xf32>
    %296 = tpu.matmul %294, %295, %cst_78 {dimension_numbers = #tpu.dot_dimension_numbers<[1], [0], [0], [1], [0, 0, 1, 1], [], []>} : vector<2x256xf32>, vector<256x512xf32>, vector<2x512xf32> -> vector<2x512xf32>
    %297 = arith.addf %296, %2 : vector<2x512xf32>
    %298 = vector.extract_strided_slice %297 {offsets = [0, 0], sizes = [2, 128], strides = [1, 1]} : vector<2x512xf32> to vector<2x128xf32>
    %299 = arith.negf %298 : vector<2x128xf32>
    %300 = math.exp %299 : vector<2x128xf32>
    %cst_79 = arith.constant 1.000000e+00 : f32
    %301 = vector.broadcast %cst_79 : f32 to vector<2x128xf32>
    %302 = arith.addf %301, %300 : vector<2x128xf32>
    %303 = arith.divf %301, %302 : vector<2x128xf32>
    %304 = vector.extract_strided_slice %297 {offsets = [0, 128], sizes = [2, 128], strides = [1, 1]} : vector<2x512xf32> to vector<2x128xf32>
    %305 = arith.negf %304 : vector<2x128xf32>
    %306 = math.exp %305 : vector<2x128xf32>
    %cst_80 = arith.constant 1.000000e+00 : f32
    %307 = vector.broadcast %cst_80 : f32 to vector<2x128xf32>
    %308 = arith.addf %307, %306 : vector<2x128xf32>
    %309 = arith.divf %307, %308 : vector<2x128xf32>
    %310 = vector.extract_strided_slice %297 {offsets = [0, 256], sizes = [2, 128], strides = [1, 1]} : vector<2x512xf32> to vector<2x128xf32>
    %311 = math.tanh %310 : vector<2x128xf32>
    %312 = vector.extract_strided_slice %297 {offsets = [0, 384], sizes = [2, 128], strides = [1, 1]} : vector<2x512xf32> to vector<2x128xf32>
    %313 = arith.negf %312 : vector<2x128xf32>
    %314 = math.exp %313 : vector<2x128xf32>
    %cst_81 = arith.constant 1.000000e+00 : f32
    %315 = vector.broadcast %cst_81 : f32 to vector<2x128xf32>
    %316 = arith.addf %315, %314 : vector<2x128xf32>
    %317 = arith.divf %315, %316 : vector<2x128xf32>
    %318 = arith.mulf %309, %256 : vector<2x128xf32>
    %319 = arith.mulf %303, %311 : vector<2x128xf32>
    %320 = arith.addf %318, %319 : vector<2x128xf32>
    %321 = math.tanh %320 : vector<2x128xf32>
    %322 = arith.mulf %317, %321 : vector<2x128xf32>
    %323 = arith.index_cast %c4_i32 : i32 to index
    %c0_82 = arith.constant 0 : index
    %c0_83 = arith.constant 0 : index
    %324 = vector.load %arg6[%323, %c0_82, %c0_83] : memref<8x2x128xf32, #tpu.memory_space<vmem>>, vector<1x2x128xf32>
    %325 = vector.shape_cast %324 : vector<1x2x128xf32> to vector<2x128xf32>
    %326 = vector.shape_cast %322 : vector<2x128xf32> to vector<1x2x128xf32>
    tpu.vector_store %arg6[%323, %c0_82, %c0_83], %326 {strides = array<i32>} : memref<8x2x128xf32, #tpu.memory_space<vmem>>, vector<1x2x128xf32>,
    %c5_i32 = arith.constant 5 : i32
    %327 = arith.index_cast %c5_i32 : i32 to index
    %c0_84 = arith.constant 0 : index
    %c0_85 = arith.constant 0 : index
    %328 = vector.load %arg0[%327, %c0_84, %c0_85] : memref<8x2x512xf32, #tpu.memory_space<vmem>>, vector<1x2x512xf32>
    %329 = vector.shape_cast %328 : vector<1x2x512xf32> to vector<2x512xf32>
    %c0_86 = arith.constant 0 : index
    %c0_87 = arith.constant 0 : index
    %330 = vector.load %arg1[%c0_86, %c0_87] : memref<128x512xf32, #tpu.memory_space<vmem>>, vector<128x512xf32>
    %cst_88 = arith.constant dense<0.000000e+00> : vector<2x512xf32>
    %331 = tpu.matmul %293, %330, %cst_88 {dimension_numbers = #tpu.dot_dimension_numbers<[1], [0], [0], [1], [0, 0, 1, 1], [], []>} : vector<2x128xf32>, vector<128x512xf32>, vector<2x512xf32> -> vector<2x512xf32>
    %332 = arith.addf %329, %331 : vector<2x512xf32>
    %333 = vector.extract_strided_slice %332 {offsets = [0, 0], sizes = [2, 128], strides = [1, 1]} : vector<2x512xf32> to vector<2x128xf32>
    %334 = arith.negf %333 : vector<2x128xf32>
    %335 = math.exp %334 : vector<2x128xf32>
    %cst_89 = arith.constant 1.000000e+00 : f32
    %336 = vector.broadcast %cst_89 : f32 to vector<2x128xf32>
    %337 = arith.addf %336, %335 : vector<2x128xf32>
    %338 = arith.divf %336, %337 : vector<2x128xf32>
    %339 = vector.extract_strided_slice %332 {offsets = [0, 128], sizes = [2, 128], strides = [1, 1]} : vector<2x512xf32> to vector<2x128xf32>
    %340 = arith.negf %339 : vector<2x128xf32>
    %341 = math.exp %340 : vector<2x128xf32>
    %cst_90 = arith.constant 1.000000e+00 : f32
    %342 = vector.broadcast %cst_90 : f32 to vector<2x128xf32>
    %343 = arith.addf %342, %341 : vector<2x128xf32>
    %344 = arith.divf %342, %343 : vector<2x128xf32>
    %345 = vector.extract_strided_slice %332 {offsets = [0, 256], sizes = [2, 128], strides = [1, 1]} : vector<2x512xf32> to vector<2x128xf32>
    %346 = math.tanh %345 : vector<2x128xf32>
    %347 = vector.extract_strided_slice %332 {offsets = [0, 384], sizes = [2, 128], strides = [1, 1]} : vector<2x512xf32> to vector<2x128xf32>
    %348 = arith.negf %347 : vector<2x128xf32>
    %349 = math.exp %348 : vector<2x128xf32>
    %cst_91 = arith.constant 1.000000e+00 : f32
    %350 = vector.broadcast %cst_91 : f32 to vector<2x128xf32>
    %351 = arith.addf %350, %349 : vector<2x128xf32>
    %352 = arith.divf %350, %351 : vector<2x128xf32>
    %353 = arith.mulf %344, %291 : vector<2x128xf32>
    %354 = arith.mulf %338, %346 : vector<2x128xf32>
    %355 = arith.addf %353, %354 : vector<2x128xf32>
    %356 = math.tanh %355 : vector<2x128xf32>
    %357 = arith.mulf %352, %356 : vector<2x128xf32>
    %358 = tpu.concatenate %357, %322 in 1 : vector<2x128xf32>, vector<2x128xf32> -> vector<2x256xf32>
    %c0_92 = arith.constant 0 : index
    %c0_93 = arith.constant 0 : index
    %359 = vector.load %arg2[%c0_92, %c0_93] : memref<256x512xf32, #tpu.memory_space<vmem>>, vector<256x512xf32>
    %cst_94 = arith.constant dense<0.000000e+00> : vector<2x512xf32>
    %360 = tpu.matmul %358, %359, %cst_94 {dimension_numbers = #tpu.dot_dimension_numbers<[1], [0], [0], [1], [0, 0, 1, 1], [], []>} : vector<2x256xf32>, vector<256x512xf32>, vector<2x512xf32> -> vector<2x512xf32>
    %361 = arith.addf %360, %2 : vector<2x512xf32>
    %362 = vector.extract_strided_slice %361 {offsets = [0, 0], sizes = [2, 128], strides = [1, 1]} : vector<2x512xf32> to vector<2x128xf32>
    %363 = arith.negf %362 : vector<2x128xf32>
    %364 = math.exp %363 : vector<2x128xf32>
    %cst_95 = arith.constant 1.000000e+00 : f32
    %365 = vector.broadcast %cst_95 : f32 to vector<2x128xf32>
    %366 = arith.addf %365, %364 : vector<2x128xf32>
    %367 = arith.divf %365, %366 : vector<2x128xf32>
    %368 = vector.extract_strided_slice %361 {offsets = [0, 128], sizes = [2, 128], strides = [1, 1]} : vector<2x512xf32> to vector<2x128xf32>
    %369 = arith.negf %368 : vector<2x128xf32>
    %370 = math.exp %369 : vector<2x128xf32>
    %cst_96 = arith.constant 1.000000e+00 : f32
    %371 = vector.broadcast %cst_96 : f32 to vector<2x128xf32>
    %372 = arith.addf %371, %370 : vector<2x128xf32>
    %373 = arith.divf %371, %372 : vector<2x128xf32>
    %374 = vector.extract_strided_slice %361 {offsets = [0, 256], sizes = [2, 128], strides = [1, 1]} : vector<2x512xf32> to vector<2x128xf32>
    %375 = math.tanh %374 : vector<2x128xf32>
    %376 = vector.extract_strided_slice %361 {offsets = [0, 384], sizes = [2, 128], strides = [1, 1]} : vector<2x512xf32> to vector<2x128xf32>
    %377 = arith.negf %376 : vector<2x128xf32>
    %378 = math.exp %377 : vector<2x128xf32>
    %cst_97 = arith.constant 1.000000e+00 : f32
    %379 = vector.broadcast %cst_97 : f32 to vector<2x128xf32>
    %380 = arith.addf %379, %378 : vector<2x128xf32>
    %381 = arith.divf %379, %380 : vector<2x128xf32>
    %382 = arith.mulf %373, %320 : vector<2x128xf32>
    %383 = arith.mulf %367, %375 : vector<2x128xf32>
    %384 = arith.addf %382, %383 : vector<2x128xf32>
    %385 = math.tanh %384 : vector<2x128xf32>
    %386 = arith.mulf %381, %385 : vector<2x128xf32>
    %387 = arith.index_cast %c5_i32 : i32 to index
    %c0_98 = arith.constant 0 : index
    %c0_99 = arith.constant 0 : index
    %388 = vector.load %arg6[%387, %c0_98, %c0_99] : memref<8x2x128xf32, #tpu.memory_space<vmem>>, vector<1x2x128xf32>
    %389 = vector.shape_cast %388 : vector<1x2x128xf32> to vector<2x128xf32>
    %390 = vector.shape_cast %386 : vector<2x128xf32> to vector<1x2x128xf32>
    tpu.vector_store %arg6[%387, %c0_98, %c0_99], %390 {strides = array<i32>} : memref<8x2x128xf32, #tpu.memory_space<vmem>>, vector<1x2x128xf32>,
    %c6_i32 = arith.constant 6 : i32
    %391 = arith.index_cast %c6_i32 : i32 to index
    %c0_100 = arith.constant 0 : index
    %c0_101 = arith.constant 0 : index
    %392 = vector.load %arg0[%391, %c0_100, %c0_101] : memref<8x2x512xf32, #tpu.memory_space<vmem>>, vector<1x2x512xf32>
    %393 = vector.shape_cast %392 : vector<1x2x512xf32> to vector<2x512xf32>
    %c0_102 = arith.constant 0 : index
    %c0_103 = arith.constant 0 : index
    %394 = vector.load %arg1[%c0_102, %c0_103] : memref<128x512xf32, #tpu.memory_space<vmem>>, vector<128x512xf32>
    %cst_104 = arith.constant dense<0.000000e+00> : vector<2x512xf32>
    %395 = tpu.matmul %357, %394, %cst_104 {dimension_numbers = #tpu.dot_dimension_numbers<[1], [0], [0], [1], [0, 0, 1, 1], [], []>} : vector<2x128xf32>, vector<128x512xf32>, vector<2x512xf32> -> vector<2x512xf32>
    %396 = arith.addf %393, %395 : vector<2x512xf32>
    %397 = vector.extract_strided_slice %396 {offsets = [0, 0], sizes = [2, 128], strides = [1, 1]} : vector<2x512xf32> to vector<2x128xf32>
    %398 = arith.negf %397 : vector<2x128xf32>
    %399 = math.exp %398 : vector<2x128xf32>
    %cst_105 = arith.constant 1.000000e+00 : f32
    %400 = vector.broadcast %cst_105 : f32 to vector<2x128xf32>
    %401 = arith.addf %400, %399 : vector<2x128xf32>
    %402 = arith.divf %400, %401 : vector<2x128xf32>
    %403 = vector.extract_strided_slice %396 {offsets = [0, 128], sizes = [2, 128], strides = [1, 1]} : vector<2x512xf32> to vector<2x128xf32>
    %404 = arith.negf %403 : vector<2x128xf32>
    %405 = math.exp %404 : vector<2x128xf32>
    %cst_106 = arith.constant 1.000000e+00 : f32
    %406 = vector.broadcast %cst_106 : f32 to vector<2x128xf32>
    %407 = arith.addf %406, %405 : vector<2x128xf32>
    %408 = arith.divf %406, %407 : vector<2x128xf32>
    %409 = vector.extract_strided_slice %396 {offsets = [0, 256], sizes = [2, 128], strides = [1, 1]} : vector<2x512xf32> to vector<2x128xf32>
    %410 = math.tanh %409 : vector<2x128xf32>
    %411 = vector.extract_strided_slice %396 {offsets = [0, 384], sizes = [2, 128], strides = [1, 1]} : vector<2x512xf32> to vector<2x128xf32>
    %412 = arith.negf %411 : vector<2x128xf32>
    %413 = math.exp %412 : vector<2x128xf32>
    %cst_107 = arith.constant 1.000000e+00 : f32
    %414 = vector.broadcast %cst_107 : f32 to vector<2x128xf32>
    %415 = arith.addf %414, %413 : vector<2x128xf32>
    %416 = arith.divf %414, %415 : vector<2x128xf32>
    %417 = arith.mulf %408, %355 : vector<2x128xf32>
    %418 = arith.mulf %402, %410 : vector<2x128xf32>
    %419 = arith.addf %417, %418 : vector<2x128xf32>
    %420 = math.tanh %419 : vector<2x128xf32>
    %421 = arith.mulf %416, %420 : vector<2x128xf32>
    %422 = tpu.concatenate %421, %386 in 1 : vector<2x128xf32>, vector<2x128xf32> -> vector<2x256xf32>
    %c0_108 = arith.constant 0 : index
    %c0_109 = arith.constant 0 : index
    %423 = vector.load %arg2[%c0_108, %c0_109] : memref<256x512xf32, #tpu.memory_space<vmem>>, vector<256x512xf32>
    %cst_110 = arith.constant dense<0.000000e+00> : vector<2x512xf32>
    %424 = tpu.matmul %422, %423, %cst_110 {dimension_numbers = #tpu.dot_dimension_numbers<[1], [0], [0], [1], [0, 0, 1, 1], [], []>} : vector<2x256xf32>, vector<256x512xf32>, vector<2x512xf32> -> vector<2x512xf32>
    %425 = arith.addf %424, %2 : vector<2x512xf32>
    %426 = vector.extract_strided_slice %425 {offsets = [0, 0], sizes = [2, 128], strides = [1, 1]} : vector<2x512xf32> to vector<2x128xf32>
    %427 = arith.negf %426 : vector<2x128xf32>
    %428 = math.exp %427 : vector<2x128xf32>
    %cst_111 = arith.constant 1.000000e+00 : f32
    %429 = vector.broadcast %cst_111 : f32 to vector<2x128xf32>
    %430 = arith.addf %429, %428 : vector<2x128xf32>
    %431 = arith.divf %429, %430 : vector<2x128xf32>
    %432 = vector.extract_strided_slice %425 {offsets = [0, 128], sizes = [2, 128], strides = [1, 1]} : vector<2x512xf32> to vector<2x128xf32>
    %433 = arith.negf %432 : vector<2x128xf32>
    %434 = math.exp %433 : vector<2x128xf32>
    %cst_112 = arith.constant 1.000000e+00 : f32
    %435 = vector.broadcast %cst_112 : f32 to vector<2x128xf32>
    %436 = arith.addf %435, %434 : vector<2x128xf32>
    %437 = arith.divf %435, %436 : vector<2x128xf32>
    %438 = vector.extract_strided_slice %425 {offsets = [0, 256], sizes = [2, 128], strides = [1, 1]} : vector<2x512xf32> to vector<2x128xf32>
    %439 = math.tanh %438 : vector<2x128xf32>
    %440 = vector.extract_strided_slice %425 {offsets = [0, 384], sizes = [2, 128], strides = [1, 1]} : vector<2x512xf32> to vector<2x128xf32>
    %441 = arith.negf %440 : vector<2x128xf32>
    %442 = math.exp %441 : vector<2x128xf32>
    %cst_113 = arith.constant 1.000000e+00 : f32
    %443 = vector.broadcast %cst_113 : f32 to vector<2x128xf32>
    %444 = arith.addf %443, %442 : vector<2x128xf32>
    %445 = arith.divf %443, %444 : vector<2x128xf32>
    %446 = arith.mulf %437, %384 : vector<2x128xf32>
    %447 = arith.mulf %431, %439 : vector<2x128xf32>
    %448 = arith.addf %446, %447 : vector<2x128xf32>
    %449 = math.tanh %448 : vector<2x128xf32>
    %450 = arith.mulf %445, %449 : vector<2x128xf32>
    %451 = arith.index_cast %c6_i32 : i32 to index
    %c0_114 = arith.constant 0 : index
    %c0_115 = arith.constant 0 : index
    %452 = vector.load %arg6[%451, %c0_114, %c0_115] : memref<8x2x128xf32, #tpu.memory_space<vmem>>, vector<1x2x128xf32>
    %453 = vector.shape_cast %452 : vector<1x2x128xf32> to vector<2x128xf32>
    %454 = vector.shape_cast %450 : vector<2x128xf32> to vector<1x2x128xf32>
    tpu.vector_store %arg6[%451, %c0_114, %c0_115], %454 {strides = array<i32>} : memref<8x2x128xf32, #tpu.memory_space<vmem>>, vector<1x2x128xf32>,
    %c7_i32 = arith.constant 7 : i32
    %455 = arith.index_cast %c7_i32 : i32 to index
    %c0_116 = arith.constant 0 : index
    %c0_117 = arith.constant 0 : index
    %456 = vector.load %arg0[%455, %c0_116, %c0_117] : memref<8x2x512xf32, #tpu.memory_space<vmem>>, vector<1x2x512xf32>
    %457 = vector.shape_cast %456 : vector<1x2x512xf32> to vector<2x512xf32>
    %c0_118 = arith.constant 0 : index
    %c0_119 = arith.constant 0 : index
    %458 = vector.load %arg1[%c0_118, %c0_119] : memref<128x512xf32, #tpu.memory_space<vmem>>, vector<128x512xf32>
    %cst_120 = arith.constant dense<0.000000e+00> : vector<2x512xf32>
    %459 = tpu.matmul %421, %458, %cst_120 {dimension_numbers = #tpu.dot_dimension_numbers<[1], [0], [0], [1], [0, 0, 1, 1], [], []>} : vector<2x128xf32>, vector<128x512xf32>, vector<2x512xf32> -> vector<2x512xf32>
    %460 = arith.addf %457, %459 : vector<2x512xf32>
    %461 = vector.extract_strided_slice %460 {offsets = [0, 0], sizes = [2, 128], strides = [1, 1]} : vector<2x512xf32> to vector<2x128xf32>
    %462 = arith.negf %461 : vector<2x128xf32>
    %463 = math.exp %462 : vector<2x128xf32>
    %cst_121 = arith.constant 1.000000e+00 : f32
    %464 = vector.broadcast %cst_121 : f32 to vector<2x128xf32>
    %465 = arith.addf %464, %463 : vector<2x128xf32>
    %466 = arith.divf %464, %465 : vector<2x128xf32>
    %467 = vector.extract_strided_slice %460 {offsets = [0, 128], sizes = [2, 128], strides = [1, 1]} : vector<2x512xf32> to vector<2x128xf32>
    %468 = arith.negf %467 : vector<2x128xf32>
    %469 = math.exp %468 : vector<2x128xf32>
    %cst_122 = arith.constant 1.000000e+00 : f32
    %470 = vector.broadcast %cst_122 : f32 to vector<2x128xf32>
    %471 = arith.addf %470, %469 : vector<2x128xf32>
    %472 = arith.divf %470, %471 : vector<2x128xf32>
    %473 = vector.extract_strided_slice %460 {offsets = [0, 256], sizes = [2, 128], strides = [1, 1]} : vector<2x512xf32> to vector<2x128xf32>
    %474 = math.tanh %473 : vector<2x128xf32>
    %475 = vector.extract_strided_slice %460 {offsets = [0, 384], sizes = [2, 128], strides = [1, 1]} : vector<2x512xf32> to vector<2x128xf32>
    %476 = arith.negf %475 : vector<2x128xf32>
    %477 = math.exp %476 : vector<2x128xf32>
    %cst_123 = arith.constant 1.000000e+00 : f32
    %478 = vector.broadcast %cst_123 : f32 to vector<2x128xf32>
    %479 = arith.addf %478, %477 : vector<2x128xf32>
    %480 = arith.divf %478, %479 : vector<2x128xf32>
    %481 = arith.mulf %472, %419 : vector<2x128xf32>
    %482 = arith.mulf %466, %474 : vector<2x128xf32>
    %483 = arith.addf %481, %482 : vector<2x128xf32>
    %484 = math.tanh %483 : vector<2x128xf32>
    %485 = arith.mulf %480, %484 : vector<2x128xf32>
    %486 = tpu.concatenate %485, %450 in 1 : vector<2x128xf32>, vector<2x128xf32> -> vector<2x256xf32>
    %c0_124 = arith.constant 0 : index
    %c0_125 = arith.constant 0 : index
    %487 = vector.load %arg2[%c0_124, %c0_125] : memref<256x512xf32, #tpu.memory_space<vmem>>, vector<256x512xf32>
    %cst_126 = arith.constant dense<0.000000e+00> : vector<2x512xf32>
    %488 = tpu.matmul %486, %487, %cst_126 {dimension_numbers = #tpu.dot_dimension_numbers<[1], [0], [0], [1], [0, 0, 1, 1], [], []>} : vector<2x256xf32>, vector<256x512xf32>, vector<2x512xf32> -> vector<2x512xf32>
    %489 = arith.addf %488, %2 : vector<2x512xf32>
    %490 = vector.extract_strided_slice %489 {offsets = [0, 0], sizes = [2, 128], strides = [1, 1]} : vector<2x512xf32> to vector<2x128xf32>
    %491 = arith.negf %490 : vector<2x128xf32>
    %492 = math.exp %491 : vector<2x128xf32>
    %cst_127 = arith.constant 1.000000e+00 : f32
    %493 = vector.broadcast %cst_127 : f32 to vector<2x128xf32>
    %494 = arith.addf %493, %492 : vector<2x128xf32>
    %495 = arith.divf %493, %494 : vector<2x128xf32>
    %496 = vector.extract_strided_slice %489 {offsets = [0, 128], sizes = [2, 128], strides = [1, 1]} : vector<2x512xf32> to vector<2x128xf32>
    %497 = arith.negf %496 : vector<2x128xf32>
    %498 = math.exp %497 : vector<2x128xf32>
    %cst_128 = arith.constant 1.000000e+00 : f32
    %499 = vector.broadcast %cst_128 : f32 to vector<2x128xf32>
    %500 = arith.addf %499, %498 : vector<2x128xf32>
    %501 = arith.divf %499, %500 : vector<2x128xf32>
    %502 = vector.extract_strided_slice %489 {offsets = [0, 256], sizes = [2, 128], strides = [1, 1]} : vector<2x512xf32> to vector<2x128xf32>
    %503 = math.tanh %502 : vector<2x128xf32>
    %504 = vector.extract_strided_slice %489 {offsets = [0, 384], sizes = [2, 128], strides = [1, 1]} : vector<2x512xf32> to vector<2x128xf32>
    %505 = arith.negf %504 : vector<2x128xf32>
    %506 = math.exp %505 : vector<2x128xf32>
    %cst_129 = arith.constant 1.000000e+00 : f32
    %507 = vector.broadcast %cst_129 : f32 to vector<2x128xf32>
    %508 = arith.addf %507, %506 : vector<2x128xf32>
    %509 = arith.divf %507, %508 : vector<2x128xf32>
    %510 = arith.mulf %501, %448 : vector<2x128xf32>
    %511 = arith.mulf %495, %503 : vector<2x128xf32>
    %512 = arith.addf %510, %511 : vector<2x128xf32>
    %513 = math.tanh %512 : vector<2x128xf32>
    %514 = arith.mulf %509, %513 : vector<2x128xf32>
    %515 = arith.index_cast %c7_i32 : i32 to index
    %c0_130 = arith.constant 0 : index
    %c0_131 = arith.constant 0 : index
    %516 = vector.load %arg6[%515, %c0_130, %c0_131] : memref<8x2x128xf32, #tpu.memory_space<vmem>>, vector<1x2x128xf32>
    %517 = vector.shape_cast %516 : vector<1x2x128xf32> to vector<2x128xf32>
    %518 = vector.shape_cast %514 : vector<2x128xf32> to vector<1x2x128xf32>
    tpu.vector_store %arg6[%515, %c0_130, %c0_131], %518 {strides = array<i32>} : memref<8x2x128xf32, #tpu.memory_space<vmem>>, vector<1x2x128xf32>,
    %c8_i32 = arith.constant 8 : i32
    return
  }
}

</mosaic_0001>

<bundles_post_ra>
// kernel: tpu_custom_call.1
= control target key start
LH: loop header
LB: loop body
LE: loop exit
PB: predicated region body
PF: predicated region fallthrough
CT: control target
= control target key end

     0   :  { %11 = vsyncpa [#allocation3], 0  ;;  %s8375_s0 = inlined_call_operand.hbm [shape: f32[8,2,512], index: 0, kind: input, shape index: {}]   ;;  %s8376_s1 = inlined_call_operand.hbm [shape: f32[128,512], index: 1, kind: input, shape index: {}]   ;;  %s8377_s2 = inlined_call_operand.hbm [shape: f32[256,512], index: 2, kind: input, shape index: {}]   ;;  %s8378_s3 = inlined_call_operand.vmem [shape: f32[1,512], index: 3, kind: input, shape index: {}]   ;;  %s8379_s4 = inlined_call_operand.hbm [shape: f32[128,512], index: 4, kind: input, shape index: {}]   ;;  %s8380_s5 = inlined_call_operand.vmem [shape: f32[1,512], index: 5, kind: input, shape index: {}]   ;;  %s8381_s6 = inlined_call_operand.hbm [shape: f32[8,2,128], index: 6, kind: output, shape index: {}]  }
   0x1   :  { %12 = vsyncpa [#allocation6], 0 }
   0x2   :  { %13 = vsyncpa [#allocation9], 0 }
   0x3   :  { %14 = vsyncpa [#allocation4], 0  ;;  %s6552_s21 = smov [#allocation5]   ;;  %s6434_s25 = scalar_lea.hbm %s8376_s1, 8192 }
   0x4   :  { %s32_s22 = sshll.u32 %s6552_s21, 4  ;;  %p6435_p0 = scmp.ne.s32.totalorder %s8376_s1, %s6434_s25  ;;  %s33_s22 = int_to_ptr.vmem [resolvable:$true] %s32_s22 }
   0x5   :  { %p6438_p1 = scmp.lt.u32.totalorder %s6434_s25, %s8376_s1 }
   0x7   :  { %p6440_p2 = pnand %p6438_p1, %p6435_p0 }
   0x9   :  { %6443 = shalt.err (!%p6440_p2)
}
   0xa   :  { %s6444_s29 = scalar_lea.vmem %s33_s22, 8192  ;;  %p6449_p4 = scmp.lt.s32.totalorder %s33_s22, %s33_s22 }
   0xb   :  { %p6445_p3 = scmp.ne.s32.totalorder %s33_s22, %s6444_s29  ;;  %p6450_p5 = scmp.lt.s32.totalorder %s6444_s29, %s6444_s29 }
   0xd   :  { %p6451_p6 = por %p6450_p5, %p6449_p4 }
   0xf   :  { %p6452_p7 = pnand %p6451_p6, %p6445_p3 }
  0x11   :  { %6455 = shalt.err (!%p6452_p7)
}
  0x12   :  { %s6553_s30 = smov 512   ;;  %s6554_s7 = smov 32  }
  0x13   :  { %38 = dma.hbm_to_vmem [thread:$0]  %s8376_s1, 8192, %s33_s22, [#allocation6], %s6553_s30, %s6553_s30, %s6554_s7  }
  0x14   :  { %s6555_s10 = smov [#allocation2]   ;;  %s6456_s14 = scalar_lea.hbm %s8375_s0, 1024 }
  0x15   :  { %s20_s11 = sshll.u32 %s6555_s10, 4  ;;  %p6457_p8 = scmp.ne.s32.totalorder %s8375_s0, %s6456_s14  ;;  %s21_s11 = int_to_ptr.vmem [resolvable:$true] %s20_s11 }
  0x16   :  { %p6460_p9 = scmp.lt.u32.totalorder %s6456_s14, %s8375_s0 }
  0x18   :  { %p6462_p10 = pnand %p6460_p9, %p6457_p8 }
  0x1a   :  { %6465 = shalt.err (!%p6462_p10)
}
  0x1b   :  { %s6466_s19 = scalar_lea.vmem %s21_s11, 1024  ;;  %p6471_p12 = scmp.lt.s32.totalorder %s21_s11, %s21_s11 }
  0x1c   :  { %p6467_p11 = scmp.ne.s32.totalorder %s21_s11, %s6466_s19  ;;  %p6472_p13 = scmp.lt.s32.totalorder %s6466_s19, %s6466_s19 }
  0x1e   :  { %p6473_p0 = por %p6472_p13, %p6471_p12 }
  0x20   :  { %p6474_p1 = pnand %p6473_p0, %p6467_p11 }
  0x22   :  { %6477 = shalt.err (!%p6474_p1)
}
  0x23   :  { %s6556_s1 = smov 128   ;;  %s6557_s20 = smov 8  }
  0x24   :  { %26 = dma.hbm_to_vmem [thread:$0]  %s8375_s0, 1024, %s21_s11, [#allocation3], %s6556_s1, %s6556_s1, %s6557_s20  }
  0x25   :  { %s6558_s23 = smov [#allocation7]   ;;  %s6559_s25 = smov [#allocation8]  }
  0x26   :  { %s44_s24 = sshll.u32 %s6558_s23, 4  ;;  %s58_s26 = sshll.u32 %s6559_s25, 4  ;;  %s45_s24 = int_to_ptr.vmem [resolvable:$true] %s44_s24  ;;  %s6626_s26 = int_to_ptr.vmem [resolvable:$true] %s58_s26 }
  0x27   :  { %s6478_s5 = scalar_lea.hbm %s8377_s2, 16384 }
  0x28   :  { %p6479_p2 = scmp.ne.s32.totalorder %s8377_s2, %s6478_s5  ;;  %p6482_p3 = scmp.lt.u32.totalorder %s6478_s5, %s8377_s2 }
  0x2a   :  { %p6484_p4 = pnand %p6482_p3, %p6479_p2 }
  0x2c   :  { %6487 = shalt.err (!%p6484_p4)
}
  0x2d   :  { %s6488_s0 = scalar_lea.vmem %s45_s24, 16384  ;;  %p6493_p6 = scmp.lt.s32.totalorder %s45_s24, %s45_s24 }
  0x2e   :  { %p6489_p5 = scmp.ne.s32.totalorder %s45_s24, %s6488_s0  ;;  %p6494_p7 = scmp.lt.s32.totalorder %s6488_s0, %s6488_s0 }
  0x30   :  { %p6495_p8 = por %p6494_p7, %p6493_p6 }
  0x32   :  { %p6496_p9 = pnand %p6495_p8, %p6489_p5 }
  0x34   :  { %6499 = shalt.err (!%p6496_p9)
}
  0x35   :  { %50 = dma.hbm_to_vmem [thread:$0]  %s8377_s2, 16384, %s45_s24, [#allocation6], %s6553_s30, %s6553_s30, %s6554_s7  }
  0x36   :  { %s6500_s15 = scalar_lea.hbm %s8379_s4, 8192 }
  0x37   :  { %p6501_p10 = scmp.ne.s32.totalorder %s8379_s4, %s6500_s15  ;;  %p6504_p11 = scmp.lt.u32.totalorder %s6500_s15, %s8379_s4 }
  0x39   :  { %p6506_p12 = pnand %p6504_p11, %p6501_p10 }
  0x3b   :  { %6509 = shalt.err (!%p6506_p12)
}
  0x3c   :  { %s6510_s1 = scalar_lea.vmem %s6626_s26, 8192  ;;  %p6515_p0 = scmp.lt.s32.totalorder %s6626_s26, %s6626_s26 }
  0x3d   :  { %p6511_p13 = scmp.ne.s32.totalorder %s6626_s26, %s6510_s1  ;;  %p6516_p1 = scmp.lt.s32.totalorder %s6510_s1, %s6510_s1 }
  0x3f   :  { %p6517_p2 = por %p6516_p1, %p6515_p0 }
  0x41   :  { %p6518_p3 = pnand %p6517_p2, %p6511_p13 }
  0x43   :  { %6521 = shalt.err (!%p6518_p3)
}
  0x44   :  { %64 = dma.hbm_to_vmem [thread:$0]  %s8379_s4, 8192, %s6626_s26, [#allocation9], %s6553_s30, %s6553_s30, %s6554_s7  }
  0x45   :  { %6544 = dma.done.wait [#allocation3], 1024  }
  0x46   :  { %6545 = vsyncadd [#allocation3], 4294966272 }
  0x47   :  { %6546 = dma.done.wait [#allocation6], 24576  }
  0x48   :  { %6547 = vsyncadd [#allocation6], 4294942720 }
  0x49   :  { %6548 = dma.done.wait [#allocation9], 8192  }
  0x4a   :  { %6549 = vsyncadd [#allocation9], 4294959104  ;;  %v8382_v0 = vmov 0.0   ;;  %v103_v1 = vld [vmem:[#allocation5 + $0x8] sm:$0xff]  ;;  %v105_v3 = vld [vmem:[#allocation5 + $0x18] sm:$0xff] }
  0x4b   :  { %230 = vmatprep.mubr.f32.mxu0 %v8382_v0  ;;  %301 = vmatprep.mubr.f32.mxu1 %v8382_v0  ;;  %v107_v2 = vld [vmem:[#allocation5 + $0x28] sm:$0xff]  ;;  %v109_v5 = vld [vmem:[#allocation5 + $0x38] sm:$0xff]  ;;  %v102_v6 = vld [vmem:[#allocation5] sm:$0xff] }
  0x4c   :  { %v6665_v4 = vpack.c.bf16 %v107_v2, %v103_v1  ;;  %v106_v7 = vld [vmem:[#allocation5 + $0x20] sm:$0xff]  ;;  %v6667_v8 = vpack.c.bf16 %v109_v5, %v105_v3  ;;  %v104_v10 = vld [vmem:[#allocation5 + $0x10] sm:$0xff]  ;;  %v111_v12 = vld [vmem:[#allocation5 + $0x48] sm:$0xff] }
  0x4d   :  { %v6669_v9 = vpack.c.bf16 %v106_v7, %v102_v6  ;;  %v108_v11 = vld [vmem:[#allocation5 + $0x30] sm:$0xff]  ;;  %v115_v14 = vld [vmem:[#allocation5 + $0x68] sm:$0xff]  ;;  %v113_v15 = vld [vmem:[#allocation5 + $0x58] sm:$0xff] }
  0x4e   :  { %4631 = vmatprep.subr.bf16.mxu0 %v6665_v4  ;;  %v6672_v13 = vpack.c.bf16 %v108_v11, %v104_v10  ;;  %v117_v16 = vld [vmem:[#allocation5 + $0x78] sm:$0xff]  ;;  %4663 = vmatprep.subr.bf16.mxu1 %v6667_v8  ;;  %v6676_v17 = vpack.c.bf16 %v115_v14, %v111_v12  ;;  %v110_v19 = vld [vmem:[#allocation5 + $0x40] sm:$0xff]  ;;  %v112_v21 = vld [vmem:[#allocation5 + $0x50] sm:$0xff] }
  0x4f   :  { %4633 = vmatpush1.bf16.msra.mxu0 %v6669_v9  ;;  %v6678_v18 = vpack.c.bf16 %v117_v16, %v113_v15  ;;  %v114_v20 = vld [vmem:[#allocation5 + $0x60] sm:$0xff]  ;;  %v116_v23 = vld [vmem:[#allocation5 + $0x70] sm:$0xff]  ;;  %v119_v24 = vld [vmem:[#allocation5 + $0x88] sm:$0xff] }
  0x50   :  { %4665 = vmatpush1.bf16.msra.mxu1 %v6672_v13  ;;  %v6681_v22 = vpack.c.bf16 %v114_v20, %v110_v19  ;;  %v123_v25 = vld [vmem:[#allocation5 + $0xa8] sm:$0xff]  ;;  %4635 = vmatprep.subr.bf16.mxu0 %v6676_v17  ;;  %v6685_v26 = vpack.c.bf16 %v116_v23, %v112_v21  ;;  %v121_v28 = vld [vmem:[#allocation5 + $0x98] sm:$0xff]  ;;  %v118_v30 = vld [vmem:[#allocation5 + $0x80] sm:$0xff] }
  0x51   :  { %4667 = vmatprep.subr.bf16.mxu1 %v6678_v18  ;;  %v6687_v27 = vpack.c.bf16 %v123_v25, %v119_v24  ;;  %v125_v29 = vld [vmem:[#allocation5 + $0xb8] sm:$0xff]  ;;  %v122_v32 = vld [vmem:[#allocation5 + $0xa0] sm:$0xff]  ;;  %v120_v33 = vld [vmem:[#allocation5 + $0x90] sm:$0xff] }
  0x52   :  { %v6689_v31 = vpack.c.bf16 %v125_v29, %v121_v28  ;;  %v124_v34 = vld [vmem:[#allocation5 + $0xb0] sm:$0xff]  ;;  %v6692_v35 = vpack.c.bf16 %v122_v32, %v118_v30  ;;  %v127_v36 = vld [vmem:[#allocation5 + $0xc8] sm:$0xff]  ;;  %v129_v38 = vld [vmem:[#allocation5 + $0xd8] sm:$0xff] }
  0x53   :  { %4637 = vmatpush1.bf16.msra.mxu0 %v6681_v22  ;;  %v131_v37 = vld [vmem:[#allocation5 + $0xe8] sm:$0xff]  ;;  %v6696_v39 = vpack.c.bf16 %v124_v34, %v120_v33  ;;  %v133_v41 = vld [vmem:[#allocation5 + $0xf8] sm:$0xff]  ;;  %v126_v42 = vld [vmem:[#allocation5 + $0xc0] sm:$0xff] }
  0x54   :  { %4669 = vmatpush1.bf16.msra.mxu1 %v6685_v26  ;;  %4639 = vmatprep.subr.bf16.mxu0 %v6687_v27  ;;  %v6698_v40 = vpack.c.bf16 %v131_v37, %v127_v36  ;;  %v130_v43 = vld [vmem:[#allocation5 + $0xe0] sm:$0xff]  ;;  %v6701_v44 = vpack.c.bf16 %v133_v41, %v129_v38  ;;  %v128_v45 = vld [vmem:[#allocation5 + $0xd0] sm:$0xff]  ;;  %v135_v47 = vld [vmem:[#allocation5 + $0x108] sm:$0xff] }
  0x55   :  { %4671 = vmatprep.subr.bf16.mxu1 %v6689_v31  ;;  %v132_v46 = vld [vmem:[#allocation5 + $0xf0] sm:$0xff]  ;;  %v139_v48 = vld [vmem:[#allocation5 + $0x128] sm:$0xff]  ;;  %v137_v49 = vld [vmem:[#allocation5 + $0x118] sm:$0xff]  ;;  %v6704_v51 = vpack.c.bf16 %v130_v43, %v126_v42 }
  0x56   :  { %v141_v50 = vld [vmem:[#allocation5 + $0x138] sm:$0xff]  ;;  %v6708_v52 = vpack.c.bf16 %v132_v46, %v128_v45  ;;  %v6710_v53 = vpack.c.bf16 %v139_v48, %v135_v47  ;;  %v134_v54 = vld [vmem:[#allocation5 + $0x100] sm:$0xff]  ;;  %v136_v56 = vld [vmem:[#allocation5 + $0x110] sm:$0xff] }
  0x57   :  { %4641 = vmatpush1.bf16.msra.mxu0 %v6692_v35  ;;  %v138_v55 = vld [vmem:[#allocation5 + $0x120] sm:$0xff]  ;;  %v6713_v57 = vpack.c.bf16 %v141_v50, %v137_v49  ;;  %v140_v58 = vld [vmem:[#allocation5 + $0x130] sm:$0xff]  ;;  %v143_v59 = vld [vmem:[#allocation5 + $0x148] sm:$0xff] }
  0x58   :  { %4673 = vmatpush1.bf16.msra.mxu1 %v6696_v39  ;;  %4643 = vmatprep.subr.bf16.mxu0 %v6698_v40  ;;  %v147_v60 = vld [vmem:[#allocation5 + $0x168] sm:$0xff]  ;;  %v145_v61 = vld [vmem:[#allocation5 + $0x158] sm:$0xff]  ;;  %v6716_v63 = vpack.c.bf16 %v138_v55, %v134_v54  ;;  %v6720_v1 = vpack.c.bf16 %v140_v58, %v136_v56  ;;  %v142_v3 = vld [vmem:[#allocation5 + $0x140] sm:$0xff] }
  0x59   :  { %4675 = vmatprep.subr.bf16.mxu1 %v6701_v44  ;;  %v149_v62 = vld [vmem:[#allocation5 + $0x178] sm:$0xff]  ;;  %v6722_v2 = vpack.c.bf16 %v147_v60, %v143_v59  ;;  %v146_v5 = vld [vmem:[#allocation5 + $0x160] sm:$0xff]  ;;  %v144_v6 = vld [vmem:[#allocation5 + $0x150] sm:$0xff] }
  0x5a   :  { %v6725_v7 = vpack.c.bf16 %v149_v62, %v145_v61  ;;  %v148_v10 = vld [vmem:[#allocation5 + $0x170] sm:$0xff]  ;;  %v151_v11 = vld [vmem:[#allocation5 + $0x188] sm:$0xff]  ;;  %v153_v14 = vld [vmem:[#allocation5 + $0x198] sm:$0xff]  ;;  %v6728_v16 = vpack.c.bf16 %v146_v5, %v142_v3 }
  0x5b   :  { %4645 = vmatpush1.bf16.msra.mxu0 %v6704_v51  ;;  %v155_v12 = vld [vmem:[#allocation5 + $0x1a8] sm:$0xff]  ;;  %v157_v15 = vld [vmem:[#allocation5 + $0x1b8] sm:$0xff]  ;;  %v6732_v19 = vpack.c.bf16 %v148_v10, %v144_v6  ;;  %v150_v21 = vld [vmem:[#allocation5 + $0x180] sm:$0xff] }
  0x5c   :  { %4677 = vmatpush1.bf16.msra.mxu1 %v6708_v52  ;;  %4647 = vmatprep.subr.bf16.mxu0 %v6710_v53  ;;  %v6734_v20 = vpack.c.bf16 %v155_v12, %v151_v11  ;;  %v154_v23 = vld [vmem:[#allocation5 + $0x1a0] sm:$0xff]  ;;  %v152_v24 = vld [vmem:[#allocation5 + $0x190] sm:$0xff]  ;;  %v6737_v25 = vpack.c.bf16 %v157_v15, %v153_v14  ;;  %v159_v29 = vld [vmem:[#allocation5 + $0x1c8] sm:$0xff] }
  0x5d   :  { %4679 = vmatprep.subr.bf16.mxu1 %v6713_v57  ;;  %v156_v28 = vld [vmem:[#allocation5 + $0x1b0] sm:$0xff]  ;;  %v163_v30 = vld [vmem:[#allocation5 + $0x1e8] sm:$0xff]  ;;  %v161_v32 = vld [vmem:[#allocation5 + $0x1d8] sm:$0xff]  ;;  %v6740_v34 = vpack.c.bf16 %v154_v23, %v150_v21 }
  0x5e   :  { %v165_v33 = vld [vmem:[#allocation5 + $0x1f8] sm:$0xff]  ;;  %v6744_v36 = vpack.c.bf16 %v156_v28, %v152_v24  ;;  %v6746_v37 = vpack.c.bf16 %v163_v30, %v159_v29  ;;  %v158_v38 = vld [vmem:[#allocation5 + $0x1c0] sm:$0xff]  ;;  %v160_v42 = vld [vmem:[#allocation5 + $0x1d0] sm:$0xff] }
  0x5f   :  { %4649 = vmatpush1.bf16.msra.mxu0 %v6716_v63  ;;  %v162_v41 = vld [vmem:[#allocation5 + $0x1e0] sm:$0xff]  ;;  %v6749_v43 = vpack.c.bf16 %v165_v33, %v161_v32  ;;  %v164_v45 = vld [vmem:[#allocation5 + $0x1f0] sm:$0xff]  ;;  %v363_v46 = vld [vmem:[#allocation7 + $0x8] sm:$0xff] }
  0x60   :  { %4681 = vmatpush1.bf16.msra.mxu1 %v6720_v1  ;;  %4651 = vmatprep.subr.bf16.mxu0 %v6722_v2  ;;  %v367_v47 = vld [vmem:[#allocation7 + $0x28] sm:$0xff]  ;;  %v365_v48 = vld [vmem:[#allocation7 + $0x18] sm:$0xff]  ;;  %v6752_v50 = vpack.c.bf16 %v162_v41, %v158_v38  ;;  %v6756_v54 = vpack.c.bf16 %v164_v45, %v160_v42  ;;  %v362_v56 = vld [vmem:[#allocation7] sm:$0xff] }
  0x61   :  { %4683 = vmatprep.subr.bf16.mxu1 %v6725_v7  ;;  %v369_v49 = vld [vmem:[#allocation7 + $0x38] sm:$0xff]  ;;  %v6758_v55 = vpack.c.bf16 %v367_v47, %v363_v46  ;;  %v366_v58 = vld [vmem:[#allocation7 + $0x20] sm:$0xff]  ;;  %v364_v59 = vld [vmem:[#allocation7 + $0x10] sm:$0xff] }
  0x62   :  { %v6761_v60 = vpack.c.bf16 %v369_v49, %v365_v48  ;;  %v368_v61 = vld [vmem:[#allocation7 + $0x30] sm:$0xff]  ;;  %v371_v62 = vld [vmem:[#allocation7 + $0x48] sm:$0xff]  ;;  %v373_v5 = vld [vmem:[#allocation7 + $0x58] sm:$0xff]  ;;  %v6764_v10 = vpack.c.bf16 %v366_v58, %v362_v56 }
  0x63   :  { %4653 = vmatpush1.bf16.msra.mxu0 %v6728_v16  ;;  %v375_v3 = vld [vmem:[#allocation7 + $0x68] sm:$0xff]  ;;  %v377_v6 = vld [vmem:[#allocation7 + $0x78] sm:$0xff]  ;;  %v6768_v11 = vpack.c.bf16 %v368_v61, %v364_v59  ;;  %v370_v14 = vld [vmem:[#allocation7 + $0x40] sm:$0xff] }
  0x64   :  { %4685 = vmatpush1.bf16.msra.mxu1 %v6732_v19  ;;  %4655 = vmatprep.subr.bf16.mxu0 %v6734_v20  ;;  %v6770_v12 = vpack.c.bf16 %v375_v3, %v371_v62  ;;  %v374_v15 = vld [vmem:[#allocation7 + $0x60] sm:$0xff]  ;;  %v372_v21 = vld [vmem:[#allocation7 + $0x50] sm:$0xff]  ;;  %v6773_v23 = vpack.c.bf16 %v377_v6, %v373_v5  ;;  %v379_v28 = vld [vmem:[#allocation7 + $0x88] sm:$0xff] }
  0x65   :  { %4687 = vmatprep.subr.bf16.mxu1 %v6737_v25  ;;  %v376_v24 = vld [vmem:[#allocation7 + $0x70] sm:$0xff]  ;;  %v383_v29 = vld [vmem:[#allocation7 + $0xa8] sm:$0xff]  ;;  %v381_v30 = vld [vmem:[#allocation7 + $0x98] sm:$0xff]  ;;  %v6778_v33 = vpack.c.bf16 %v374_v15, %v370_v14 }
  0x66   :  { %v385_v32 = vld [vmem:[#allocation7 + $0xb8] sm:$0xff]  ;;  %v6782_v38 = vpack.c.bf16 %v376_v24, %v372_v21  ;;  %v6784_v41 = vpack.c.bf16 %v383_v29, %v379_v28  ;;  %v378_v42 = vld [vmem:[#allocation7 + $0x80] sm:$0xff]  ;;  %v380_v47 = vld [vmem:[#allocation7 + $0x90] sm:$0xff] }
  0x67   :  { %4657 = vmatpush1.bf16.msra.mxu0 %v6740_v34  ;;  %v382_v45 = vld [vmem:[#allocation7 + $0xa0] sm:$0xff]  ;;  %v6787_v46 = vpack.c.bf16 %v385_v32, %v381_v30  ;;  %v384_v48 = vld [vmem:[#allocation7 + $0xb0] sm:$0xff]  ;;  %v387_v58 = vld [vmem:[#allocation7 + $0xc8] sm:$0xff] }
  0x68   :  { %4689 = vmatpush1.bf16.msra.mxu1 %v6744_v36  ;;  %4659 = vmatprep.subr.bf16.mxu0 %v6746_v37  ;;  %v6792_v49 = vpack.c.bf16 %v382_v45, %v378_v42  ;;  %v6796_v56 = vpack.c.bf16 %v384_v48, %v380_v47  ;;  %v391_v59 = vld [vmem:[#allocation7 + $0xe8] sm:$0xff]  ;;  %v389_v61 = vld [vmem:[#allocation7 + $0xd8] sm:$0xff]  ;;  %v386_v5 = vld [vmem:[#allocation7 + $0xc0] sm:$0xff] }
  0x69   :  { %4691 = vmatprep.subr.bf16.mxu1 %v6749_v43  ;;  %v6801_v62 = vpack.c.bf16 %v391_v59, %v387_v58  ;;  %v393_v3 = vld [vmem:[#allocation7 + $0xf8] sm:$0xff]  ;;  %v390_v6 = vld [vmem:[#allocation7 + $0xe0] sm:$0xff]  ;;  %v388_v21 = vld [vmem:[#allocation7 + $0xd0] sm:$0xff] }
  0x6a   :  { %v6803_v14 = vpack.c.bf16 %v393_v3, %v389_v61  ;;  %v6805_v15 = vpack.c.bf16 %v390_v6, %v386_v5  ;;  %v392_v24 = vld [vmem:[#allocation7 + $0xf0] sm:$0xff]  ;;  %v395_v29 = vld [vmem:[#allocation7 + $0x108] sm:$0xff]  ;;  %v397_v32 = vld [vmem:[#allocation7 + $0x118] sm:$0xff] }
  0x6b   :  { %4661 = vmatpush1.bf16.msra.mxu0 %v6752_v50  ;;  %v6808_v28 = vpack.c.bf16 %v392_v24, %v388_v21  ;;  %v399_v30 = vld [vmem:[#allocation7 + $0x128] sm:$0xff]  ;;  %v401_v45 = vld [vmem:[#allocation7 + $0x138] sm:$0xff]  ;;  %v394_v47 = vld [vmem:[#allocation7 + $0x100] sm:$0xff] }
  0x6c   :  { %4693 = vmatpush1.bf16.msra.mxu1 %v6756_v54  ;;  %4695 = vmatprep.subr.bf16.mxu0 %v6758_v55  ;;  %8607 = vst [vmem:[#allocation15_spill] sm:$0xff] %v6803_v14  ;;  %8608 = vst [vmem:[#allocation16_spill] sm:$0xff] %v6805_v15  ;;  %v6813_v42 = vpack.c.bf16 %v399_v30, %v395_v29  ;;  %v398_v48 = vld [vmem:[#allocation7 + $0x120] sm:$0xff]  ;;  %v6815_v58 = vpack.c.bf16 %v401_v45, %v397_v32  ;;  %v396_v61 = vld [vmem:[#allocation7 + $0x110] sm:$0xff] }
  0x6d   :  { %4759 = vmatprep.subr.bf16.mxu1 %v6761_v60  ;;  %8609 = vst [vmem:[#allocation17_spill] sm:$0xff] %v6808_v28  ;;  %v6817_v59 = vpack.c.bf16 %v398_v48, %v394_v47  ;;  %v400_v3 = vld [vmem:[#allocation7 + $0x130] sm:$0xff]  ;;  %v403_v6 = vld [vmem:[#allocation7 + $0x148] sm:$0xff]  ;;  %v405_v24 = vld [vmem:[#allocation7 + $0x158] sm:$0xff] }
  0x6e   :  { %231 = vmatmul.mubr.f32.vlgmr.msra.gmra.mrb[0].mxu0 %v8382_v0  ;;  %8610 = vst [vmem:[#allocation18_spill] sm:$0xff] %v6813_v42  ;;  %8611 = vst [vmem:[#allocation19_spill] sm:$0xff] %v6815_v58  ;;  %v6820_v5 = vpack.c.bf16 %v400_v3, %v396_v61  ;;  %v407_v21 = vld [vmem:[#allocation7 + $0x168] sm:$0xff]  ;;  %v409_v30 = vld [vmem:[#allocation7 + $0x178] sm:$0xff] }
  0x6f   :  { %302 = vmatmul.mubr.f32.vlgmr.msra.gmra.mrb[0].mxu1 %v8382_v0  ;;  %4697 = vmatpush1.bf16.msra.mxu0 %v6764_v10  ;;  %8612 = vst [vmem:[#allocation20_spill] sm:$0xff] %v6817_v59  ;;  %v6825_v29 = vpack.c.bf16 %v407_v21, %v403_v6  ;;  %v402_v32 = vld [vmem:[#allocation7 + $0x140] sm:$0xff]  ;;  %v6827_v47 = vpack.c.bf16 %v409_v30, %v405_v24  ;;  %v404_v61 = vld [vmem:[#allocation7 + $0x150] sm:$0xff]  ;;  %v415_v6 = vld [vmem:[#allocation7 + $0x1a8] sm:$0xff] }
  0x70   :  { %4761 = vmatpush1.bf16.msra.mxu1 %v6768_v11  ;;  %4699 = vmatprep.subr.bf16.mxu0 %v6770_v12  ;;  %8613 = vst [vmem:[#allocation21_spill] sm:$0xff] %v6820_v5  ;;  %v406_v45 = vld [vmem:[#allocation7 + $0x160] sm:$0xff]  ;;  %v408_v3 = vld [vmem:[#allocation7 + $0x170] sm:$0xff]  ;;  %v413_v21 = vld [vmem:[#allocation7 + $0x198] sm:$0xff] }
  0x71   :  { %4763 = vmatprep.subr.bf16.mxu1 %v6773_v23  ;;  %554 = vmatprep.mubr.f32.mxu0 %v8382_v0  ;;  %8614 = vst [vmem:[#allocation22_spill] sm:$0xff] %v6825_v29  ;;  %8615 = vst [vmem:[#allocation23_spill] sm:$0xff] %v6827_v47  ;;  %v6829_v48 = vpack.c.bf16 %v406_v45, %v402_v32  ;;  %v417_v24 = vld [vmem:[#allocation7 + $0x1b8] sm:$0xff]  ;;  %v410_v30 = vld [vmem:[#allocation7 + $0x180] sm:$0xff] }
  0x72   :  { %625 = vmatprep.mubr.f32.mxu1 %v8382_v0  ;;  %v6832_v0 = vpack.c.bf16 %v408_v3, %v404_v61  ;;  %v414_v32 = vld [vmem:[#allocation7 + $0x1a0] sm:$0xff]  ;;  %v6839_v45 = vpack.c.bf16 %v417_v24, %v413_v21  ;;  %v412_v61 = vld [vmem:[#allocation7 + $0x190] sm:$0xff]  ;;  %v425_v21 = vld [vmem:[#allocation7 + $0x1f8] sm:$0xff] }
  0x73   :  { %4701 = vmatpush1.bf16.msra.mxu0 %v6778_v33  ;;  %8616 = vst [vmem:[#allocation24_spill] sm:$0xff] %v6829_v48  ;;  %v416_v3 = vld [vmem:[#allocation7 + $0x1b0] sm:$0xff]  ;;  %v418_v24 = vld [vmem:[#allocation7 + $0x1c0] sm:$0xff] }
  0x74   :  { %4765 = vmatpush1.bf16.msra.mxu1 %v6782_v38  ;;  %4703 = vmatprep.subr.bf16.mxu0 %v6784_v41  ;;  %8617 = vst [vmem:[#allocation25_spill] sm:$0xff] %v6832_v0  ;;  %8619 = vst [vmem:[#allocation27_spill] sm:$0xff] %v6839_v45 }
  0x75   :  { %4767 = vmatprep.subr.bf16.mxu1 %v6787_v46 }
  0x77   :  { %4705 = vmatpush1.bf16.msra.mxu0 %v6792_v49 }
  0x78   :  { %4769 = vmatpush1.bf16.msra.mxu1 %v6796_v56  ;;  %4707 = vmatprep.subr.bf16.mxu0 %v6801_v62 }
  0x79   :  { %4771 = vmatprep.subr.bf16.mxu1 %v6803_v14  ;;  %v485_v14 = vld [vmem:[#allocation7 + $0x3d8] sm:$0xff] }
  0x7b   :  { %4709 = vmatpush1.bf16.msra.mxu0 %v6805_v15  ;;  %v483_v15 = vld [vmem:[#allocation7 + $0x3c8] sm:$0xff] }
  0x7c   :  { %4773 = vmatpush1.bf16.msra.mxu1 %v6808_v28  ;;  %4711 = vmatprep.subr.bf16.mxu0 %v6813_v42  ;;  %v469_v42 = vld [vmem:[#allocation7 + $0x358] sm:$0xff] }
  0x7d   :  { %4775 = vmatprep.subr.bf16.mxu1 %v6815_v58  ;;  %v6841_v58 = vpack.c.bf16 %v414_v32, %v410_v30  ;;  %v422_v30 = vld [vmem:[#allocation7 + $0x1e0] sm:$0xff]  ;;  %v473_v28 = vld [vmem:[#allocation7 + $0x378] sm:$0xff] }
  0x7f   :  { %4713 = vmatpush1.bf16.msra.mxu0 %v6817_v59  ;;  %8620 = vst [vmem:[#allocation28_spill] sm:$0xff] %v6841_v58 }
  0x80   :  { %4777 = vmatpush1.bf16.msra.mxu1 %v6820_v5  ;;  %4715 = vmatprep.subr.bf16.mxu0 %v6825_v29  ;;  %v411_v5 = vld [vmem:[#allocation7 + $0x188] sm:$0xff]  ;;  %v6853_v29 = vpack.c.bf16 %v422_v30, %v418_v24  ;;  %v430_v24 = vld [vmem:[#allocation7 + $0x220] sm:$0xff] }
  0x81   :  { %4779 = vmatprep.subr.bf16.mxu1 %v6827_v47  ;;  %v6837_v59 = vpack.c.bf16 %v415_v6, %v411_v5  ;;  %v6844_v47 = vpack.c.bf16 %v416_v3, %v412_v61  ;;  %v423_v5 = vld [vmem:[#allocation7 + $0x1e8] sm:$0xff]  ;;  %v421_v6 = vld [vmem:[#allocation7 + $0x1d8] sm:$0xff]  ;;  %v420_v61 = vld [vmem:[#allocation7 + $0x1d0] sm:$0xff] }
  0x82   :  { %v6851_v32 = vpack.c.bf16 %v425_v21, %v421_v6  ;;  %8624 = vst [vmem:[#allocation32_spill] sm:$0xff] %v6853_v29  ;;  %v424_v3 = vld [vmem:[#allocation7 + $0x1f0] sm:$0xff]  ;;  %v433_v6 = vld [vmem:[#allocation7 + $0x238] sm:$0xff]  ;;  %v426_v21 = vld [vmem:[#allocation7 + $0x200] sm:$0xff] }
  0x83   :  { %4717 = vmatpush1.bf16.msra.mxu0 %v6829_v48  ;;  %8618 = vst [vmem:[#allocation26_spill] sm:$0xff] %v6837_v59  ;;  %8621 = vst [vmem:[#allocation29_spill] sm:$0xff] %v6844_v47 }
  0x84   :  { %4781 = vmatpush1.bf16.msra.mxu1 %v6832_v0  ;;  %4719 = vmatprep.subr.bf16.mxu0 %v6837_v59  ;;  %v419_v0 = vld [vmem:[#allocation7 + $0x1c8] sm:$0xff]  ;;  %8623 = vst [vmem:[#allocation31_spill] sm:$0xff] %v6851_v32  ;;  %v6865_v59 = vpack.c.bf16 %v430_v24, %v426_v21  ;;  %v438_v21 = vld [vmem:[#allocation7 + $0x260] sm:$0xff] }
  0x85   :  { %4783 = vmatprep.subr.bf16.mxu1 %v6839_v45  ;;  %v6849_v48 = vpack.c.bf16 %v423_v5, %v419_v0  ;;  %v6856_v45 = vpack.c.bf16 %v424_v3, %v420_v61  ;;  %v431_v0 = vld [vmem:[#allocation7 + $0x228] sm:$0xff]  ;;  %v429_v5 = vld [vmem:[#allocation7 + $0x218] sm:$0xff]  ;;  %v428_v61 = vld [vmem:[#allocation7 + $0x210] sm:$0xff] }
  0x86   :  { %v6863_v30 = vpack.c.bf16 %v433_v6, %v429_v5  ;;  %8628 = vst [vmem:[#allocation36_spill] sm:$0xff] %v6865_v59  ;;  %v432_v3 = vld [vmem:[#allocation7 + $0x230] sm:$0xff]  ;;  %v441_v5 = vld [vmem:[#allocation7 + $0x278] sm:$0xff]  ;;  %v434_v6 = vld [vmem:[#allocation7 + $0x240] sm:$0xff] }
  0x87   :  { %4721 = vmatpush1.bf16.msra.mxu0 %v6841_v58  ;;  %8622 = vst [vmem:[#allocation30_spill] sm:$0xff] %v6849_v48  ;;  %8625 = vst [vmem:[#allocation33_spill] sm:$0xff] %v6856_v45 }
  0x88   :  { %4785 = vmatpush1.bf16.msra.mxu1 %v6844_v47  ;;  %4723 = vmatprep.subr.bf16.mxu0 %v6849_v48  ;;  %v427_v47 = vld [vmem:[#allocation7 + $0x208] sm:$0xff]  ;;  %8627 = vst [vmem:[#allocation35_spill] sm:$0xff] %v6863_v30  ;;  %v6877_v48 = vpack.c.bf16 %v438_v21, %v434_v6  ;;  %v446_v6 = vld [vmem:[#allocation7 + $0x2a0] sm:$0xff] }
  0x89   :  { %4787 = vmatprep.subr.bf16.mxu1 %v6851_v32  ;;  %v6861_v58 = vpack.c.bf16 %v431_v0, %v427_v47  ;;  %v6868_v32 = vpack.c.bf16 %v432_v3, %v428_v61  ;;  %v439_v47 = vld [vmem:[#allocation7 + $0x268] sm:$0xff]  ;;  %v437_v0 = vld [vmem:[#allocation7 + $0x258] sm:$0xff]  ;;  %v436_v61 = vld [vmem:[#allocation7 + $0x250] sm:$0xff] }
  0x8a   :  { %v6875_v24 = vpack.c.bf16 %v441_v5, %v437_v0  ;;  %8632 = vst [vmem:[#allocation40_spill] sm:$0xff] %v6877_v48  ;;  %v440_v3 = vld [vmem:[#allocation7 + $0x270] sm:$0xff]  ;;  %v449_v0 = vld [vmem:[#allocation7 + $0x2b8] sm:$0xff]  ;;  %v442_v5 = vld [vmem:[#allocation7 + $0x280] sm:$0xff] }
  0x8b   :  { %4725 = vmatpush1.bf16.msra.mxu0 %v6853_v29  ;;  %8626 = vst [vmem:[#allocation34_spill] sm:$0xff] %v6861_v58  ;;  %8629 = vst [vmem:[#allocation37_spill] sm:$0xff] %v6868_v32 }
  0x8c   :  { %4789 = vmatpush1.bf16.msra.mxu1 %v6856_v45  ;;  %4727 = vmatprep.subr.bf16.mxu0 %v6861_v58  ;;  %v435_v45 = vld [vmem:[#allocation7 + $0x248] sm:$0xff]  ;;  %8631 = vst [vmem:[#allocation39_spill] sm:$0xff] %v6875_v24  ;;  %v6889_v58 = vpack.c.bf16 %v446_v6, %v442_v5  ;;  %v454_v5 = vld [vmem:[#allocation7 + $0x2e0] sm:$0xff] }
  0x8d   :  { %4791 = vmatprep.subr.bf16.mxu1 %v6863_v30  ;;  %v6873_v29 = vpack.c.bf16 %v439_v47, %v435_v45  ;;  %v6880_v30 = vpack.c.bf16 %v440_v3, %v436_v61  ;;  %v447_v45 = vld [vmem:[#allocation7 + $0x2a8] sm:$0xff]  ;;  %v445_v47 = vld [vmem:[#allocation7 + $0x298] sm:$0xff]  ;;  %v444_v61 = vld [vmem:[#allocation7 + $0x290] sm:$0xff] }
  0x8e   :  { %v6887_v21 = vpack.c.bf16 %v449_v0, %v445_v47  ;;  %8636 = vst [vmem:[#allocation44_spill] sm:$0xff] %v6889_v58  ;;  %v448_v3 = vld [vmem:[#allocation7 + $0x2b0] sm:$0xff]  ;;  %v457_v47 = vld [vmem:[#allocation7 + $0x2f8] sm:$0xff]  ;;  %v450_v0 = vld [vmem:[#allocation7 + $0x2c0] sm:$0xff] }
  0x8f   :  { %4729 = vmatpush1.bf16.msra.mxu0 %v6865_v59  ;;  %8630 = vst [vmem:[#allocation38_spill] sm:$0xff] %v6873_v29  ;;  %8633 = vst [vmem:[#allocation41_spill] sm:$0xff] %v6880_v30 }
  0x90   :  { %4793 = vmatpush1.bf16.msra.mxu1 %v6868_v32  ;;  %4731 = vmatprep.subr.bf16.mxu0 %v6873_v29  ;;  %v443_v32 = vld [vmem:[#allocation7 + $0x288] sm:$0xff]  ;;  %8635 = vst [vmem:[#allocation43_spill] sm:$0xff] %v6887_v21  ;;  %v6901_v29 = vpack.c.bf16 %v454_v5, %v450_v0  ;;  %v462_v0 = vld [vmem:[#allocation7 + $0x320] sm:$0xff] }
  0x91   :  { %4795 = vmatprep.subr.bf16.mxu1 %v6875_v24  ;;  %v6885_v59 = vpack.c.bf16 %v447_v45, %v443_v32  ;;  %v6892_v24 = vpack.c.bf16 %v448_v3, %v444_v61  ;;  %v455_v32 = vld [vmem:[#allocation7 + $0x2e8] sm:$0xff]  ;;  %v453_v45 = vld [vmem:[#allocation7 + $0x2d8] sm:$0xff]  ;;  %v452_v61 = vld [vmem:[#allocation7 + $0x2d0] sm:$0xff] }
  0x92   :  { %v6899_v6 = vpack.c.bf16 %v457_v47, %v453_v45  ;;  %8640 = vst [vmem:[#allocation48_spill] sm:$0xff] %v6901_v29  ;;  %v456_v3 = vld [vmem:[#allocation7 + $0x2f0] sm:$0xff]  ;;  %v465_v45 = vld [vmem:[#allocation7 + $0x338] sm:$0xff]  ;;  %v458_v47 = vld [vmem:[#allocation7 + $0x300] sm:$0xff] }
  0x93   :  { %4733 = vmatpush1.bf16.msra.mxu0 %v6877_v48  ;;  %8634 = vst [vmem:[#allocation42_spill] sm:$0xff] %v6885_v59  ;;  %8637 = vst [vmem:[#allocation45_spill] sm:$0xff] %v6892_v24 }
  0x94   :  { %4797 = vmatpush1.bf16.msra.mxu1 %v6880_v30  ;;  %4735 = vmatprep.subr.bf16.mxu0 %v6885_v59  ;;  %v451_v30 = vld [vmem:[#allocation7 + $0x2c8] sm:$0xff]  ;;  %8639 = vst [vmem:[#allocation47_spill] sm:$0xff] %v6899_v6  ;;  %v6913_v59 = vpack.c.bf16 %v462_v0, %v458_v47  ;;  %v468_v47 = vld [vmem:[#allocation7 + $0x350] sm:$0xff] }
  0x95   :  { %4799 = vmatprep.subr.bf16.mxu1 %v6887_v21  ;;  %v6897_v48 = vpack.c.bf16 %v455_v32, %v451_v30  ;;  %v6904_v21 = vpack.c.bf16 %v456_v3, %v452_v61  ;;  %v463_v30 = vld [vmem:[#allocation7 + $0x328] sm:$0xff]  ;;  %v461_v32 = vld [vmem:[#allocation7 + $0x318] sm:$0xff]  ;;  %v460_v61 = vld [vmem:[#allocation7 + $0x310] sm:$0xff] }
  0x96   :  { %v6911_v5 = vpack.c.bf16 %v465_v45, %v461_v32  ;;  %8644 = vst [vmem:[#allocation52_spill] sm:$0xff] %v6913_v59  ;;  %v464_v3 = vld [vmem:[#allocation7 + $0x330] sm:$0xff]  ;;  %v466_v32 = vld [vmem:[#allocation7 + $0x340] sm:$0xff] }
  0x97   :  { %4737 = vmatpush1.bf16.msra.mxu0 %v6889_v58  ;;  %8638 = vst [vmem:[#allocation46_spill] sm:$0xff] %v6897_v48  ;;  %8641 = vst [vmem:[#allocation49_spill] sm:$0xff] %v6904_v21  ;;  %v470_v45 = vld [vmem:[#allocation7 + $0x360] sm:$0xff] }
  0x98   :  { %4801 = vmatpush1.bf16.msra.mxu1 %v6892_v24  ;;  %4739 = vmatprep.subr.bf16.mxu0 %v6897_v48  ;;  %v459_v24 = vld [vmem:[#allocation7 + $0x308] sm:$0xff]  ;;  %8643 = vst [vmem:[#allocation51_spill] sm:$0xff] %v6911_v5  ;;  %v6925_v0 = vpack.c.bf16 %v470_v45, %v466_v32  ;;  %v480_v32 = vld [vmem:[#allocation7 + $0x3b0] sm:$0xff] }
  0x99   :  { %4803 = vmatprep.subr.bf16.mxu1 %v6899_v6  ;;  %v6909_v58 = vpack.c.bf16 %v463_v30, %v459_v24  ;;  %v467_v48 = vld [vmem:[#allocation7 + $0x348] sm:$0xff]  ;;  %v6922_v30 = vpack.c.bf16 %v473_v28, %v469_v42  ;;  %v477_v28 = vld [vmem:[#allocation7 + $0x398] sm:$0xff] }
  0x9a   :  { %v471_v6 = vld [vmem:[#allocation7 + $0x368] sm:$0xff]  ;;  %8647 = vst [vmem:[#allocation55_spill] sm:$0xff] %v6925_v0  ;;  %v481_v42 = vld [vmem:[#allocation7 + $0x3b8] sm:$0xff] }
  0x9b   :  { %4741 = vmatpush1.bf16.msra.mxu0 %v6901_v29  ;;  %8642 = vst [vmem:[#allocation50_spill] sm:$0xff] %v6909_v58  ;;  %v6916_v29 = vpack.c.bf16 %v464_v3, %v460_v61  ;;  %v6920_v24 = vpack.c.bf16 %v471_v6, %v467_v48  ;;  %v472_v61 = vld [vmem:[#allocation7 + $0x370] sm:$0xff]  ;;  %v475_v3 = vld [vmem:[#allocation7 + $0x388] sm:$0xff]  ;;  %v474_v6 = vld [vmem:[#allocation7 + $0x380] sm:$0xff] }
  0x9c   :  { %4805 = vmatpush1.bf16.msra.mxu1 %v6904_v21  ;;  %4743 = vmatprep.subr.bf16.mxu0 %v6909_v58  ;;  %v479_v58 = vld [vmem:[#allocation7 + $0x3a8] sm:$0xff]  ;;  %v478_v21 = vld [vmem:[#allocation7 + $0x3a0] sm:$0xff] }
  0x9d   :  { %8645 = vst [vmem:[#allocation53_spill] sm:$0xff] %v6916_v29  ;;  %4807 = vmatprep.subr.bf16.mxu1 %v6911_v5  ;;  %8646 = vst [vmem:[#allocation54_spill] sm:$0xff] %v6920_v24  ;;  %v6929_v5 = vpack.c.bf16 %v472_v61, %v468_v47  ;;  %v6931_v48 = vpack.c.bf16 %v479_v58, %v475_v3  ;;  %v6936_v45 = vpack.c.bf16 %v478_v21, %v474_v6  ;;  %v489_v61 = vld [vmem:[#allocation7 + $0x3f8] sm:$0xff]  ;;  %v482_v3 = vld [vmem:[#allocation7 + $0x3c0] sm:$0xff] }
  0x9e   :  { %v484_v21 = vld [vmem:[#allocation7 + $0x3d0] sm:$0xff] }
  0x9f   :  { %4745 = vmatpush1.bf16.msra.mxu0 %v6913_v59  ;;  %8648 = vst [vmem:[#allocation56_spill] sm:$0xff] %v6929_v5  ;;  %8649 = vst [vmem:[#allocation57_spill] sm:$0xff] %v6931_v48  ;;  %v6933_v59 = vpack.c.bf16 %v481_v42, %v477_v28  ;;  %v486_v28 = vld [vmem:[#allocation7 + $0x3e0] sm:$0xff]  ;;  %v6945_v42 = vpack.c.bf16 %v489_v61, %v485_v14  ;;  %v488_v6 = vld [vmem:[#allocation7 + $0x3f0] sm:$0xff]  ;;  %v81_v14 = vlaneseq }
  0xa0   :  { %4809 = vmatpush1.bf16.msra.mxu1 %v6916_v29  ;;  %4747 = vmatprep.subr.bf16.mxu0 %v6920_v24  ;;  %v476_v29 = vld [vmem:[#allocation7 + $0x390] sm:$0xff]  ;;  %8651 = vst [vmem:[#allocation59_spill] sm:$0xff] %v6936_v45  ;;  %v487_v24 = vld [vmem:[#allocation7 + $0x3e8] sm:$0xff] }
  0xa1   :  { %4811 = vmatprep.subr.bf16.mxu1 %v6922_v30  ;;  %8650 = vst [vmem:[#allocation58_spill] sm:$0xff] %v6933_v59  ;;  %v6940_v58 = vpack.c.bf16 %v480_v32, %v476_v29  ;;  %v6942_v47 = vpack.c.bf16 %v487_v24, %v483_v15  ;;  %8654 = vst [vmem:[#allocation62_spill] sm:$0xff] %v6945_v42  ;;  %v6952_v29 = vpack.c.bf16 %v488_v6, %v484_v21  ;;  %v6561_v15 = vmov 1983009808  }
  0xa2   :  { %v315_v24 = vunpack.c.l.s4 %v6561_v15  ;;  %v6959_v32 = vshrl.u32 %v81_v14, 7 }
  0xa3   :  { %4749 = vmatpush1.bf16.msra.mxu0 %v6925_v0  ;;  %8652 = vst [vmem:[#allocation60_spill] sm:$0xff] %v6940_v58  ;;  %8653 = vst [vmem:[#allocation61_spill] sm:$0xff] %v6942_v47  ;;  %v6948_v0 = vpack.c.bf16 %v486_v28, %v482_v3 }
  0xa4   :  { %4813 = vmatpush1.bf16.msra.mxu1 %v6929_v5  ;;  %4751 = vmatprep.subr.bf16.mxu0 %v6931_v48  ;;  %8656 = vst [vmem:[#allocation64_spill] sm:$0xff] %v6952_v29  ;;  %8657 = vst [vmem:[#allocation65_spill] sm:$0xff] %v6959_v32  ;;  %v316_v61 = vunpack.c.0.s8 %v315_v24 }
  0xa5   :  { %4815 = vmatprep.subr.bf16.mxu1 %v6933_v59  ;;  %8655 = vst [vmem:[#allocation63_spill] sm:$0xff] %v6948_v0 }
  0xa6   :  { %v6962_v28 = vsub.s32 %v316_v61, %v6959_v32 }
  0xa7   :  { %4753 = vmatpush1.bf16.msra.mxu0 %v6936_v45 }
  0xa8   :  { %4817 = vmatpush1.bf16.msra.mxu1 %v6940_v58  ;;  %4755 = vmatprep.subr.bf16.mxu0 %v6942_v47 }
  0xa9   :  { %4819 = vmatprep.subr.bf16.mxu1 %v6945_v42 }
  0xab   :  { %4757 = vmatpush1.bf16.msra.mxu0 %v6948_v0 }
  0xac   :  { %4821 = vmatpush1.bf16.msra.mxu1 %v6952_v29  ;;  %4823 = vmatprep.subr.bf16.mxu0 %v6665_v4 }
  0xad   :  { %4855 = vmatprep.subr.bf16.mxu1 %v6667_v8  ;;  %v101_v8 = vld [vmem:[#allocation2] sm:$0xff] }
 0x141   :  { %v232_v3 = vpop.f32.mrb[0].mxu0 }
 0x142   :  { %v303_v21 = vpop.f32.mrb[0].mxu1  ;;  %v234_v6 = vpop.f32.mrb[1].mxu0 }
 0x143   :  { %v312_v42 = vcombine.low %v232_v3, %v234_v6  ;;  %v305_v0 = vpop.f32.mrb[1].mxu1 }
 0x144   :  { %v313_v47 = vcombine.low %v303_v21, %v305_v0 }
 0x145   :  { %v320_v29 = vrot.slane %v312_v42, %v6962_v28 }
 0x146   :  { %v327_v4 = vrot.slane %v313_v47, %v6962_v28 }
 0x148   :  { %v328_v58 = vcombine.low %v320_v29, %v327_v4 }
 0x14a   :  { %v330_v45 = vadd.f32 %v328_v58, %v101_v8 }
 0x14c   :  { %v4582_v15 = vmul.f32 -1.442695, %v330_v45  ;;  %v338_v14 = vrot.slane %v330_v45, 2  ;;  %v349_v59 = vrot.slane %v330_v45, 6  ;;  %v346_v48 = vrot.slane %v330_v45, 4 }
 0x14e   :  { %6178 = vpow2.f32 %v4582_v15  ;;  %v4583_v24 = vmul.f32 -1.442695, %v338_v14  ;;  %v4584_v61 = vmul.f32 -1.442695, %v349_v59  ;;  %v8703_v15 = vld [vmem:[#allocation59_spill] sm:$0xff]  ;;  %v8704_v14 = vld [vmem:[#allocation60_spill] sm:$0xff] }
 0x150   :  { %6180 = vpow2.f32 %v4583_v24  ;;  %v8705_v24 = vld [vmem:[#allocation61_spill] sm:$0xff] }
 0x151   :  { %6182 = vpow2.f32 %v4584_v61  ;;  %v8706_v61 = vld [vmem:[#allocation62_spill] sm:$0xff] }
 0x158   :  { %v6179_v32 = vpop.eup %6178 }
 0x159   :  { %v334_v5 = vadd.f32 1.0, %v6179_v32 }
 0x15a   :  { %v6181_v3 = vpop.eup %6180 }
 0x15b   :  { %6184 = vrcp.f32 %v334_v5  ;;  %v343_v0 = vadd.f32 1.0, %v6181_v3  ;;  %v6183_v47 = vpop.eup %6182  ;;  %v8658_v5 = vmov 0.0   ;;  %v8707_v3 = vld [vmem:[#allocation63_spill] sm:$0xff] }
 0x15c   :  { %6186 = vtanh.f32 %v346_v48  ;;  %v354_v21 = vadd.f32 1.0, %v6183_v47  ;;  %v8702_v48 = vld [vmem:[#allocation58_spill] sm:$0xff] }
 0x15d   :  { %6188 = vrcp.f32 %v343_v0  ;;  %v8708_v0 = vld [vmem:[#allocation64_spill] sm:$0xff]  ;;  %v1222_v47 = vld [vmem:[#allocation5 + $0x28] sm:$0xff] }
 0x15e   :  { %6190 = vrcp.f32 %v354_v21 }
 0x165   :  { %v6185_v42 = vpop.eup %6184 }
 0x166   :  { %v6187_v29 = vpop.eup %6186 }
 0x167   :  { %v6189_v58 = vpop.eup %6188  ;;  %v358_v4 = vmul.f32 %v6187_v29, %v6185_v42  ;;  %v1220_v42 = vld [vmem:[#allocation5 + $0x18] sm:$0xff] }
 0x168   :  { %v357_v6 = vmul.f32 0.0, %v6189_v58  ;;  %v6191_v59 = vpop.eup %6190  ;;  %v1224_v58 = vld [vmem:[#allocation5 + $0x38] sm:$0xff] }
 0x169   :  { %v7067_v21 = vpack.c.bf16 %v1224_v58, %v1220_v42 }
 0x16a   :  { %v6966_v8 = vadd.f32 %v358_v4, %v357_v6  ;;  %v8709_v6 = vld [vmem:[#allocation65_spill] sm:$0xff] }
 0x16b   :  { %v83_v4 = vsub.s32 0, %v8709_v6 }
 0x16c   :  { %6192 = vtanh.f32 %v6966_v8 }
 0x176   :  { %v6193_v45 = vpop.eup %6192 }
 0x177   :  { %v361_v32 = vmul.f32 %v6193_v45, %v6191_v59  ;;  %v79_v59 = vld [vmem:[%s8378_s3] sm:$0xf]  ;;  %v87_v45 = vsub.s32 1, %v8709_v6  ;;  %s6562_s3 = smov [#allocation10]  }
 0x178   :  { %s4568_s21 = sshll.u32 %s6562_s3, 4  ;;  %s4569_s21 = int_to_ptr.vmem [resolvable:$true] %s4568_s21 }
 0x179   :  { %555 = vmatmul.mubr.f32.vlgmr.msra.gmra.mrb[2].mxu0 %v361_v32  ;;  %626 = vmatmul.mubr.f32.vlgmr.msra.gmra.mrb[2].mxu1 %v361_v32  ;;  %s6522_s22 = scalar_lea.vmem %s4569_s21, 256  ;;  %p6527_p5 = scmp.lt.s32.totalorder %s4569_s21, %s4569_s21 }
 0x17a   :  { %4825 = vmatpush1.bf16.msra.mxu0 %v6669_v9  ;;  %4857 = vmatpush1.bf16.msra.mxu1 %v6672_v13  ;;  %v8659_v9 = vld [vmem:[#allocation15_spill] sm:$0xff]  ;;  %v8660_v13 = vld [vmem:[#allocation16_spill] sm:$0xff]  ;;  %p6523_p4 = scmp.ne.s32.totalorder %s4569_s21, %s6522_s22  ;;  %p6528_p6 = scmp.lt.s32.totalorder %s6522_s22, %s6522_s22 }
 0x17b   :  { %4827 = vmatprep.subr.bf16.mxu0 %v6676_v17  ;;  %4859 = vmatprep.subr.bf16.mxu1 %v6678_v18  ;;  %v8661_v17 = vld [vmem:[#allocation17_spill] sm:$0xff]  ;;  %v8662_v18 = vld [vmem:[#allocation18_spill] sm:$0xff] }
 0x17c   :  { %787 = vmatprep.mubr.f32.mxu0 %v8658_v5  ;;  %858 = vmatprep.mubr.f32.mxu1 %v8658_v5  ;;  %p6529_p7 = por %p6528_p6, %p6527_p5 }
 0x17e   :  { %4829 = vmatpush1.bf16.msra.mxu0 %v6681_v22  ;;  %4861 = vmatpush1.bf16.msra.mxu1 %v6685_v26  ;;  %v8663_v22 = vld [vmem:[#allocation19_spill] sm:$0xff]  ;;  %v8664_v26 = vld [vmem:[#allocation20_spill] sm:$0xff]  ;;  %p6530_p8 = pnand %p6529_p7, %p6523_p4 }
 0x17f   :  { %4831 = vmatprep.subr.bf16.mxu0 %v6687_v27  ;;  %4863 = vmatprep.subr.bf16.mxu1 %v6689_v31  ;;  %v8665_v27 = vld [vmem:[#allocation21_spill] sm:$0xff]  ;;  %v8666_v31 = vld [vmem:[#allocation22_spill] sm:$0xff] }
 0x182   :  { %4833 = vmatpush1.bf16.msra.mxu0 %v6692_v35  ;;  %4865 = vmatpush1.bf16.msra.mxu1 %v6696_v39  ;;  %v8667_v35 = vld [vmem:[#allocation23_spill] sm:$0xff]  ;;  %v8668_v39 = vld [vmem:[#allocation24_spill] sm:$0xff] }
 0x183   :  { %4835 = vmatprep.subr.bf16.mxu0 %v6698_v40  ;;  %4867 = vmatprep.subr.bf16.mxu1 %v6701_v44  ;;  %v8669_v40 = vld [vmem:[#allocation25_spill] sm:$0xff]  ;;  %v8670_v44 = vld [vmem:[#allocation26_spill] sm:$0xff] }
 0x186   :  { %4837 = vmatpush1.bf16.msra.mxu0 %v6704_v51  ;;  %4869 = vmatpush1.bf16.msra.mxu1 %v6708_v52  ;;  %v8671_v51 = vld [vmem:[#allocation27_spill] sm:$0xff]  ;;  %v8672_v52 = vld [vmem:[#allocation28_spill] sm:$0xff] }
 0x187   :  { %4839 = vmatprep.subr.bf16.mxu0 %v6710_v53  ;;  %4871 = vmatprep.subr.bf16.mxu1 %v6713_v57  ;;  %v8673_v53 = vld [vmem:[#allocation29_spill] sm:$0xff]  ;;  %v8674_v57 = vld [vmem:[#allocation30_spill] sm:$0xff] }
 0x18a   :  { %4841 = vmatpush1.bf16.msra.mxu0 %v6716_v63  ;;  %4873 = vmatpush1.bf16.msra.mxu1 %v6720_v1  ;;  %v8675_v63 = vld [vmem:[#allocation31_spill] sm:$0xff]  ;;  %v8676_v1 = vld [vmem:[#allocation32_spill] sm:$0xff] }
 0x18b   :  { %4843 = vmatprep.subr.bf16.mxu0 %v6722_v2  ;;  %4875 = vmatprep.subr.bf16.mxu1 %v6725_v7  ;;  %v8677_v2 = vld [vmem:[#allocation33_spill] sm:$0xff]  ;;  %v8678_v7 = vld [vmem:[#allocation34_spill] sm:$0xff] }
 0x18e   :  { %4845 = vmatpush1.bf16.msra.mxu0 %v6728_v16  ;;  %4877 = vmatpush1.bf16.msra.mxu1 %v6732_v19  ;;  %v8679_v16 = vld [vmem:[#allocation35_spill] sm:$0xff]  ;;  %v8680_v19 = vld [vmem:[#allocation36_spill] sm:$0xff] }
 0x18f   :  { %4847 = vmatprep.subr.bf16.mxu0 %v6734_v20  ;;  %4879 = vmatprep.subr.bf16.mxu1 %v6737_v25  ;;  %v8681_v20 = vld [vmem:[#allocation37_spill] sm:$0xff]  ;;  %v8682_v25 = vld [vmem:[#allocation38_spill] sm:$0xff] }
 0x192   :  { %4849 = vmatpush1.bf16.msra.mxu0 %v6740_v34  ;;  %4881 = vmatpush1.bf16.msra.mxu1 %v6744_v36  ;;  %v8683_v34 = vld [vmem:[#allocation39_spill] sm:$0xff]  ;;  %v8684_v36 = vld [vmem:[#allocation40_spill] sm:$0xff] }
 0x193   :  { %4851 = vmatprep.subr.bf16.mxu0 %v6746_v37  ;;  %4883 = vmatprep.subr.bf16.mxu1 %v6749_v43  ;;  %v8685_v37 = vld [vmem:[#allocation41_spill] sm:$0xff]  ;;  %v8686_v43 = vld [vmem:[#allocation42_spill] sm:$0xff] }
 0x196   :  { %4853 = vmatpush1.bf16.msra.mxu0 %v6752_v50  ;;  %4885 = vmatpush1.bf16.msra.mxu1 %v6756_v54  ;;  %v8687_v50 = vld [vmem:[#allocation43_spill] sm:$0xff]  ;;  %v8688_v54 = vld [vmem:[#allocation44_spill] sm:$0xff] }
 0x197   :  { %4887 = vmatprep.subr.bf16.mxu0 %v6758_v55  ;;  %4951 = vmatprep.subr.bf16.mxu1 %v6761_v60  ;;  %v8689_v55 = vld [vmem:[#allocation45_spill] sm:$0xff]  ;;  %v8690_v60 = vld [vmem:[#allocation46_spill] sm:$0xff] }
 0x199   :  { %788 = vmatmul.mubr.f32.vlgmr.msra.gmra.mrb[4].mxu0 %v361_v32  ;;  %859 = vmatmul.mubr.f32.vlgmr.msra.gmra.mrb[4].mxu1 %v361_v32  ;;  %v7076_v32 = vrot.slane %v79_v59, %v83_v4 }
 0x19a   :  { %4889 = vmatpush1.bf16.msra.mxu0 %v6764_v10  ;;  %4953 = vmatpush1.bf16.msra.mxu1 %v6768_v11  ;;  %v8691_v10 = vld [vmem:[#allocation47_spill] sm:$0xff]  ;;  %v8692_v11 = vld [vmem:[#allocation48_spill] sm:$0xff] }
 0x19b   :  { %4891 = vmatprep.subr.bf16.mxu0 %v6770_v12  ;;  %4955 = vmatprep.subr.bf16.mxu1 %v6773_v23  ;;  %v8693_v12 = vld [vmem:[#allocation49_spill] sm:$0xff]  ;;  %v8694_v23 = vld [vmem:[#allocation50_spill] sm:$0xff]  ;;  %8710 = vst [vmem:[#allocation15_spill] sm:$0xff] %v7076_v32 }
 0x19e   :  { %4893 = vmatpush1.bf16.msra.mxu0 %v6778_v33  ;;  %4957 = vmatpush1.bf16.msra.mxu1 %v6782_v38  ;;  %v8695_v33 = vld [vmem:[#allocation51_spill] sm:$0xff]  ;;  %v8696_v38 = vld [vmem:[#allocation52_spill] sm:$0xff] }
 0x19f   :  { %4895 = vmatprep.subr.bf16.mxu0 %v6784_v41  ;;  %4959 = vmatprep.subr.bf16.mxu1 %v6787_v46  ;;  %v8697_v41 = vld [vmem:[#allocation53_spill] sm:$0xff]  ;;  %v8698_v46 = vld [vmem:[#allocation54_spill] sm:$0xff] }
 0x1a2   :  { %4897 = vmatpush1.bf16.msra.mxu0 %v6792_v49  ;;  %4961 = vmatpush1.bf16.msra.mxu1 %v6796_v56  ;;  %v8699_v49 = vld [vmem:[#allocation55_spill] sm:$0xff]  ;;  %v8700_v56 = vld [vmem:[#allocation56_spill] sm:$0xff] }
 0x1a3   :  { %4899 = vmatprep.subr.bf16.mxu0 %v6801_v62  ;;  %4963 = vmatprep.subr.bf16.mxu1 %v8659_v9  ;;  %v8701_v62 = vld [vmem:[#allocation57_spill] sm:$0xff]  ;;  %v7078_v9 = vrot.slane %v79_v59, %v87_v45 }
 0x1a6   :  { %4901 = vmatpush1.bf16.msra.mxu0 %v8660_v13  ;;  %4965 = vmatpush1.bf16.msra.mxu1 %v8661_v17 }
 0x1a7   :  { %4903 = vmatprep.subr.bf16.mxu0 %v8662_v18  ;;  %4967 = vmatprep.subr.bf16.mxu1 %v8663_v22  ;;  %v95_v18 = vsub.s32 3, %v8709_v6 }
 0x1aa   :  { %4905 = vmatpush1.bf16.msra.mxu0 %v8664_v26  ;;  %4969 = vmatpush1.bf16.msra.mxu1 %v8665_v27 }
 0x1ab   :  { %4907 = vmatprep.subr.bf16.mxu0 %v8666_v31  ;;  %4971 = vmatprep.subr.bf16.mxu1 %v8667_v35 }
 0x1ae   :  { %4909 = vmatpush1.bf16.msra.mxu0 %v8668_v39  ;;  %4973 = vmatpush1.bf16.msra.mxu1 %v8669_v40  ;;  %v7083_v40 = vrot.slane %v79_v59, %v95_v18  ;;  %v1217_v18 = vld [vmem:[#allocation5] sm:$0xff] }
 0x1af   :  { %4911 = vmatprep.subr.bf16.mxu0 %v8670_v44  ;;  %4975 = vmatprep.subr.bf16.mxu1 %v8671_v51  ;;  %v91_v44 = vsub.s32 2, %v8709_v6 }
 0x1b0   :  { %8711 = vst [vmem:[#allocation16_spill] sm:$0xff] %v7083_v40 }
 0x1b2   :  { %4913 = vmatpush1.bf16.msra.mxu0 %v8672_v52  ;;  %4977 = vmatpush1.bf16.msra.mxu1 %v8673_v53  ;;  %v7087_v52 = vrot.slane %v79_v59, %v91_v44  ;;  %v1232_v44 = vld [vmem:[#allocation5 + $0x78] sm:$0xff] }
 0x1b3   :  { %4915 = vmatprep.subr.bf16.mxu0 %v8674_v57  ;;  %4979 = vmatprep.subr.bf16.mxu1 %v8675_v63 }
 0x1b4   :  { %8712 = vst [vmem:[#allocation17_spill] sm:$0xff] %v7087_v52 }
 0x1b6   :  { %4917 = vmatpush1.bf16.msra.mxu0 %v8676_v1  ;;  %4981 = vmatpush1.bf16.msra.mxu1 %v8677_v2 }
 0x1b7   :  { %4919 = vmatprep.subr.bf16.mxu0 %v8678_v7  ;;  %4983 = vmatprep.subr.bf16.mxu1 %v8679_v16 }
 0x1ba   :  { %4921 = vmatpush1.bf16.msra.mxu0 %v8680_v19  ;;  %4985 = vmatpush1.bf16.msra.mxu1 %v8681_v20 }
 0x1bb   :  { %4923 = vmatprep.subr.bf16.mxu0 %v8682_v25  ;;  %4987 = vmatprep.subr.bf16.mxu1 %v8683_v34 }
 0x1be   :  { %4925 = vmatpush1.bf16.msra.mxu0 %v8684_v36  ;;  %4989 = vmatpush1.bf16.msra.mxu1 %v8685_v37 }
 0x1bf   :  { %4927 = vmatprep.subr.bf16.mxu0 %v8686_v43  ;;  %4991 = vmatprep.subr.bf16.mxu1 %v8687_v50 }
 0x1c2   :  { %4929 = vmatpush1.bf16.msra.mxu0 %v8688_v54  ;;  %4993 = vmatpush1.bf16.msra.mxu1 %v8689_v55 }
 0x1c3   :  { %4931 = vmatprep.subr.bf16.mxu0 %v8690_v60  ;;  %4995 = vmatprep.subr.bf16.mxu1 %v8691_v10 }
 0x1c6   :  { %4933 = vmatpush1.bf16.msra.mxu0 %v8692_v11  ;;  %4997 = vmatpush1.bf16.msra.mxu1 %v8693_v12 }
 0x1c7   :  { %4935 = vmatprep.subr.bf16.mxu0 %v8694_v23  ;;  %4999 = vmatprep.subr.bf16.mxu1 %v8695_v33  ;;  %v658_v33 = vld [vmem:[#allocation2 + $0x8] sm:$0xff] }
 0x1ca   :  { %4937 = vmatpush1.bf16.msra.mxu0 %v8696_v38  ;;  %5001 = vmatpush1.bf16.msra.mxu1 %v8697_v41 }
 0x1cb   :  { %4939 = vmatprep.subr.bf16.mxu0 %v8698_v46  ;;  %5003 = vmatprep.subr.bf16.mxu1 %v6922_v30  ;;  %v1218_v30 = vld [vmem:[#allocation5 + $0x8] sm:$0xff] }
 0x1cc   :  { %v7065_v29 = vpack.c.bf16 %v1222_v47, %v1218_v30 }
 0x1ce   :  { %4941 = vmatpush1.bf16.msra.mxu0 %v8699_v49  ;;  %5005 = vmatpush1.bf16.msra.mxu1 %v8700_v56 }
 0x1cf   :  { %4943 = vmatprep.subr.bf16.mxu0 %v8701_v62  ;;  %5007 = vmatprep.subr.bf16.mxu1 %v8702_v48 }
 0x1d2   :  { %4945 = vmatpush1.bf16.msra.mxu0 %v8703_v15  ;;  %5009 = vmatpush1.bf16.msra.mxu1 %v8704_v14 }
 0x1d3   :  { %4947 = vmatprep.subr.bf16.mxu0 %v8705_v24  ;;  %5011 = vmatprep.subr.bf16.mxu1 %v8706_v61 }
 0x1d6   :  { %4949 = vmatpush1.bf16.msra.mxu0 %v8707_v3  ;;  %5013 = vmatpush1.bf16.msra.mxu1 %v8708_v0 }
 0x1d7   :  { %5015 = vmatprep.subr.bf16.mxu0 %v7065_v29  ;;  %5047 = vmatprep.subr.bf16.mxu1 %v7067_v21 }
 0x24c   :  { %v556_v13 = vpop.f32.mrb[2].mxu0  ;;  %v627_v17 = vpop.f32.mrb[2].mxu1 }
 0x24d   :  { %v557_v22 = vadd.f32 %v556_v13, %v7076_v32  ;;  %v558_v26 = vpop.f32.mrb[3].mxu0  ;;  %v629_v27 = vpop.f32.mrb[3].mxu1  ;;  %v628_v57 = vadd.f32 %v627_v17, %v7087_v52 }
 0x24e   :  { %v559_v31 = vadd.f32 %v558_v26, %v7078_v9  ;;  %v630_v51 = vadd.f32 %v629_v27, %v7083_v40  ;;  %v1219_v26 = vld [vmem:[#allocation5 + $0x10] sm:$0xff] }
 0x24f   :  { %v4585_v35 = vmul.f32 -1.442695, %v557_v22  ;;  %v1221_v22 = vld [vmem:[#allocation5 + $0x20] sm:$0xff]  ;;  %v1223_v27 = vld [vmem:[#allocation5 + $0x30] sm:$0xff] }
 0x250   :  { %v4586_v39 = vmul.f32 -1.442695, %v559_v31  ;;  %v4587_v53 = vmul.f32 -1.442695, %v630_v51  ;;  %v1226_v31 = vld [vmem:[#allocation5 + $0x48] sm:$0xff] }
 0x251   :  { %6194 = vpow2.f32 %v4585_v35  ;;  %v1230_v35 = vld [vmem:[#allocation5 + $0x68] sm:$0xff] }
 0x252   :  { %6196 = vpow2.f32 %v4586_v39  ;;  %v1228_v39 = vld [vmem:[#allocation5 + $0x58] sm:$0xff] }
 0x253   :  { %6198 = vpow2.f32 %v4587_v53 }
 0x254   :  { %6200 = vtanh.f32 %v628_v57  ;;  %v7099_v57 = vpack.c.bf16 %v1221_v22, %v1217_v18  ;;  %v1255_v18 = vld [vmem:[#allocation5 + $0x130] sm:$0xff]  ;;  %v1258_v22 = vld [vmem:[#allocation5 + $0x148] sm:$0xff] }
 0x25b   :  { %v6195_v63 = vpop.eup %6194 }
 0x25c   :  { %v6197_v1 = vpop.eup %6196  ;;  %v635_v2 = vadd.f32 1.0, %v6195_v63  ;;  %v7101_v63 = vpack.c.bf16 %v1223_v27, %v1219_v26  ;;  %v1262_v26 = vld [vmem:[#allocation5 + $0x168] sm:$0xff]  ;;  %v1260_v27 = vld [vmem:[#allocation5 + $0x158] sm:$0xff] }
 0x25d   :  { %v641_v7 = vadd.f32 1.0, %v6197_v1  ;;  %v6199_v16 = vpop.eup %6198  ;;  %v1229_v1 = vld [vmem:[#allocation5 + $0x60] sm:$0xff] }
 0x25e   :  { %6202 = vrcp.f32 %v635_v2  ;;  %v6201_v19 = vpop.eup %6200  ;;  %v648_v36 = vadd.f32 1.0, %v6199_v16  ;;  %v7107_v16 = vpack.c.bf16 %v1232_v44, %v1228_v39  ;;  %v1257_v44 = vld [vmem:[#allocation5 + $0x140] sm:$0xff] }
 0x25f   :  { %6204 = vrcp.f32 %v641_v7  ;;  %v7105_v7 = vpack.c.bf16 %v1230_v35, %v1226_v31  ;;  %v1264_v31 = vld [vmem:[#allocation5 + $0x178] sm:$0xff] }
 0x260   :  { %6206 = vrcp.f32 %v648_v36  ;;  %v1236_v36 = vld [vmem:[#allocation5 + $0x98] sm:$0xff] }
 0x268   :  { %v6203_v20 = vpop.eup %6202 }
 0x269   :  { %v6205_v25 = vpop.eup %6204  ;;  %v652_v34 = vmul.f32 %v6203_v20, %v6201_v19  ;;  %v1227_v19 = vld [vmem:[#allocation5 + $0x50] sm:$0xff] }
 0x26a   :  { %v651_v37 = vmul.f32 0.0, %v6205_v25  ;;  %v6207_v56 = vpop.eup %6206  ;;  %v1231_v20 = vld [vmem:[#allocation5 + $0x70] sm:$0xff]  ;;  %v1234_v25 = vld [vmem:[#allocation5 + $0x88] sm:$0xff] }
 0x26c   :  { %v7090_v43 = vadd.f32 %v652_v34, %v651_v37  ;;  %v789_v50 = vpop.f32.mrb[4].mxu0  ;;  %v860_v54 = vpop.f32.mrb[4].mxu1  ;;  %v1238_v34 = vld [vmem:[#allocation5 + $0xa8] sm:$0xff]  ;;  %v1240_v37 = vld [vmem:[#allocation5 + $0xb8] sm:$0xff] }
 0x26d   :  { %v791_v55 = vpop.f32.mrb[5].mxu0  ;;  %v862_v60 = vpop.f32.mrb[5].mxu1 }
 0x26e   :  { %6208 = vtanh.f32 %v7090_v43  ;;  %v869_v10 = vcombine.low %v789_v50, %v791_v55  ;;  %v870_v11 = vcombine.low %v860_v54, %v862_v60  ;;  %v7115_v54 = vpack.c.bf16 %v1231_v20, %v1227_v19  ;;  %v1233_v55 = vld [vmem:[#allocation5 + $0x80] sm:$0xff]  ;;  %v1263_v19 = vld [vmem:[#allocation5 + $0x170] sm:$0xff]  ;;  %v1266_v20 = vld [vmem:[#allocation5 + $0x188] sm:$0xff] }
 0x26f   :  { %v1237_v60 = vld [vmem:[#allocation5 + $0xa0] sm:$0xff] }
 0x270   :  { %v877_v12 = vrot.slane %v869_v10, %v6962_v28  ;;  %v884_v23 = vrot.slane %v870_v11, %v6962_v28  ;;  %v7119_v10 = vpack.c.bf16 %v1238_v34, %v1234_v25  ;;  %v7121_v11 = vpack.c.bf16 %v1240_v37, %v1236_v36  ;;  %v1270_v25 = vld [vmem:[#allocation5 + $0x1a8] sm:$0xff]  ;;  %v1268_v34 = vld [vmem:[#allocation5 + $0x198] sm:$0xff] }
 0x271   :  { %v1272_v36 = vld [vmem:[#allocation5 + $0x1b8] sm:$0xff] }
 0x272   :  { %v885_v38 = vcombine.low %v877_v12, %v884_v23  ;;  %v1235_v12 = vld [vmem:[#allocation5 + $0x90] sm:$0xff] }
 0x273   :  { %v1239_v23 = vld [vmem:[#allocation5 + $0xb0] sm:$0xff] }
 0x274   :  { %v887_v41 = vadd.f32 %v885_v38, %v658_v33  ;;  %v1242_v33 = vld [vmem:[#allocation5 + $0xc8] sm:$0xff] }
 0x275   :  { %v1246_v38 = vld [vmem:[#allocation5 + $0xe8] sm:$0xff] }
 0x276   :  { %v4588_v46 = vmul.f32 -1.442695, %v887_v41  ;;  %v895_v49 = vrot.slane %v887_v41, 2  ;;  %v906_v14 = vrot.slane %v887_v41, 6  ;;  %v903_v3 = vrot.slane %v887_v41, 4  ;;  %v1244_v41 = vld [vmem:[#allocation5 + $0xd8] sm:$0xff] }
 0x278   :  { %v6209_v62 = vpop.eup %6208  ;;  %6210 = vpow2.f32 %v4588_v46  ;;  %v4589_v48 = vmul.f32 -1.442695, %v895_v49  ;;  %v4590_v24 = vmul.f32 -1.442695, %v906_v14  ;;  %v1248_v46 = vld [vmem:[#allocation5 + $0xf8] sm:$0xff]  ;;  %v7127_v49 = vpack.c.bf16 %v1237_v60, %v1233_v55  ;;  %v1265_v60 = vld [vmem:[#allocation5 + $0x180] sm:$0xff] }
 0x279   :  { %v655_v15 = vmul.f32 %v6209_v62, %v6207_v56  ;;  %v7129_v56 = vpack.c.bf16 %v1239_v23, %v1235_v12  ;;  %v1241_v62 = vld [vmem:[#allocation5 + $0xc0] sm:$0xff]  ;;  %v7135_v14 = vpack.c.bf16 %v1248_v46, %v1244_v41  ;;  %v7169_v23 = vpack.c.bf16 %v1270_v25, %v1266_v20  ;;  %v1271_v41 = vld [vmem:[#allocation5 + $0x1b0] sm:$0xff]  ;;  %v1274_v46 = vld [vmem:[#allocation5 + $0x1c8] sm:$0xff] }
 0x27a   :  { %6212 = vpow2.f32 %v4589_v48  ;;  %v1245_v48 = vld [vmem:[#allocation5 + $0xe0] sm:$0xff] }
 0x27b   :  { %656 = vst [vmem:[#allocation10] sm:$0x3] %v655_v15  ;;  %1111 = vmatprep.mubr.f32.mxu0 %v655_v15  ;;  %1182 = vmatprep.mubr.f32.mxu1 %v655_v15  ;;  %6214 = vpow2.f32 %v4590_v24  ;;  %v7133_v15 = vpack.c.bf16 %v1246_v38, %v1242_v33  ;;  %v1243_v24 = vld [vmem:[#allocation5 + $0xd0] sm:$0xff]  ;;  %v1269_v12 = vld [vmem:[#allocation5 + $0x1a0] sm:$0xff]  ;;  %v7171_v33 = vpack.c.bf16 %v1272_v36, %v1268_v34 }
 0x27c   :  { %v1267_v38 = vld [vmem:[#allocation5 + $0x190] sm:$0xff] }
 0x27d   :  { %v1479_v34 = vld [vmem:[#allocation7 + $0x10] sm:$0xff] }
 0x27e   :  { %v1483_v36 = vld [vmem:[#allocation7 + $0x30] sm:$0xff] }
 0x282   :  { %v6211_v61 = vpop.eup %6210 }
 0x283   :  { %v891_v0 = vadd.f32 1.0, %v6211_v61  ;;  %v1247_v61 = vld [vmem:[#allocation5 + $0xf0] sm:$0xff] }
 0x284   :  { %v6213_v30 = vpop.eup %6212 }
 0x285   :  { %6216 = vrcp.f32 %v891_v0  ;;  %v900_v47 = vadd.f32 1.0, %v6213_v30  ;;  %v6215_v42 = vpop.eup %6214  ;;  %v1254_v0 = vld [vmem:[#allocation5 + $0x128] sm:$0xff]  ;;  %v1252_v30 = vld [vmem:[#allocation5 + $0x118] sm:$0xff] }
 0x286   :  { %6218 = vtanh.f32 %v903_v3  ;;  %v911_v59 = vadd.f32 1.0, %v6215_v42  ;;  %v1250_v3 = vld [vmem:[#allocation5 + $0x108] sm:$0xff]  ;;  %v7139_v42 = vpack.c.bf16 %v1245_v48, %v1241_v62  ;;  %v1276_v48 = vld [vmem:[#allocation5 + $0x1d8] sm:$0xff] }
 0x287   :  { %6220 = vrcp.f32 %v900_v47  ;;  %v1256_v47 = vld [vmem:[#allocation5 + $0x138] sm:$0xff]  ;;  %v1278_v62 = vld [vmem:[#allocation5 + $0x1e8] sm:$0xff] }
 0x288   :  { %6222 = vrcp.f32 %v911_v59  ;;  %v7145_v59 = vpack.c.bf16 %v1254_v0, %v1250_v3  ;;  %v7177_v3 = vpack.c.bf16 %v1271_v41, %v1267_v38  ;;  %v1273_v0 = vld [vmem:[#allocation5 + $0x1c0] sm:$0xff]  ;;  %v1488_v38 = vld [vmem:[#allocation7 + $0x58] sm:$0xff] }
 0x28f   :  { %v6217_v58 = vpop.eup %6216 }
 0x290   :  { %v6219_v6 = vpop.eup %6218 }
 0x291   :  { %v6221_v4 = vpop.eup %6220  ;;  %v915_v13 = vmul.f32 %v6219_v6, %v6217_v58  ;;  %v7141_v58 = vpack.c.bf16 %v1247_v61, %v1243_v24  ;;  %v1249_v6 = vld [vmem:[#allocation5 + $0x100] sm:$0xff]  ;;  %v1280_v24 = vld [vmem:[#allocation5 + $0x1f8] sm:$0xff]  ;;  %v7175_v61 = vpack.c.bf16 %v1269_v12, %v1265_v60  ;;  %v7204_v60 = vpack.c.bf16 %v1483_v36, %v1479_v34  ;;  %v1490_v12 = vld [vmem:[#allocation7 + $0x68] sm:$0xff] }
 0x292   :  { %v914_v45 = vmul.f32 %v6221_v4, %v6966_v8  ;;  %v6223_v51 = vpop.eup %6222  ;;  %v1225_v8 = vld [vmem:[#allocation5 + $0x40] sm:$0xff] }
 0x293   :  { %v7113_v50 = vpack.c.bf16 %v1229_v1, %v1225_v8  ;;  %v1253_v4 = vld [vmem:[#allocation5 + $0x120] sm:$0xff]  ;;  %v7159_v8 = vpack.c.bf16 %v1264_v31, %v1260_v27  ;;  %v1259_v1 = vld [vmem:[#allocation5 + $0x150] sm:$0xff]  ;;  %v1482_v27 = vld [vmem:[#allocation7 + $0x28] sm:$0xff]  ;;  %8714 = vst [vmem:[#allocation19_spill] sm:$0xff] %v7204_v60 }
 0x294   :  { %v7096_v17 = vadd.f32 %v915_v13, %v914_v45  ;;  %v7147_v45 = vpack.c.bf16 %v1256_v47, %v1252_v30  ;;  %v1251_v13 = vld [vmem:[#allocation5 + $0x110] sm:$0xff]  ;;  %v7151_v35 = vpack.c.bf16 %v1253_v4, %v1249_v6  ;;  %v7165_v55 = vpack.c.bf16 %v1263_v19, %v1259_v1  ;;  %v1277_v6 = vld [vmem:[#allocation5 + $0x1e0] sm:$0xff]  ;;  %v1480_v31 = vld [vmem:[#allocation7 + $0x18] sm:$0xff] }
 0x295   :  { %v7153_v39 = vpack.c.bf16 %v1255_v18, %v1251_v13  ;;  %v7181_v30 = vpack.c.bf16 %v1278_v62, %v1274_v46  ;;  %v7183_v47 = vpack.c.bf16 %v1280_v24, %v1276_v48  ;;  %v1275_v4 = vld [vmem:[#allocation5 + $0x1d0] sm:$0xff]  ;;  %v7187_v18 = vpack.c.bf16 %v1277_v6, %v1273_v0  ;;  %v1477_v1 = vld [vmem:[#allocation7] sm:$0xff]  ;;  %v1492_v46 = vld [vmem:[#allocation7 + $0x78] sm:$0xff] }
 0x296   :  { %6224 = vtanh.f32 %v7096_v17  ;;  %v1279_v13 = vld [vmem:[#allocation5 + $0x1f0] sm:$0xff]  ;;  %v1481_v19 = vld [vmem:[#allocation7 + $0x20] sm:$0xff]  ;;  %v7211_v24 = vpack.c.bf16 %v1492_v46, %v1488_v38 }
 0x297   :  { %v7201_v25 = vpack.c.bf16 %v1481_v19, %v1477_v1  ;;  %v1485_v62 = vld [vmem:[#allocation7 + $0x40] sm:$0xff]  ;;  %v1487_v6 = vld [vmem:[#allocation7 + $0x50] sm:$0xff]  ;;  %v1500_v1 = vld [vmem:[#allocation7 + $0xb8] sm:$0xff] }
 0x298   :  { %v1489_v48 = vld [vmem:[#allocation7 + $0x60] sm:$0xff]  ;;  %8716 = vst [vmem:[#allocation21_spill] sm:$0xff] %v7211_v24  ;;  %v1499_v38 = vld [vmem:[#allocation7 + $0xb0] sm:$0xff] }
 0x299   :  { %8713 = vst [vmem:[#allocation18_spill] sm:$0xff] %v7201_v25  ;;  %v7213_v0 = vpack.c.bf16 %v1489_v48, %v1485_v62  ;;  %v1493_v19 = vld [vmem:[#allocation7 + $0x80] sm:$0xff]  ;;  %v1502_v62 = vld [vmem:[#allocation7 + $0xc8] sm:$0xff] }
 0x29a   :  { %v1497_v34 = vld [vmem:[#allocation7 + $0xa0] sm:$0xff]  ;;  %v1506_v48 = vld [vmem:[#allocation7 + $0xe8] sm:$0xff] }
 0x29b   :  { %8717 = vst [vmem:[#allocation22_spill] sm:$0xff] %v7213_v0 }
 0x2a0   :  { %v6225_v53 = vpop.eup %6224 }
 0x2a1   :  { %v7103_v2 = vmul.f32 %v6225_v53, %v6223_v51  ;;  %v1261_v51 = vld [vmem:[#allocation5 + $0x160] sm:$0xff]  ;;  %v7157_v53 = vpack.c.bf16 %v1262_v26, %v1258_v22  ;;  %v7189_v22 = vpack.c.bf16 %v1279_v13, %v1275_v4  ;;  %v1478_v26 = vld [vmem:[#allocation7 + $0x8] sm:$0xff]  ;;  %v1491_v4 = vld [vmem:[#allocation7 + $0x70] sm:$0xff] }
 0x2a2   :  { %v7163_v37 = vpack.c.bf16 %v1261_v51, %v1257_v44  ;;  %v7197_v44 = vpack.c.bf16 %v1482_v27, %v1478_v26  ;;  %v1484_v51 = vld [vmem:[#allocation7 + $0x38] sm:$0xff]  ;;  %v7216_v13 = vpack.c.bf16 %v1491_v4, %v1487_v6  ;;  %v1494_v26 = vld [vmem:[#allocation7 + $0x88] sm:$0xff]  ;;  %v7233_v4 = vpack.c.bf16 %v1506_v48, %v1502_v62 }
 0x2a3   :  { %1112 = vmatmul.mubr.f32.vlgmr.msra.gmra.mrb[6].mxu0 %v7103_v2  ;;  %1183 = vmatmul.mubr.f32.vlgmr.msra.gmra.mrb[6].mxu1 %v7103_v2  ;;  %v7199_v20 = vpack.c.bf16 %v1484_v51, %v1480_v31  ;;  %v1498_v27 = vld [vmem:[#allocation7 + $0xa8] sm:$0xff]  ;;  %v1496_v31 = vld [vmem:[#allocation7 + $0x98] sm:$0xff] }
 0x2a4   :  { %5017 = vmatpush1.bf16.msra.mxu0 %v7099_v57  ;;  %5049 = vmatpush1.bf16.msra.mxu1 %v7101_v63  ;;  %8718 = vst [vmem:[#allocation23_spill] sm:$0xff] %v7216_v13  ;;  %v7221_v51 = vpack.c.bf16 %v1498_v27, %v1494_v26  ;;  %v7223_v36 = vpack.c.bf16 %v1500_v1, %v1496_v31  ;;  %v1504_v6 = vld [vmem:[#allocation7 + $0xd8] sm:$0xff]  ;;  %8723 = vst [vmem:[#allocation28_spill] sm:$0xff] %v7233_v4  ;;  %v1501_v27 = vld [vmem:[#allocation7 + $0xc0] sm:$0xff] }
 0x2a5   :  { %5019 = vmatprep.subr.bf16.mxu0 %v7105_v7  ;;  %5051 = vmatprep.subr.bf16.mxu1 %v7107_v16  ;;  %v1508_v26 = vld [vmem:[#allocation7 + $0xf8] sm:$0xff]  ;;  %v1505_v31 = vld [vmem:[#allocation7 + $0xe0] sm:$0xff]  ;;  %v1514_v62 = vld [vmem:[#allocation7 + $0x128] sm:$0xff] }
 0x2a6   :  { %1345 = vmatprep.mubr.f32.mxu0 %v8658_v5  ;;  %1416 = vmatprep.mubr.f32.mxu1 %v8658_v5  ;;  %8719 = vst [vmem:[#allocation24_spill] sm:$0xff] %v7221_v51  ;;  %8720 = vst [vmem:[#allocation25_spill] sm:$0xff] %v7223_v36  ;;  %v7235_v1 = vpack.c.bf16 %v1508_v26, %v1504_v6  ;;  %v1512_v6 = vld [vmem:[#allocation7 + $0x118] sm:$0xff] }
 0x2a7   :  { %v1516_v26 = vld [vmem:[#allocation7 + $0x138] sm:$0xff] }
 0x2a8   :  { %5021 = vmatpush1.bf16.msra.mxu0 %v7113_v50  ;;  %5053 = vmatpush1.bf16.msra.mxu1 %v7115_v54  ;;  %8724 = vst [vmem:[#allocation29_spill] sm:$0xff] %v7235_v1 }
 0x2a9   :  { %5023 = vmatprep.subr.bf16.mxu0 %v7119_v10  ;;  %5055 = vmatprep.subr.bf16.mxu1 %v7121_v11 }
 0x2ac   :  { %5025 = vmatpush1.bf16.msra.mxu0 %v7127_v49  ;;  %5057 = vmatpush1.bf16.msra.mxu1 %v7129_v56 }
 0x2ad   :  { %5027 = vmatprep.subr.bf16.mxu0 %v7133_v15  ;;  %5059 = vmatprep.subr.bf16.mxu1 %v7135_v14 }
 0x2b0   :  { %5029 = vmatpush1.bf16.msra.mxu0 %v7139_v42  ;;  %5061 = vmatpush1.bf16.msra.mxu1 %v7141_v58 }
 0x2b1   :  { %5031 = vmatprep.subr.bf16.mxu0 %v7145_v59  ;;  %5063 = vmatprep.subr.bf16.mxu1 %v7147_v45 }
 0x2b4   :  { %5033 = vmatpush1.bf16.msra.mxu0 %v7151_v35  ;;  %5065 = vmatpush1.bf16.msra.mxu1 %v7153_v39 }
 0x2b5   :  { %5035 = vmatprep.subr.bf16.mxu0 %v7157_v53  ;;  %5067 = vmatprep.subr.bf16.mxu1 %v7159_v8 }
 0x2b8   :  { %5037 = vmatpush1.bf16.msra.mxu0 %v7163_v37  ;;  %5069 = vmatpush1.bf16.msra.mxu1 %v7165_v55 }
 0x2b9   :  { %5039 = vmatprep.subr.bf16.mxu0 %v7169_v23  ;;  %5071 = vmatprep.subr.bf16.mxu1 %v7171_v33 }
 0x2bc   :  { %5041 = vmatpush1.bf16.msra.mxu0 %v7175_v61  ;;  %5073 = vmatpush1.bf16.msra.mxu1 %v7177_v3 }
 0x2bd   :  { %5043 = vmatprep.subr.bf16.mxu0 %v7181_v30  ;;  %5075 = vmatprep.subr.bf16.mxu1 %v7183_v47 }
 0x2c0   :  { %5045 = vmatpush1.bf16.msra.mxu0 %v7187_v18  ;;  %5077 = vmatpush1.bf16.msra.mxu1 %v7189_v22 }
 0x2c1   :  { %5079 = vmatprep.subr.bf16.mxu0 %v7197_v44  ;;  %5143 = vmatprep.subr.bf16.mxu1 %v7199_v20 }
 0x2c3   :  { %1346 = vmatmul.mubr.f32.vlgmr.msra.gmra.mrb[8].mxu0 %v7103_v2  ;;  %1417 = vmatmul.mubr.f32.vlgmr.msra.gmra.mrb[8].mxu1 %v7103_v2  ;;  %v1486_v2 = vld [vmem:[#allocation7 + $0x48] sm:$0xff] }
 0x2c4   :  { %5081 = vmatpush1.bf16.msra.mxu0 %v7201_v25  ;;  %5145 = vmatpush1.bf16.msra.mxu1 %v7204_v60  ;;  %v7209_v41 = vpack.c.bf16 %v1490_v12, %v1486_v2  ;;  %v7225_v2 = vpack.c.bf16 %v1497_v34, %v1493_v19  ;;  %v1495_v12 = vld [vmem:[#allocation7 + $0x90] sm:$0xff]  ;;  %v7237_v19 = vpack.c.bf16 %v1505_v31, %v1501_v27  ;;  %v1509_v27 = vld [vmem:[#allocation7 + $0x100] sm:$0xff]  ;;  %v1590_v60 = vld [vmem:[#allocation7 + $0x388] sm:$0xff] }
 0x2c5   :  { %5147 = vmatprep.subr.bf16.mxu1 %v7211_v24  ;;  %v7228_v46 = vpack.c.bf16 %v1499_v38, %v1495_v12  ;;  %v1503_v34 = vld [vmem:[#allocation7 + $0xd0] sm:$0xff]  ;;  %v7247_v31 = vpack.c.bf16 %v1516_v26, %v1512_v6  ;;  %v1524_v6 = vld [vmem:[#allocation7 + $0x178] sm:$0xff]  ;;  %v1517_v26 = vld [vmem:[#allocation7 + $0x140] sm:$0xff] }
 0x2c6   :  { %8715 = vst [vmem:[#allocation20_spill] sm:$0xff] %v7209_v41  ;;  %5083 = vmatprep.subr.bf16.mxu0 %v7209_v41  ;;  %8721 = vst [vmem:[#allocation26_spill] sm:$0xff] %v7225_v2  ;;  %v1507_v12 = vld [vmem:[#allocation7 + $0xf0] sm:$0xff]  ;;  %v1582_v41 = vld [vmem:[#allocation7 + $0x348] sm:$0xff] }
 0x2c7   :  { %8722 = vst [vmem:[#allocation27_spill] sm:$0xff] %v7228_v46  ;;  %8725 = vst [vmem:[#allocation30_spill] sm:$0xff] %v7237_v19  ;;  %v7240_v38 = vpack.c.bf16 %v1507_v12, %v1503_v34  ;;  %v1575_v24 = vld [vmem:[#allocation7 + $0x310] sm:$0xff]  ;;  %v1592_v25 = vld [vmem:[#allocation7 + $0x398] sm:$0xff] }
 0x2c8   :  { %5085 = vmatpush1.bf16.msra.mxu0 %v7213_v0  ;;  %5149 = vmatpush1.bf16.msra.mxu1 %v7216_v13  ;;  %8728 = vst [vmem:[#allocation33_spill] sm:$0xff] %v7247_v31  ;;  %v1561_v13 = vld [vmem:[#allocation7 + $0x2a0] sm:$0xff]  ;;  %v1578_v0 = vld [vmem:[#allocation7 + $0x328] sm:$0xff] }
 0x2c9   :  { %5087 = vmatprep.subr.bf16.mxu0 %v7221_v51  ;;  %5151 = vmatprep.subr.bf16.mxu1 %v7223_v36  ;;  %8726 = vst [vmem:[#allocation31_spill] sm:$0xff] %v7240_v38  ;;  %v1511_v36 = vld [vmem:[#allocation7 + $0x110] sm:$0xff] }
 0x2cc   :  { %5089 = vmatpush1.bf16.msra.mxu0 %v7225_v2  ;;  %5153 = vmatpush1.bf16.msra.mxu1 %v7228_v46  ;;  %v1510_v46 = vld [vmem:[#allocation7 + $0x108] sm:$0xff]  ;;  %v1513_v2 = vld [vmem:[#allocation7 + $0x120] sm:$0xff] }
 0x2cd   :  { %5091 = vmatprep.subr.bf16.mxu0 %v7233_v4  ;;  %5155 = vmatprep.subr.bf16.mxu1 %v7235_v1  ;;  %v7245_v48 = vpack.c.bf16 %v1514_v62, %v1510_v46  ;;  %v1515_v4 = vld [vmem:[#allocation7 + $0x130] sm:$0xff]  ;;  %v7250_v34 = vpack.c.bf16 %v1513_v2, %v1509_v27  ;;  %v1520_v46 = vld [vmem:[#allocation7 + $0x158] sm:$0xff]  ;;  %v1521_v1 = vld [vmem:[#allocation7 + $0x160] sm:$0xff] }
 0x2ce   :  { %v7252_v12 = vpack.c.bf16 %v1515_v4, %v1511_v36  ;;  %v7259_v51 = vpack.c.bf16 %v1524_v6, %v1520_v46  ;;  %v7261_v2 = vpack.c.bf16 %v1521_v1, %v1517_v26  ;;  %v1519_v36 = vld [vmem:[#allocation7 + $0x150] sm:$0xff]  ;;  %v1525_v1 = vld [vmem:[#allocation7 + $0x180] sm:$0xff] }
 0x2cf   :  { %8727 = vst [vmem:[#allocation32_spill] sm:$0xff] %v7245_v48  ;;  %8729 = vst [vmem:[#allocation34_spill] sm:$0xff] %v7250_v34  ;;  %v1523_v4 = vld [vmem:[#allocation7 + $0x170] sm:$0xff]  ;;  %v1529_v46 = vld [vmem:[#allocation7 + $0x1a0] sm:$0xff] }
 0x2d0   :  { %5093 = vmatpush1.bf16.msra.mxu0 %v7237_v19  ;;  %5157 = vmatpush1.bf16.msra.mxu1 %v7240_v38  ;;  %8730 = vst [vmem:[#allocation35_spill] sm:$0xff] %v7252_v12  ;;  %v1518_v19 = vld [vmem:[#allocation7 + $0x148] sm:$0xff]  ;;  %8732 = vst [vmem:[#allocation37_spill] sm:$0xff] %v7259_v51  ;;  %v7264_v27 = vpack.c.bf16 %v1523_v4, %v1519_v36  ;;  %v7273_v26 = vpack.c.bf16 %v1529_v46, %v1525_v1  ;;  %v1527_v36 = vld [vmem:[#allocation7 + $0x190] sm:$0xff] }
 0x2d1   :  { %5095 = vmatprep.subr.bf16.mxu0 %v7245_v48  ;;  %5159 = vmatprep.subr.bf16.mxu1 %v7247_v31  ;;  %v1522_v38 = vld [vmem:[#allocation7 + $0x168] sm:$0xff]  ;;  %8733 = vst [vmem:[#allocation38_spill] sm:$0xff] %v7261_v2  ;;  %v1531_v4 = vld [vmem:[#allocation7 + $0x1b0] sm:$0xff] }
 0x2d2   :  { %v7257_v62 = vpack.c.bf16 %v1522_v38, %v1518_v19  ;;  %8734 = vst [vmem:[#allocation39_spill] sm:$0xff] %v7264_v27  ;;  %v1530_v31 = vld [vmem:[#allocation7 + $0x1a8] sm:$0xff]  ;;  %v1532_v38 = vld [vmem:[#allocation7 + $0x1b8] sm:$0xff]  ;;  %8737 = vst [vmem:[#allocation42_spill] sm:$0xff] %v7273_v26 }
 0x2d3   :  { %v1562_v48 = vld [vmem:[#allocation7 + $0x2a8] sm:$0xff] }
 0x2d4   :  { %5097 = vmatpush1.bf16.msra.mxu0 %v7250_v34  ;;  %5161 = vmatpush1.bf16.msra.mxu1 %v7252_v12  ;;  %8731 = vst [vmem:[#allocation36_spill] sm:$0xff] %v7257_v62  ;;  %v1526_v34 = vld [vmem:[#allocation7 + $0x188] sm:$0xff]  ;;  %v1528_v12 = vld [vmem:[#allocation7 + $0x198] sm:$0xff] }
 0x2d5   :  { %5099 = vmatprep.subr.bf16.mxu0 %v7257_v62  ;;  %5163 = vmatprep.subr.bf16.mxu1 %v7259_v51  ;;  %v7269_v19 = vpack.c.bf16 %v1530_v31, %v1526_v34  ;;  %v7271_v6 = vpack.c.bf16 %v1532_v38, %v1528_v12  ;;  %v7276_v51 = vpack.c.bf16 %v1531_v4, %v1527_v36  ;;  %v1538_v62 = vld [vmem:[#allocation7 + $0x1e8] sm:$0xff]  ;;  %v1540_v34 = vld [vmem:[#allocation7 + $0x1f8] sm:$0xff]  ;;  %v1533_v12 = vld [vmem:[#allocation7 + $0x1c0] sm:$0xff] }
 0x2d6   :  { %v1537_v38 = vld [vmem:[#allocation7 + $0x1e0] sm:$0xff]  ;;  %v1535_v36 = vld [vmem:[#allocation7 + $0x1d0] sm:$0xff] }
 0x2d7   :  { %8735 = vst [vmem:[#allocation40_spill] sm:$0xff] %v7269_v19  ;;  %8736 = vst [vmem:[#allocation41_spill] sm:$0xff] %v7271_v6  ;;  %v7285_v46 = vpack.c.bf16 %v1537_v38, %v1533_v12  ;;  %v1539_v4 = vld [vmem:[#allocation7 + $0x1f0] sm:$0xff] }
 0x2d8   :  { %5101 = vmatpush1.bf16.msra.mxu0 %v7261_v2  ;;  %5165 = vmatpush1.bf16.msra.mxu1 %v7264_v27  ;;  %8738 = vst [vmem:[#allocation43_spill] sm:$0xff] %v7276_v51  ;;  %v1534_v2 = vld [vmem:[#allocation7 + $0x1c8] sm:$0xff]  ;;  %v1536_v27 = vld [vmem:[#allocation7 + $0x1d8] sm:$0xff] }
 0x2d9   :  { %5103 = vmatprep.subr.bf16.mxu0 %v7269_v19  ;;  %5167 = vmatprep.subr.bf16.mxu1 %v7271_v6  ;;  %v7281_v31 = vpack.c.bf16 %v1538_v62, %v1534_v2  ;;  %v7283_v1 = vpack.c.bf16 %v1540_v34, %v1536_v27  ;;  %8741 = vst [vmem:[#allocation46_spill] sm:$0xff] %v7285_v46  ;;  %v1546_v19 = vld [vmem:[#allocation7 + $0x228] sm:$0xff]  ;;  %v1548_v2 = vld [vmem:[#allocation7 + $0x238] sm:$0xff]  ;;  %v1541_v27 = vld [vmem:[#allocation7 + $0x200] sm:$0xff] }
 0x2da   :  { %v7288_v6 = vpack.c.bf16 %v1539_v4, %v1535_v36  ;;  %v1545_v34 = vld [vmem:[#allocation7 + $0x220] sm:$0xff]  ;;  %v1543_v36 = vld [vmem:[#allocation7 + $0x210] sm:$0xff] }
 0x2db   :  { %8739 = vst [vmem:[#allocation44_spill] sm:$0xff] %v7281_v31  ;;  %8740 = vst [vmem:[#allocation45_spill] sm:$0xff] %v7283_v1  ;;  %v7297_v38 = vpack.c.bf16 %v1545_v34, %v1541_v27  ;;  %v1547_v4 = vld [vmem:[#allocation7 + $0x230] sm:$0xff] }
 0x2dc   :  { %5105 = vmatpush1.bf16.msra.mxu0 %v7273_v26  ;;  %5169 = vmatpush1.bf16.msra.mxu1 %v7276_v51  ;;  %8742 = vst [vmem:[#allocation47_spill] sm:$0xff] %v7288_v6  ;;  %v1542_v26 = vld [vmem:[#allocation7 + $0x208] sm:$0xff]  ;;  %v1544_v51 = vld [vmem:[#allocation7 + $0x218] sm:$0xff] }
 0x2dd   :  { %5107 = vmatprep.subr.bf16.mxu0 %v7281_v31  ;;  %5171 = vmatprep.subr.bf16.mxu1 %v7283_v1  ;;  %v7293_v62 = vpack.c.bf16 %v1546_v19, %v1542_v26  ;;  %v7295_v12 = vpack.c.bf16 %v1548_v2, %v1544_v51  ;;  %8745 = vst [vmem:[#allocation50_spill] sm:$0xff] %v7297_v38  ;;  %v1554_v31 = vld [vmem:[#allocation7 + $0x268] sm:$0xff]  ;;  %v1556_v51 = vld [vmem:[#allocation7 + $0x278] sm:$0xff]  ;;  %v1549_v26 = vld [vmem:[#allocation7 + $0x240] sm:$0xff] }
 0x2de   :  { %v7300_v1 = vpack.c.bf16 %v1547_v4, %v1543_v36  ;;  %v1553_v2 = vld [vmem:[#allocation7 + $0x260] sm:$0xff]  ;;  %v1551_v36 = vld [vmem:[#allocation7 + $0x250] sm:$0xff] }
 0x2df   :  { %8743 = vst [vmem:[#allocation48_spill] sm:$0xff] %v7293_v62  ;;  %8744 = vst [vmem:[#allocation49_spill] sm:$0xff] %v7295_v12  ;;  %v7309_v34 = vpack.c.bf16 %v1553_v2, %v1549_v26  ;;  %v1555_v4 = vld [vmem:[#allocation7 + $0x270] sm:$0xff] }
 0x2e0   :  { %5109 = vmatpush1.bf16.msra.mxu0 %v7285_v46  ;;  %5173 = vmatpush1.bf16.msra.mxu1 %v7288_v6  ;;  %8746 = vst [vmem:[#allocation51_spill] sm:$0xff] %v7300_v1  ;;  %v1550_v46 = vld [vmem:[#allocation7 + $0x248] sm:$0xff]  ;;  %v1552_v6 = vld [vmem:[#allocation7 + $0x258] sm:$0xff]  ;;  %v1559_v26 = vld [vmem:[#allocation7 + $0x290] sm:$0xff] }
 0x2e1   :  { %5111 = vmatprep.subr.bf16.mxu0 %v7293_v62  ;;  %5175 = vmatprep.subr.bf16.mxu1 %v7295_v12  ;;  %v7305_v19 = vpack.c.bf16 %v1554_v31, %v1550_v46  ;;  %v7307_v27 = vpack.c.bf16 %v1556_v51, %v1552_v6  ;;  %8749 = vst [vmem:[#allocation54_spill] sm:$0xff] %v7309_v34  ;;  %v1558_v62 = vld [vmem:[#allocation7 + $0x288] sm:$0xff]  ;;  %v1564_v46 = vld [vmem:[#allocation7 + $0x2b8] sm:$0xff]  ;;  %v1563_v2 = vld [vmem:[#allocation7 + $0x2b0] sm:$0xff] }
 0x2e2   :  { %v7312_v12 = vpack.c.bf16 %v1555_v4, %v1551_v36  ;;  %v7315_v31 = vpack.c.bf16 %v1562_v48, %v1558_v62  ;;  %v1566_v36 = vld [vmem:[#allocation7 + $0x2c8] sm:$0xff]  ;;  %v7324_v4 = vpack.c.bf16 %v1563_v2, %v1559_v26  ;;  %v1568_v62 = vld [vmem:[#allocation7 + $0x2d8] sm:$0xff] }
 0x2e3   :  { %8747 = vst [vmem:[#allocation52_spill] sm:$0xff] %v7305_v19  ;;  %8748 = vst [vmem:[#allocation53_spill] sm:$0xff] %v7307_v27  ;;  %v1570_v48 = vld [vmem:[#allocation7 + $0x2e8] sm:$0xff] }
 0x2e4   :  { %5113 = vmatpush1.bf16.msra.mxu0 %v7297_v38  ;;  %5177 = vmatpush1.bf16.msra.mxu1 %v7300_v1  ;;  %8750 = vst [vmem:[#allocation55_spill] sm:$0xff] %v7312_v12  ;;  %v1560_v38 = vld [vmem:[#allocation7 + $0x298] sm:$0xff]  ;;  %8751 = vst [vmem:[#allocation56_spill] sm:$0xff] %v7315_v31  ;;  %v1557_v1 = vld [vmem:[#allocation7 + $0x280] sm:$0xff] }
 0x2e5   :  { %5115 = vmatprep.subr.bf16.mxu0 %v7305_v19  ;;  %5179 = vmatprep.subr.bf16.mxu1 %v7307_v27  ;;  %v7319_v6 = vpack.c.bf16 %v1564_v46, %v1560_v38  ;;  %v7321_v51 = vpack.c.bf16 %v1561_v13, %v1557_v1  ;;  %8754 = vst [vmem:[#allocation59_spill] sm:$0xff] %v7324_v4  ;;  %v1572_v27 = vld [vmem:[#allocation7 + $0x2f8] sm:$0xff]  ;;  %v1565_v38 = vld [vmem:[#allocation7 + $0x2c0] sm:$0xff]  ;;  %v1567_v13 = vld [vmem:[#allocation7 + $0x2d0] sm:$0xff] }
 0x2e6   :  { %v7327_v19 = vpack.c.bf16 %v1570_v48, %v1566_v36  ;;  %v1569_v46 = vld [vmem:[#allocation7 + $0x2e0] sm:$0xff]  ;;  %v1571_v1 = vld [vmem:[#allocation7 + $0x2f0] sm:$0xff] }
 0x2e7   :  { %8752 = vst [vmem:[#allocation57_spill] sm:$0xff] %v7319_v6  ;;  %8753 = vst [vmem:[#allocation58_spill] sm:$0xff] %v7321_v51  ;;  %v7333_v26 = vpack.c.bf16 %v1569_v46, %v1565_v38  ;;  %v7335_v2 = vpack.c.bf16 %v1571_v1, %v1567_v13  ;;  %v1573_v36 = vld [vmem:[#allocation7 + $0x300] sm:$0xff]  ;;  %v1584_v38 = vld [vmem:[#allocation7 + $0x358] sm:$0xff] }
 0x2e8   :  { %5117 = vmatpush1.bf16.msra.mxu0 %v7309_v34  ;;  %5181 = vmatpush1.bf16.msra.mxu1 %v7312_v12  ;;  %8755 = vst [vmem:[#allocation60_spill] sm:$0xff] %v7327_v19  ;;  %v7329_v34 = vpack.c.bf16 %v1572_v27, %v1568_v62  ;;  %v1574_v12 = vld [vmem:[#allocation7 + $0x308] sm:$0xff]  ;;  %v1577_v62 = vld [vmem:[#allocation7 + $0x320] sm:$0xff]  ;;  %v1588_v46 = vld [vmem:[#allocation7 + $0x378] sm:$0xff] }
 0x2e9   :  { %5119 = vmatprep.subr.bf16.mxu0 %v7315_v31  ;;  %5183 = vmatprep.subr.bf16.mxu1 %v7319_v6  ;;  %8757 = vst [vmem:[#allocation62_spill] sm:$0xff] %v7333_v26  ;;  %8758 = vst [vmem:[#allocation63_spill] sm:$0xff] %v7335_v2  ;;  %v1576_v31 = vld [vmem:[#allocation7 + $0x318] sm:$0xff]  ;;  %v7339_v27 = vpack.c.bf16 %v1578_v0, %v1574_v12  ;;  %v7345_v13 = vpack.c.bf16 %v1577_v62, %v1573_v36  ;;  %v1585_v0 = vld [vmem:[#allocation7 + $0x360] sm:$0xff] }
 0x2ea   :  { %8756 = vst [vmem:[#allocation61_spill] sm:$0xff] %v7329_v34  ;;  %v1580_v6 = vld [vmem:[#allocation7 + $0x338] sm:$0xff]  ;;  %v1589_v36 = vld [vmem:[#allocation7 + $0x380] sm:$0xff] }
 0x2eb   :  { %8759 = vst [vmem:[#allocation64_spill] sm:$0xff] %v7339_v27  ;;  %v7341_v48 = vpack.c.bf16 %v1580_v6, %v1576_v31  ;;  %8761 = vst [vmem:[#allocation66_spill] sm:$0xff] %v7345_v13  ;;  %v7353_v31 = vpack.c.bf16 %v1588_v46, %v1584_v38  ;;  %v1583_v6 = vld [vmem:[#allocation7 + $0x350] sm:$0xff]  ;;  %v1593_v62 = vld [vmem:[#allocation7 + $0x3a0] sm:$0xff] }
 0x2ec   :  { %5121 = vmatpush1.bf16.msra.mxu0 %v7321_v51  ;;  %5185 = vmatpush1.bf16.msra.mxu1 %v7324_v4  ;;  %v1579_v51 = vld [vmem:[#allocation7 + $0x330] sm:$0xff]  ;;  %v1586_v4 = vld [vmem:[#allocation7 + $0x368] sm:$0xff] }
 0x2ed   :  { %5123 = vmatprep.subr.bf16.mxu0 %v7327_v19  ;;  %5187 = vmatprep.subr.bf16.mxu1 %v7329_v34  ;;  %8760 = vst [vmem:[#allocation65_spill] sm:$0xff] %v7341_v48  ;;  %v7347_v1 = vpack.c.bf16 %v1579_v51, %v1575_v24  ;;  %v1581_v34 = vld [vmem:[#allocation7 + $0x340] sm:$0xff]  ;;  %v7351_v12 = vpack.c.bf16 %v1586_v4, %v1582_v41  ;;  %v1587_v19 = vld [vmem:[#allocation7 + $0x370] sm:$0xff] }
 0x2ee   :  { %v7357_v24 = vpack.c.bf16 %v1585_v0, %v1581_v34  ;;  %v7359_v51 = vpack.c.bf16 %v1587_v19, %v1583_v6  ;;  %v1591_v38 = vld [vmem:[#allocation7 + $0x390] sm:$0xff]  ;;  %v7369_v19 = vpack.c.bf16 %v1593_v62, %v1589_v36  ;;  %v1597_v0 = vld [vmem:[#allocation7 + $0x3c0] sm:$0xff] }
 0x2ef   :  { %8762 = vst [vmem:[#allocation67_spill] sm:$0xff] %v7347_v1  ;;  %v1595_v46 = vld [vmem:[#allocation7 + $0x3b0] sm:$0xff] }
 0x2f0   :  { %5125 = vmatpush1.bf16.msra.mxu0 %v7333_v26  ;;  %5189 = vmatpush1.bf16.msra.mxu1 %v7335_v2  ;;  %v1594_v26 = vld [vmem:[#allocation7 + $0x3a8] sm:$0xff]  ;;  %v1596_v2 = vld [vmem:[#allocation7 + $0x3b8] sm:$0xff]  ;;  %v7371_v34 = vpack.c.bf16 %v1595_v46, %v1591_v38  ;;  %v1603_v6 = vld [vmem:[#allocation7 + $0x3f0] sm:$0xff] }
 0x2f1   :  { %5127 = vmatprep.subr.bf16.mxu0 %v7339_v27  ;;  %5191 = vmatprep.subr.bf16.mxu1 %v7341_v48  ;;  %v7363_v41 = vpack.c.bf16 %v1594_v26, %v1590_v60  ;;  %v7365_v4 = vpack.c.bf16 %v1596_v2, %v1592_v25  ;;  %v1598_v48 = vld [vmem:[#allocation7 + $0x3c8] sm:$0xff]  ;;  %v1600_v27 = vld [vmem:[#allocation7 + $0x3d8] sm:$0xff]  ;;  %v1601_v26 = vld [vmem:[#allocation7 + $0x3e0] sm:$0xff] }
 0x2f2   :  { %v1599_v2 = vld [vmem:[#allocation7 + $0x3d0] sm:$0xff]  ;;  %v7381_v36 = vpack.c.bf16 %v1601_v26, %v1597_v0 }
 0x2f3   :  { %v7383_v62 = vpack.c.bf16 %v1603_v6, %v1599_v2 }
 0x2f4   :  { %5129 = vmatpush1.bf16.msra.mxu0 %v7345_v13  ;;  %5193 = vmatpush1.bf16.msra.mxu1 %v7347_v1  ;;  %v1602_v13 = vld [vmem:[#allocation7 + $0x3e8] sm:$0xff]  ;;  %v1604_v1 = vld [vmem:[#allocation7 + $0x3f8] sm:$0xff]  ;;  %8764 = vst [vmem:[#allocation69_spill] sm:$0xff] %v7381_v36 }
 0x2f5   :  { %5131 = vmatprep.subr.bf16.mxu0 %v7351_v12  ;;  %5195 = vmatprep.subr.bf16.mxu1 %v7353_v31  ;;  %v7375_v25 = vpack.c.bf16 %v1602_v13, %v1598_v48  ;;  %v7377_v60 = vpack.c.bf16 %v1604_v1, %v1600_v27  ;;  %8765 = vst [vmem:[#allocation70_spill] sm:$0xff] %v7383_v62 }
 0x2f7   :  { %8763 = vst [vmem:[#allocation68_spill] sm:$0xff] %v7377_v60 }
 0x2f8   :  { %5133 = vmatpush1.bf16.msra.mxu0 %v7357_v24  ;;  %5197 = vmatpush1.bf16.msra.mxu1 %v7359_v51 }
 0x2f9   :  { %5135 = vmatprep.subr.bf16.mxu0 %v7363_v41  ;;  %5199 = vmatprep.subr.bf16.mxu1 %v7365_v4 }
 0x2fc   :  { %5137 = vmatpush1.bf16.msra.mxu0 %v7369_v19  ;;  %5201 = vmatpush1.bf16.msra.mxu1 %v7371_v34 }
 0x2fd   :  { %5139 = vmatprep.subr.bf16.mxu0 %v7375_v25  ;;  %5203 = vmatprep.subr.bf16.mxu1 %v7377_v60 }
 0x300   :  { %5141 = vmatpush1.bf16.msra.mxu0 %v7381_v36  ;;  %5205 = vmatpush1.bf16.msra.mxu1 %v7383_v62 }
 0x301   :  { %5207 = vmatprep.subr.bf16.mxu0 %v7065_v29  ;;  %5239 = vmatprep.subr.bf16.mxu1 %v7067_v21 }
 0x376   :  { %v1113_v27 = vpop.f32.mrb[6].mxu0  ;;  %v1184_v48 = vpop.f32.mrb[6].mxu1 }
 0x377   :  { %v1114_v13 = vadd.f32 %v1113_v27, %v7076_v32  ;;  %v1115_v1 = vpop.f32.mrb[7].mxu0  ;;  %v1186_v38 = vpop.f32.mrb[7].mxu1  ;;  %v1185_v62 = vadd.f32 %v1184_v48, %v7087_v52 }
 0x378   :  { %v1116_v46 = vadd.f32 %v1115_v1, %v7078_v9  ;;  %v1187_v2 = vadd.f32 %v1186_v38, %v7083_v40 }
 0x379   :  { %v4591_v0 = vmul.f32 -1.442695, %v1114_v13 }
 0x37a   :  { %v4592_v26 = vmul.f32 -1.442695, %v1116_v46  ;;  %v4593_v6 = vmul.f32 -1.442695, %v1187_v2 }
 0x37b   :  { %6226 = vpow2.f32 %v4591_v0 }
 0x37c   :  { %6228 = vpow2.f32 %v4592_v26 }
 0x37d   :  { %6230 = vpow2.f32 %v4593_v6 }
 0x37e   :  { %6232 = vtanh.f32 %v1185_v62 }
 0x385   :  { %v6227_v29 = vpop.eup %6226 }
 0x386   :  { %v6229_v36 = vpop.eup %6228  ;;  %v1192_v21 = vadd.f32 1.0, %v6227_v29 }
 0x387   :  { %v1198_v60 = vadd.f32 1.0, %v6229_v36  ;;  %v6231_v27 = vpop.eup %6230 }
 0x388   :  { %6234 = vrcp.f32 %v1192_v21  ;;  %v6233_v32 = vpop.eup %6232  ;;  %v1205_v0 = vadd.f32 1.0, %v6231_v27  ;;  %v1216_v21 = vld [vmem:[#allocation2 + $0x10] sm:$0xff] }
 0x389   :  { %6236 = vrcp.f32 %v1198_v60 }
 0x38a   :  { %6238 = vrcp.f32 %v1205_v0 }
 0x392   :  { %v6235_v1 = vpop.eup %6234 }
 0x393   :  { %v6237_v13 = vpop.eup %6236  ;;  %v1209_v46 = vmul.f32 %v6235_v1, %v6233_v32 }
 0x394   :  { %v1208_v26 = vmul.f32 %v6237_v13, %v7090_v43  ;;  %v6239_v13 = vpop.eup %6238 }
 0x396   :  { %v1347_v38 = vpop.f32.mrb[8].mxu0  ;;  %v1418_v2 = vpop.f32.mrb[8].mxu1  ;;  %v7396_v40 = vadd.f32 %v1209_v46, %v1208_v26 }
 0x397   :  { %v1349_v48 = vpop.f32.mrb[9].mxu0  ;;  %v1420_v29 = vpop.f32.mrb[9].mxu1 }
 0x398   :  { %v1427_v6 = vcombine.low %v1347_v38, %v1349_v48  ;;  %v1428_v62 = vcombine.low %v1418_v2, %v1420_v29  ;;  %6240 = vtanh.f32 %v7396_v40 }
 0x39a   :  { %v1435_v60 = vrot.slane %v1427_v6, %v6962_v28  ;;  %v1442_v36 = vrot.slane %v1428_v62, %v6962_v28 }
 0x39c   :  { %v1443_v32 = vcombine.low %v1435_v60, %v1442_v36 }
 0x39e   :  { %v1445_v27 = vadd.f32 %v1443_v32, %v1216_v21 }
 0x3a0   :  { %v4594_v1 = vmul.f32 -1.442695, %v1445_v27  ;;  %v1453_v43 = vrot.slane %v1445_v27, 2  ;;  %v1464_v26 = vrot.slane %v1445_v27, 6  ;;  %v1461_v48 = vrot.slane %v1445_v27, 4 }
 0x3a2   :  { %v6241_v52 = vpop.eup %6240  ;;  %6242 = vpow2.f32 %v4594_v1  ;;  %v4595_v46 = vmul.f32 -1.442695, %v1453_v43  ;;  %v4596_v38 = vmul.f32 -1.442695, %v1464_v26  ;;  %v8799_v26 = vld [vmem:[#allocation51_spill] sm:$0xff] }
 0x3a3   :  { %v1212_v0 = vmul.f32 %v6241_v52, %v6239_v13 }
 0x3a4   :  { %6244 = vpow2.f32 %v4595_v46 }
 0x3a5   :  { %1214 = vst [vmem:[#allocation10 + $0x2] sm:$0x3] %v1212_v0  ;;  %1669 = vmatprep.mubr.f32.mxu0 %v1212_v0  ;;  %1740 = vmatprep.mubr.f32.mxu1 %v1212_v0  ;;  %6246 = vpow2.f32 %v4596_v38  ;;  %v8800_v38 = vld [vmem:[#allocation52_spill] sm:$0xff] }
 0x3ac   :  { %v6243_v2 = vpop.eup %6242 }
 0x3ad   :  { %v1449_v29 = vadd.f32 1.0, %v6243_v2  ;;  %v8801_v2 = vld [vmem:[#allocation53_spill] sm:$0xff] }
 0x3ae   :  { %v6245_v6 = vpop.eup %6244 }
 0x3af   :  { %6248 = vrcp.f32 %v1449_v29  ;;  %v1458_v62 = vadd.f32 1.0, %v6245_v6  ;;  %v6247_v60 = vpop.eup %6246  ;;  %v8803_v29 = vld [vmem:[#allocation55_spill] sm:$0xff]  ;;  %v8804_v6 = vld [vmem:[#allocation56_spill] sm:$0xff] }
 0x3b0   :  { %6250 = vtanh.f32 %v1461_v48  ;;  %v1469_v52 = vadd.f32 1.0, %v6247_v60  ;;  %v8802_v48 = vld [vmem:[#allocation54_spill] sm:$0xff] }
 0x3b1   :  { %6252 = vrcp.f32 %v1458_v62  ;;  %v8805_v62 = vld [vmem:[#allocation57_spill] sm:$0xff]  ;;  %v8806_v60 = vld [vmem:[#allocation58_spill] sm:$0xff] }
 0x3b2   :  { %6254 = vrcp.f32 %v1469_v52  ;;  %v8810_v52 = vld [vmem:[#allocation62_spill] sm:$0xff] }
 0x3b9   :  { %v6249_v36 = vpop.eup %6248 }
 0x3ba   :  { %v6251_v21 = vpop.eup %6250 }
 0x3bb   :  { %v6253_v32 = vpop.eup %6252  ;;  %v1473_v43 = vmul.f32 %v6251_v21, %v6249_v36  ;;  %v8807_v36 = vld [vmem:[#allocation59_spill] sm:$0xff]  ;;  %v8808_v21 = vld [vmem:[#allocation60_spill] sm:$0xff] }
 0x3bc   :  { %v1472_v1 = vmul.f32 %v6253_v32, %v7096_v17  ;;  %v6255_v27 = vpop.eup %6254  ;;  %v8766_v17 = vld [vmem:[#allocation18_spill] sm:$0xff]  ;;  %v8809_v32 = vld [vmem:[#allocation61_spill] sm:$0xff] }
 0x3be   :  { %v7402_v13 = vadd.f32 %v1473_v43, %v1472_v1  ;;  %v8811_v1 = vld [vmem:[#allocation63_spill] sm:$0xff]  ;;  %v8812_v43 = vld [vmem:[#allocation64_spill] sm:$0xff] }
 0x3c0   :  { %6256 = vtanh.f32 %v7402_v13 }
 0x3ca   :  { %v6257_v46 = vpop.eup %6256 }
 0x3cb   :  { %v1476_v0 = vmul.f32 %v6257_v46, %v6255_v27  ;;  %v8813_v27 = vld [vmem:[#allocation65_spill] sm:$0xff]  ;;  %v8814_v46 = vld [vmem:[#allocation66_spill] sm:$0xff] }
 0x3cd   :  { %1670 = vmatmul.mubr.f32.vlgmr.msra.gmra.mrb[10].mxu0 %v1476_v0  ;;  %1741 = vmatmul.mubr.f32.vlgmr.msra.gmra.mrb[10].mxu1 %v1476_v0 }
 0x3ce   :  { %5209 = vmatpush1.bf16.msra.mxu0 %v7099_v57  ;;  %5241 = vmatpush1.bf16.msra.mxu1 %v7101_v63  ;;  %v8767_v57 = vld [vmem:[#allocation19_spill] sm:$0xff]  ;;  %v8768_v63 = vld [vmem:[#allocation20_spill] sm:$0xff] }
 0x3cf   :  { %5211 = vmatprep.subr.bf16.mxu0 %v7105_v7  ;;  %5243 = vmatprep.subr.bf16.mxu1 %v7107_v16  ;;  %v8769_v7 = vld [vmem:[#allocation21_spill] sm:$0xff]  ;;  %v8770_v16 = vld [vmem:[#allocation22_spill] sm:$0xff] }
 0x3d0   :  { %1903 = vmatprep.mubr.f32.mxu0 %v8658_v5  ;;  %1974 = vmatprep.mubr.f32.mxu1 %v8658_v5 }
 0x3d2   :  { %5213 = vmatpush1.bf16.msra.mxu0 %v7113_v50  ;;  %5245 = vmatpush1.bf16.msra.mxu1 %v7115_v54  ;;  %v8771_v50 = vld [vmem:[#allocation23_spill] sm:$0xff]  ;;  %v8772_v54 = vld [vmem:[#allocation24_spill] sm:$0xff] }
 0x3d3   :  { %5215 = vmatprep.subr.bf16.mxu0 %v7119_v10  ;;  %5247 = vmatprep.subr.bf16.mxu1 %v7121_v11  ;;  %v8773_v10 = vld [vmem:[#allocation25_spill] sm:$0xff]  ;;  %v8774_v11 = vld [vmem:[#allocation26_spill] sm:$0xff] }
 0x3d6   :  { %5217 = vmatpush1.bf16.msra.mxu0 %v7127_v49  ;;  %5249 = vmatpush1.bf16.msra.mxu1 %v7129_v56  ;;  %v8775_v49 = vld [vmem:[#allocation27_spill] sm:$0xff]  ;;  %v8776_v56 = vld [vmem:[#allocation28_spill] sm:$0xff] }
 0x3d7   :  { %5219 = vmatprep.subr.bf16.mxu0 %v7133_v15  ;;  %5251 = vmatprep.subr.bf16.mxu1 %v7135_v14  ;;  %v8777_v15 = vld [vmem:[#allocation29_spill] sm:$0xff]  ;;  %v8778_v14 = vld [vmem:[#allocation30_spill] sm:$0xff] }
 0x3da   :  { %5221 = vmatpush1.bf16.msra.mxu0 %v7139_v42  ;;  %5253 = vmatpush1.bf16.msra.mxu1 %v7141_v58  ;;  %v8779_v42 = vld [vmem:[#allocation31_spill] sm:$0xff]  ;;  %v8780_v58 = vld [vmem:[#allocation32_spill] sm:$0xff] }
 0x3db   :  { %5223 = vmatprep.subr.bf16.mxu0 %v7145_v59  ;;  %5255 = vmatprep.subr.bf16.mxu1 %v7147_v45  ;;  %v8781_v59 = vld [vmem:[#allocation33_spill] sm:$0xff]  ;;  %v8782_v45 = vld [vmem:[#allocation34_spill] sm:$0xff] }
 0x3de   :  { %5225 = vmatpush1.bf16.msra.mxu0 %v7151_v35  ;;  %5257 = vmatpush1.bf16.msra.mxu1 %v7153_v39  ;;  %v8783_v35 = vld [vmem:[#allocation35_spill] sm:$0xff]  ;;  %v8784_v39 = vld [vmem:[#allocation36_spill] sm:$0xff] }
 0x3df   :  { %5227 = vmatprep.subr.bf16.mxu0 %v7157_v53  ;;  %5259 = vmatprep.subr.bf16.mxu1 %v7159_v8  ;;  %v8785_v53 = vld [vmem:[#allocation37_spill] sm:$0xff]  ;;  %v8786_v8 = vld [vmem:[#allocation38_spill] sm:$0xff] }
 0x3e2   :  { %5229 = vmatpush1.bf16.msra.mxu0 %v7163_v37  ;;  %5261 = vmatpush1.bf16.msra.mxu1 %v7165_v55  ;;  %v8787_v37 = vld [vmem:[#allocation39_spill] sm:$0xff]  ;;  %v8788_v55 = vld [vmem:[#allocation40_spill] sm:$0xff] }
 0x3e3   :  { %5231 = vmatprep.subr.bf16.mxu0 %v7169_v23  ;;  %5263 = vmatprep.subr.bf16.mxu1 %v7171_v33  ;;  %v8789_v23 = vld [vmem:[#allocation41_spill] sm:$0xff]  ;;  %v8790_v33 = vld [vmem:[#allocation42_spill] sm:$0xff] }
 0x3e6   :  { %5233 = vmatpush1.bf16.msra.mxu0 %v7175_v61  ;;  %5265 = vmatpush1.bf16.msra.mxu1 %v7177_v3  ;;  %v8791_v61 = vld [vmem:[#allocation43_spill] sm:$0xff]  ;;  %v8792_v3 = vld [vmem:[#allocation44_spill] sm:$0xff] }
 0x3e7   :  { %5235 = vmatprep.subr.bf16.mxu0 %v7181_v30  ;;  %5267 = vmatprep.subr.bf16.mxu1 %v7183_v47  ;;  %v8793_v30 = vld [vmem:[#allocation45_spill] sm:$0xff]  ;;  %v8794_v47 = vld [vmem:[#allocation46_spill] sm:$0xff] }
 0x3ea   :  { %5237 = vmatpush1.bf16.msra.mxu0 %v7187_v18  ;;  %5269 = vmatpush1.bf16.msra.mxu1 %v7189_v22  ;;  %v8795_v18 = vld [vmem:[#allocation47_spill] sm:$0xff]  ;;  %v8796_v22 = vld [vmem:[#allocation48_spill] sm:$0xff] }
 0x3eb   :  { %5271 = vmatprep.subr.bf16.mxu0 %v7197_v44  ;;  %5335 = vmatprep.subr.bf16.mxu1 %v7199_v20  ;;  %v8797_v44 = vld [vmem:[#allocation49_spill] sm:$0xff]  ;;  %v8798_v20 = vld [vmem:[#allocation50_spill] sm:$0xff] }
 0x3ed   :  { %1904 = vmatmul.mubr.f32.vlgmr.msra.gmra.mrb[12].mxu0 %v1476_v0  ;;  %1975 = vmatmul.mubr.f32.vlgmr.msra.gmra.mrb[12].mxu1 %v1476_v0  ;;  %v8815_v0 = vld [vmem:[#allocation67_spill] sm:$0xff] }
 0x3ee   :  { %5273 = vmatpush1.bf16.msra.mxu0 %v8766_v17  ;;  %5337 = vmatpush1.bf16.msra.mxu1 %v8767_v57  ;;  %v8816_v17 = vld [vmem:[#allocation68_spill] sm:$0xff]  ;;  %v8817_v57 = vld [vmem:[#allocation69_spill] sm:$0xff] }
 0x3ef   :  { %5275 = vmatprep.subr.bf16.mxu0 %v8768_v63  ;;  %5339 = vmatprep.subr.bf16.mxu1 %v8769_v7  ;;  %v2336_v63 = vld [vmem:[#allocation5 + $0x18] sm:$0xff] }
 0x3f2   :  { %5277 = vmatpush1.bf16.msra.mxu0 %v8770_v16  ;;  %5341 = vmatpush1.bf16.msra.mxu1 %v8771_v50 }
 0x3f3   :  { %5279 = vmatprep.subr.bf16.mxu0 %v8772_v54  ;;  %5343 = vmatprep.subr.bf16.mxu1 %v8773_v10 }
 0x3f6   :  { %5281 = vmatpush1.bf16.msra.mxu0 %v8774_v11  ;;  %5345 = vmatpush1.bf16.msra.mxu1 %v8775_v49  ;;  %v8820_v49 = vld [vmem:[#allocation16_spill] sm:$0xff] }
 0x3f7   :  { %5283 = vmatprep.subr.bf16.mxu0 %v8776_v56  ;;  %5347 = vmatprep.subr.bf16.mxu1 %v8777_v15 }
 0x3fa   :  { %5285 = vmatpush1.bf16.msra.mxu0 %v8778_v14  ;;  %5349 = vmatpush1.bf16.msra.mxu1 %v8779_v42  ;;  %v8821_v14 = vld [vmem:[#allocation17_spill] sm:$0xff] }
 0x3fb   :  { %5287 = vmatprep.subr.bf16.mxu0 %v8780_v58  ;;  %5351 = vmatprep.subr.bf16.mxu1 %v8781_v59 }
 0x3fe   :  { %5289 = vmatpush1.bf16.msra.mxu0 %v8782_v45  ;;  %5353 = vmatpush1.bf16.msra.mxu1 %v8783_v35 }
 0x3ff   :  { %5291 = vmatprep.subr.bf16.mxu0 %v8784_v39  ;;  %5355 = vmatprep.subr.bf16.mxu1 %v8785_v53 }
 0x402   :  { %5293 = vmatpush1.bf16.msra.mxu0 %v8786_v8  ;;  %5357 = vmatpush1.bf16.msra.mxu1 %v8787_v37 }
 0x403   :  { %5295 = vmatprep.subr.bf16.mxu0 %v8788_v55  ;;  %5359 = vmatprep.subr.bf16.mxu1 %v8789_v23 }
 0x406   :  { %5297 = vmatpush1.bf16.msra.mxu0 %v8790_v33  ;;  %5361 = vmatpush1.bf16.msra.mxu1 %v8791_v61 }
 0x407   :  { %5299 = vmatprep.subr.bf16.mxu0 %v8792_v3  ;;  %5363 = vmatprep.subr.bf16.mxu1 %v8793_v30 }
 0x40a   :  { %5301 = vmatpush1.bf16.msra.mxu0 %v8794_v47  ;;  %5365 = vmatpush1.bf16.msra.mxu1 %v8795_v18 }
 0x40b   :  { %5303 = vmatprep.subr.bf16.mxu0 %v8796_v22  ;;  %5367 = vmatprep.subr.bf16.mxu1 %v8797_v44 }
 0x40e   :  { %5305 = vmatpush1.bf16.msra.mxu0 %v8798_v20  ;;  %5369 = vmatpush1.bf16.msra.mxu1 %v8799_v26 }
 0x40f   :  { %5307 = vmatprep.subr.bf16.mxu0 %v8800_v38  ;;  %5371 = vmatprep.subr.bf16.mxu1 %v8801_v2  ;;  %v1774_v38 = vld [vmem:[#allocation2 + $0x18] sm:$0xff] }
 0x412   :  { %5309 = vmatpush1.bf16.msra.mxu0 %v8802_v48  ;;  %5373 = vmatpush1.bf16.msra.mxu1 %v8803_v29 }
 0x413   :  { %5311 = vmatprep.subr.bf16.mxu0 %v8804_v6  ;;  %5375 = vmatprep.subr.bf16.mxu1 %v8805_v62 }
 0x416   :  { %5313 = vmatpush1.bf16.msra.mxu0 %v8806_v60  ;;  %5377 = vmatpush1.bf16.msra.mxu1 %v8807_v36 }
 0x417   :  { %5315 = vmatprep.subr.bf16.mxu0 %v8808_v21  ;;  %5379 = vmatprep.subr.bf16.mxu1 %v8809_v32 }
 0x41a   :  { %5317 = vmatpush1.bf16.msra.mxu0 %v8810_v52  ;;  %5381 = vmatpush1.bf16.msra.mxu1 %v8811_v1 }
 0x41b   :  { %5319 = vmatprep.subr.bf16.mxu0 %v8812_v43  ;;  %5383 = vmatprep.subr.bf16.mxu1 %v8813_v27 }
 0x41e   :  { %5321 = vmatpush1.bf16.msra.mxu0 %v8814_v46  ;;  %5385 = vmatpush1.bf16.msra.mxu1 %v8815_v0 }
 0x41f   :  { %5323 = vmatprep.subr.bf16.mxu0 %v7351_v12  ;;  %5387 = vmatprep.subr.bf16.mxu1 %v7353_v31  ;;  %v8818_v12 = vld [vmem:[#allocation70_spill] sm:$0xff] }
 0x420   :  { %v2334_v31 = vld [vmem:[#allocation5 + $0x8] sm:$0xff] }
 0x422   :  { %5325 = vmatpush1.bf16.msra.mxu0 %v7357_v24  ;;  %5389 = vmatpush1.bf16.msra.mxu1 %v7359_v51  ;;  %v2338_v24 = vld [vmem:[#allocation5 + $0x28] sm:$0xff] }
 0x423   :  { %5327 = vmatprep.subr.bf16.mxu0 %v7363_v41  ;;  %5391 = vmatprep.subr.bf16.mxu1 %v7365_v4  ;;  %v7501_v51 = vpack.c.bf16 %v2338_v24, %v2334_v31  ;;  %v2340_v41 = vld [vmem:[#allocation5 + $0x38] sm:$0xff] }
 0x424   :  { %v7503_v7 = vpack.c.bf16 %v2340_v41, %v2336_v63 }
 0x426   :  { %5329 = vmatpush1.bf16.msra.mxu0 %v7369_v19  ;;  %5393 = vmatpush1.bf16.msra.mxu1 %v7371_v34  ;;  %v8819_v34 = vld [vmem:[#allocation15_spill] sm:$0xff] }
 0x427   :  { %5331 = vmatprep.subr.bf16.mxu0 %v7375_v25  ;;  %5395 = vmatprep.subr.bf16.mxu1 %v8816_v17 }
 0x42a   :  { %5333 = vmatpush1.bf16.msra.mxu0 %v8817_v57  ;;  %5397 = vmatpush1.bf16.msra.mxu1 %v8818_v12 }
 0x42b   :  { %5399 = vmatprep.subr.bf16.mxu0 %v7501_v51  ;;  %5431 = vmatprep.subr.bf16.mxu1 %v7503_v7 }
 0x4a0   :  { %v1671_v4 = vpop.f32.mrb[10].mxu0  ;;  %v1742_v19 = vpop.f32.mrb[10].mxu1 }
 0x4a1   :  { %v1672_v25 = vadd.f32 %v1671_v4, %v8819_v34  ;;  %v1673_v16 = vpop.f32.mrb[11].mxu0  ;;  %v1744_v50 = vpop.f32.mrb[11].mxu1  ;;  %v1743_v42 = vadd.f32 %v1742_v19, %v8821_v14  ;;  %v2333_v4 = vld [vmem:[#allocation5] sm:$0xff] }
 0x4a2   :  { %v1674_v54 = vadd.f32 %v1673_v16, %v7078_v9  ;;  %v1745_v56 = vadd.f32 %v1744_v50, %v8820_v49  ;;  %v2337_v19 = vld [vmem:[#allocation5 + $0x20] sm:$0xff]  ;;  %v2339_v16 = vld [vmem:[#allocation5 + $0x30] sm:$0xff]  ;;  %v2342_v50 = vld [vmem:[#allocation5 + $0x48] sm:$0xff] }
 0x4a3   :  { %v4597_v10 = vmul.f32 -1.442695, %v1672_v25  ;;  %v2335_v25 = vld [vmem:[#allocation5 + $0x10] sm:$0xff] }
 0x4a4   :  { %v4598_v11 = vmul.f32 -1.442695, %v1674_v54  ;;  %v4599_v15 = vmul.f32 -1.442695, %v1745_v56  ;;  %v2346_v54 = vld [vmem:[#allocation5 + $0x68] sm:$0xff] }
 0x4a5   :  { %6258 = vpow2.f32 %v4597_v10  ;;  %v2344_v10 = vld [vmem:[#allocation5 + $0x58] sm:$0xff] }
 0x4a6   :  { %6260 = vpow2.f32 %v4598_v11  ;;  %v2348_v11 = vld [vmem:[#allocation5 + $0x78] sm:$0xff] }
 0x4a7   :  { %6262 = vpow2.f32 %v4599_v15 }
 0x4a8   :  { %6264 = vtanh.f32 %v1743_v42  ;;  %v7521_v42 = vpack.c.bf16 %v2337_v19, %v2333_v4  ;;  %v2371_v4 = vld [vmem:[#allocation5 + $0x130] sm:$0xff]  ;;  %v2374_v19 = vld [vmem:[#allocation5 + $0x148] sm:$0xff] }
 0x4af   :  { %v6259_v58 = vpop.eup %6258 }
 0x4b0   :  { %v6261_v59 = vpop.eup %6260  ;;  %v1750_v45 = vadd.f32 1.0, %v6259_v58  ;;  %v7523_v58 = vpack.c.bf16 %v2339_v16, %v2335_v25  ;;  %v2378_v25 = vld [vmem:[#allocation5 + $0x168] sm:$0xff]  ;;  %v2376_v16 = vld [vmem:[#allocation5 + $0x158] sm:$0xff] }
 0x4b1   :  { %v1756_v35 = vadd.f32 1.0, %v6261_v59  ;;  %v6263_v39 = vpop.eup %6262  ;;  %v2345_v59 = vld [vmem:[#allocation5 + $0x60] sm:$0xff] }
 0x4b2   :  { %6266 = vrcp.f32 %v1750_v45  ;;  %v6265_v53 = vpop.eup %6264  ;;  %v1763_v23 = vadd.f32 1.0, %v6263_v39  ;;  %v7529_v39 = vpack.c.bf16 %v2348_v11, %v2344_v10  ;;  %v2373_v11 = vld [vmem:[#allocation5 + $0x140] sm:$0xff] }
 0x4b3   :  { %6268 = vrcp.f32 %v1756_v35  ;;  %v7527_v35 = vpack.c.bf16 %v2346_v54, %v2342_v50  ;;  %v2380_v50 = vld [vmem:[#allocation5 + $0x178] sm:$0xff] }
 0x4b4   :  { %6270 = vrcp.f32 %v1763_v23  ;;  %v2352_v23 = vld [vmem:[#allocation5 + $0x98] sm:$0xff] }
 0x4bc   :  { %v6267_v8 = vpop.eup %6266 }
 0x4bd   :  { %v6269_v37 = vpop.eup %6268  ;;  %v1767_v55 = vmul.f32 %v6267_v8, %v6265_v53  ;;  %v2343_v53 = vld [vmem:[#allocation5 + $0x50] sm:$0xff] }
 0x4be   :  { %v1766_v33 = vmul.f32 %v6269_v37, %v7396_v40  ;;  %v6271_v6 = vpop.eup %6270  ;;  %v2347_v8 = vld [vmem:[#allocation5 + $0x70] sm:$0xff]  ;;  %v2350_v37 = vld [vmem:[#allocation5 + $0x88] sm:$0xff] }
 0x4c0   :  { %v1905_v61 = vpop.f32.mrb[12].mxu0  ;;  %v1976_v3 = vpop.f32.mrb[12].mxu1  ;;  %v7512_v30 = vadd.f32 %v1767_v55, %v1766_v33  ;;  %v2354_v55 = vld [vmem:[#allocation5 + $0xa8] sm:$0xff]  ;;  %v2356_v33 = vld [vmem:[#allocation5 + $0xb8] sm:$0xff] }
 0x4c1   :  { %v1907_v47 = vpop.f32.mrb[13].mxu0  ;;  %v1978_v18 = vpop.f32.mrb[13].mxu1 }
 0x4c2   :  { %v1985_v22 = vcombine.low %v1905_v61, %v1907_v47  ;;  %v1986_v44 = vcombine.low %v1976_v3, %v1978_v18  ;;  %6272 = vtanh.f32 %v7512_v30  ;;  %v7537_v3 = vpack.c.bf16 %v2347_v8, %v2343_v53  ;;  %v2349_v47 = vld [vmem:[#allocation5 + $0x80] sm:$0xff]  ;;  %v2379_v53 = vld [vmem:[#allocation5 + $0x170] sm:$0xff]  ;;  %v2382_v8 = vld [vmem:[#allocation5 + $0x188] sm:$0xff] }
 0x4c3   :  { %v2353_v18 = vld [vmem:[#allocation5 + $0xa0] sm:$0xff] }
 0x4c4   :  { %v1993_v20 = vrot.slane %v1985_v22, %v6962_v28  ;;  %v2000_v26 = vrot.slane %v1986_v44, %v6962_v28  ;;  %v7541_v22 = vpack.c.bf16 %v2354_v55, %v2350_v37  ;;  %v7543_v44 = vpack.c.bf16 %v2356_v33, %v2352_v23  ;;  %v2386_v37 = vld [vmem:[#allocation5 + $0x1a8] sm:$0xff]  ;;  %v2384_v55 = vld [vmem:[#allocation5 + $0x198] sm:$0xff] }
 0x4c5   :  { %v2388_v23 = vld [vmem:[#allocation5 + $0x1b8] sm:$0xff] }
 0x4c6   :  { %v2001_v2 = vcombine.low %v1993_v20, %v2000_v26  ;;  %v2351_v20 = vld [vmem:[#allocation5 + $0x90] sm:$0xff] }
 0x4c7   :  { %v2355_v26 = vld [vmem:[#allocation5 + $0xb0] sm:$0xff] }
 0x4c8   :  { %v2003_v48 = vadd.f32 %v2001_v2, %v1774_v38  ;;  %v2358_v38 = vld [vmem:[#allocation5 + $0xc8] sm:$0xff] }
 0x4c9   :  { %v2362_v2 = vld [vmem:[#allocation5 + $0xe8] sm:$0xff] }
 0x4ca   :  { %v4600_v29 = vmul.f32 -1.442695, %v2003_v48  ;;  %v2011_v40 = vrot.slane %v2003_v48, 2  ;;  %v2022_v21 = vrot.slane %v2003_v48, 6  ;;  %v2019_v1 = vrot.slane %v2003_v48, 4  ;;  %v2360_v48 = vld [vmem:[#allocation5 + $0xd8] sm:$0xff] }
 0x4cc   :  { %v6273_v62 = vpop.eup %6272  ;;  %6274 = vpow2.f32 %v4600_v29  ;;  %v4601_v60 = vmul.f32 -1.442695, %v2011_v40  ;;  %v4602_v32 = vmul.f32 -1.442695, %v2022_v21  ;;  %v2364_v29 = vld [vmem:[#allocation5 + $0xf8] sm:$0xff]  ;;  %v7549_v40 = vpack.c.bf16 %v2353_v18, %v2349_v47  ;;  %v2381_v18 = vld [vmem:[#allocation5 + $0x180] sm:$0xff] }
 0x4cd   :  { %v1770_v36 = vmul.f32 %v6273_v62, %v6271_v6  ;;  %v7551_v6 = vpack.c.bf16 %v2355_v26, %v2351_v20  ;;  %v2357_v62 = vld [vmem:[#allocation5 + $0xc0] sm:$0xff]  ;;  %v7557_v21 = vpack.c.bf16 %v2364_v29, %v2360_v48  ;;  %v7591_v26 = vpack.c.bf16 %v2386_v37, %v2382_v8  ;;  %v2387_v48 = vld [vmem:[#allocation5 + $0x1b0] sm:$0xff]  ;;  %v2390_v29 = vld [vmem:[#allocation5 + $0x1c8] sm:$0xff] }
 0x4ce   :  { %6276 = vpow2.f32 %v4601_v60  ;;  %v2361_v60 = vld [vmem:[#allocation5 + $0xe0] sm:$0xff] }
 0x4cf   :  { %1772 = vst [vmem:[#allocation10 + $0x4] sm:$0x3] %v1770_v36  ;;  %2227 = vmatprep.mubr.f32.mxu0 %v1770_v36  ;;  %2298 = vmatprep.mubr.f32.mxu1 %v1770_v36  ;;  %6278 = vpow2.f32 %v4602_v32  ;;  %v7555_v36 = vpack.c.bf16 %v2362_v2, %v2358_v38  ;;  %v2359_v32 = vld [vmem:[#allocation5 + $0xd0] sm:$0xff]  ;;  %v2385_v20 = vld [vmem:[#allocation5 + $0x1a0] sm:$0xff]  ;;  %v7593_v38 = vpack.c.bf16 %v2388_v23, %v2384_v55 }
 0x4d0   :  { %v2383_v2 = vld [vmem:[#allocation5 + $0x190] sm:$0xff] }
 0x4d1   :  { %v2595_v55 = vld [vmem:[#allocation7 + $0x10] sm:$0xff] }
 0x4d2   :  { %v2599_v23 = vld [vmem:[#allocation7 + $0x30] sm:$0xff] }
 0x4d6   :  { %v6275_v52 = vpop.eup %6274 }
 0x4d7   :  { %v2007_v43 = vadd.f32 1.0, %v6275_v52  ;;  %v2363_v52 = vld [vmem:[#allocation5 + $0xf0] sm:$0xff] }
 0x4d8   :  { %v6277_v27 = vpop.eup %6276 }
 0x4d9   :  { %6280 = vrcp.f32 %v2007_v43  ;;  %v2016_v46 = vadd.f32 1.0, %v6277_v27  ;;  %v6279_v0 = vpop.eup %6278  ;;  %v2370_v43 = vld [vmem:[#allocation5 + $0x128] sm:$0xff]  ;;  %v2368_v27 = vld [vmem:[#allocation5 + $0x118] sm:$0xff] }
 0x4da   :  { %6282 = vtanh.f32 %v2019_v1  ;;  %v2027_v31 = vadd.f32 1.0, %v6279_v0  ;;  %v2366_v1 = vld [vmem:[#allocation5 + $0x108] sm:$0xff]  ;;  %v7561_v0 = vpack.c.bf16 %v2361_v60, %v2357_v62  ;;  %v2392_v60 = vld [vmem:[#allocation5 + $0x1d8] sm:$0xff] }
 0x4db   :  { %6284 = vrcp.f32 %v2016_v46  ;;  %v2372_v46 = vld [vmem:[#allocation5 + $0x138] sm:$0xff]  ;;  %v2394_v62 = vld [vmem:[#allocation5 + $0x1e8] sm:$0xff] }
 0x4dc   :  { %6286 = vrcp.f32 %v2027_v31  ;;  %v7567_v31 = vpack.c.bf16 %v2370_v43, %v2366_v1  ;;  %v7599_v1 = vpack.c.bf16 %v2387_v48, %v2383_v2  ;;  %v2389_v43 = vld [vmem:[#allocation5 + $0x1c0] sm:$0xff]  ;;  %v2604_v2 = vld [vmem:[#allocation7 + $0x58] sm:$0xff] }
 0x4e3   :  { %v6281_v17 = vpop.eup %6280 }
 0x4e4   :  { %v6283_v57 = vpop.eup %6282 }
 0x4e5   :  { %v6285_v12 = vpop.eup %6284  ;;  %v2031_v63 = vmul.f32 %v6283_v57, %v6281_v17  ;;  %v7563_v17 = vpack.c.bf16 %v2363_v52, %v2359_v32  ;;  %v2365_v57 = vld [vmem:[#allocation5 + $0x100] sm:$0xff]  ;;  %v2396_v32 = vld [vmem:[#allocation5 + $0x1f8] sm:$0xff]  ;;  %v7597_v52 = vpack.c.bf16 %v2385_v20, %v2381_v18  ;;  %v7626_v18 = vpack.c.bf16 %v2599_v23, %v2595_v55  ;;  %v2606_v20 = vld [vmem:[#allocation7 + $0x68] sm:$0xff] }
 0x4e6   :  { %v2030_v24 = vmul.f32 %v6285_v12, %v7402_v13  ;;  %v6287_v56 = vpop.eup %6286  ;;  %v2341_v13 = vld [vmem:[#allocation5 + $0x40] sm:$0xff] }
 0x4e7   :  { %v7535_v61 = vpack.c.bf16 %v2345_v59, %v2341_v13  ;;  %v2369_v12 = vld [vmem:[#allocation5 + $0x120] sm:$0xff]  ;;  %v7581_v13 = vpack.c.bf16 %v2380_v50, %v2376_v16  ;;  %v2375_v59 = vld [vmem:[#allocation5 + $0x150] sm:$0xff]  ;;  %v2598_v16 = vld [vmem:[#allocation7 + $0x28] sm:$0xff]  ;;  %8823 = vst [vmem:[#allocation19_spill] sm:$0xff] %v7626_v18 }
 0x4e8   :  { %v7518_v41 = vadd.f32 %v2031_v63, %v2030_v24  ;;  %v7569_v24 = vpack.c.bf16 %v2372_v46, %v2368_v27  ;;  %v2367_v63 = vld [vmem:[#allocation5 + $0x110] sm:$0xff]  ;;  %v7573_v54 = vpack.c.bf16 %v2369_v12, %v2365_v57  ;;  %v7587_v47 = vpack.c.bf16 %v2379_v53, %v2375_v59  ;;  %v2393_v57 = vld [vmem:[#allocation5 + $0x1e0] sm:$0xff]  ;;  %v2596_v50 = vld [vmem:[#allocation7 + $0x18] sm:$0xff] }
 0x4e9   :  { %v7575_v10 = vpack.c.bf16 %v2371_v4, %v2367_v63  ;;  %v7603_v27 = vpack.c.bf16 %v2394_v62, %v2390_v29  ;;  %v7605_v46 = vpack.c.bf16 %v2396_v32, %v2392_v60  ;;  %v2391_v12 = vld [vmem:[#allocation5 + $0x1d0] sm:$0xff]  ;;  %v7609_v4 = vpack.c.bf16 %v2393_v57, %v2389_v43  ;;  %v2593_v59 = vld [vmem:[#allocation7] sm:$0xff]  ;;  %v2608_v29 = vld [vmem:[#allocation7 + $0x78] sm:$0xff] }
 0x4ea   :  { %6288 = vtanh.f32 %v7518_v41  ;;  %v2395_v63 = vld [vmem:[#allocation5 + $0x1f0] sm:$0xff]  ;;  %v2597_v53 = vld [vmem:[#allocation7 + $0x20] sm:$0xff]  ;;  %v7633_v32 = vpack.c.bf16 %v2608_v29, %v2604_v2 }
 0x4eb   :  { %v7623_v37 = vpack.c.bf16 %v2597_v53, %v2593_v59  ;;  %v2601_v62 = vld [vmem:[#allocation7 + $0x40] sm:$0xff]  ;;  %v2603_v57 = vld [vmem:[#allocation7 + $0x50] sm:$0xff]  ;;  %v2616_v59 = vld [vmem:[#allocation7 + $0xb8] sm:$0xff] }
 0x4ec   :  { %v2605_v60 = vld [vmem:[#allocation7 + $0x60] sm:$0xff]  ;;  %8825 = vst [vmem:[#allocation21_spill] sm:$0xff] %v7633_v32  ;;  %v2615_v2 = vld [vmem:[#allocation7 + $0xb0] sm:$0xff] }
 0x4ed   :  { %8822 = vst [vmem:[#allocation18_spill] sm:$0xff] %v7623_v37  ;;  %v7635_v43 = vpack.c.bf16 %v2605_v60, %v2601_v62  ;;  %v2609_v53 = vld [vmem:[#allocation7 + $0x80] sm:$0xff]  ;;  %v2618_v62 = vld [vmem:[#allocation7 + $0xc8] sm:$0xff] }
 0x4ee   :  { %v2613_v55 = vld [vmem:[#allocation7 + $0xa0] sm:$0xff]  ;;  %v2622_v60 = vld [vmem:[#allocation7 + $0xe8] sm:$0xff] }
 0x4ef   :  { %8826 = vst [vmem:[#allocation22_spill] sm:$0xff] %v7635_v43 }
 0x4f4   :  { %v6289_v15 = vpop.eup %6288 }
 0x4f5   :  { %v7525_v45 = vmul.f32 %v6289_v15, %v6287_v56  ;;  %v2377_v56 = vld [vmem:[#allocation5 + $0x160] sm:$0xff]  ;;  %v7579_v15 = vpack.c.bf16 %v2378_v25, %v2374_v19  ;;  %v7611_v19 = vpack.c.bf16 %v2395_v63, %v2391_v12  ;;  %v2594_v25 = vld [vmem:[#allocation7 + $0x8] sm:$0xff]  ;;  %v2607_v12 = vld [vmem:[#allocation7 + $0x70] sm:$0xff] }
 0x4f6   :  { %v7585_v33 = vpack.c.bf16 %v2377_v56, %v2373_v11  ;;  %v7619_v11 = vpack.c.bf16 %v2598_v16, %v2594_v25  ;;  %v2600_v56 = vld [vmem:[#allocation7 + $0x38] sm:$0xff]  ;;  %v7638_v63 = vpack.c.bf16 %v2607_v12, %v2603_v57  ;;  %v2610_v25 = vld [vmem:[#allocation7 + $0x88] sm:$0xff]  ;;  %v7655_v12 = vpack.c.bf16 %v2622_v60, %v2618_v62 }
 0x4f7   :  { %2228 = vmatmul.mubr.f32.vlgmr.msra.gmra.mrb[14].mxu0 %v7525_v45  ;;  %2299 = vmatmul.mubr.f32.vlgmr.msra.gmra.mrb[14].mxu1 %v7525_v45  ;;  %v7621_v8 = vpack.c.bf16 %v2600_v56, %v2596_v50  ;;  %v2614_v16 = vld [vmem:[#allocation7 + $0xa8] sm:$0xff]  ;;  %v2612_v50 = vld [vmem:[#allocation7 + $0x98] sm:$0xff] }
 0x4f8   :  { %5401 = vmatpush1.bf16.msra.mxu0 %v7521_v42  ;;  %5433 = vmatpush1.bf16.msra.mxu1 %v7523_v58  ;;  %8827 = vst [vmem:[#allocation23_spill] sm:$0xff] %v7638_v63  ;;  %v7643_v56 = vpack.c.bf16 %v2614_v16, %v2610_v25  ;;  %v7645_v23 = vpack.c.bf16 %v2616_v59, %v2612_v50  ;;  %v2620_v57 = vld [vmem:[#allocation7 + $0xd8] sm:$0xff]  ;;  %8832 = vst [vmem:[#allocation28_spill] sm:$0xff] %v7655_v12  ;;  %v2617_v16 = vld [vmem:[#allocation7 + $0xc0] sm:$0xff] }
 0x4f9   :  { %5403 = vmatprep.subr.bf16.mxu0 %v7527_v35  ;;  %5435 = vmatprep.subr.bf16.mxu1 %v7529_v39  ;;  %v2624_v25 = vld [vmem:[#allocation7 + $0xf8] sm:$0xff]  ;;  %v2621_v50 = vld [vmem:[#allocation7 + $0xe0] sm:$0xff]  ;;  %v2630_v62 = vld [vmem:[#allocation7 + $0x128] sm:$0xff] }
 0x4fa   :  { %2461 = vmatprep.mubr.f32.mxu0 %v8658_v5  ;;  %2532 = vmatprep.mubr.f32.mxu1 %v8658_v5  ;;  %8828 = vst [vmem:[#allocation24_spill] sm:$0xff] %v7643_v56  ;;  %8829 = vst [vmem:[#allocation25_spill] sm:$0xff] %v7645_v23  ;;  %v7657_v59 = vpack.c.bf16 %v2624_v25, %v2620_v57  ;;  %v2628_v57 = vld [vmem:[#allocation7 + $0x118] sm:$0xff] }
 0x4fb   :  { %v2632_v25 = vld [vmem:[#allocation7 + $0x138] sm:$0xff] }
 0x4fc   :  { %5405 = vmatpush1.bf16.msra.mxu0 %v7535_v61  ;;  %5437 = vmatpush1.bf16.msra.mxu1 %v7537_v3  ;;  %8833 = vst [vmem:[#allocation29_spill] sm:$0xff] %v7657_v59 }
 0x4fd   :  { %5407 = vmatprep.subr.bf16.mxu0 %v7541_v22  ;;  %5439 = vmatprep.subr.bf16.mxu1 %v7543_v44 }
 0x500   :  { %5409 = vmatpush1.bf16.msra.mxu0 %v7549_v40  ;;  %5441 = vmatpush1.bf16.msra.mxu1 %v7551_v6 }
 0x501   :  { %5411 = vmatprep.subr.bf16.mxu0 %v7555_v36  ;;  %5443 = vmatprep.subr.bf16.mxu1 %v7557_v21 }
 0x504   :  { %5413 = vmatpush1.bf16.msra.mxu0 %v7561_v0  ;;  %5445 = vmatpush1.bf16.msra.mxu1 %v7563_v17 }
 0x505   :  { %5415 = vmatprep.subr.bf16.mxu0 %v7567_v31  ;;  %5447 = vmatprep.subr.bf16.mxu1 %v7569_v24 }
 0x508   :  { %5417 = vmatpush1.bf16.msra.mxu0 %v7573_v54  ;;  %5449 = vmatpush1.bf16.msra.mxu1 %v7575_v10 }
 0x509   :  { %5419 = vmatprep.subr.bf16.mxu0 %v7579_v15  ;;  %5451 = vmatprep.subr.bf16.mxu1 %v7581_v13 }
 0x50c   :  { %5421 = vmatpush1.bf16.msra.mxu0 %v7585_v33  ;;  %5453 = vmatpush1.bf16.msra.mxu1 %v7587_v47 }
 0x50d   :  { %5423 = vmatprep.subr.bf16.mxu0 %v7591_v26  ;;  %5455 = vmatprep.subr.bf16.mxu1 %v7593_v38 }
 0x510   :  { %5425 = vmatpush1.bf16.msra.mxu0 %v7597_v52  ;;  %5457 = vmatpush1.bf16.msra.mxu1 %v7599_v1 }
 0x511   :  { %5427 = vmatprep.subr.bf16.mxu0 %v7603_v27  ;;  %5459 = vmatprep.subr.bf16.mxu1 %v7605_v46 }
 0x514   :  { %5429 = vmatpush1.bf16.msra.mxu0 %v7609_v4  ;;  %5461 = vmatpush1.bf16.msra.mxu1 %v7611_v19 }
 0x515   :  { %5463 = vmatprep.subr.bf16.mxu0 %v7619_v11  ;;  %5527 = vmatprep.subr.bf16.mxu1 %v7621_v8 }
 0x517   :  { %2462 = vmatmul.mubr.f32.vlgmr.msra.gmra.mrb[16].mxu0 %v7525_v45  ;;  %2533 = vmatmul.mubr.f32.vlgmr.msra.gmra.mrb[16].mxu1 %v7525_v45  ;;  %v2602_v45 = vld [vmem:[#allocation7 + $0x48] sm:$0xff] }
 0x518   :  { %5465 = vmatpush1.bf16.msra.mxu0 %v7623_v37  ;;  %5529 = vmatpush1.bf16.msra.mxu1 %v7626_v18  ;;  %v7631_v48 = vpack.c.bf16 %v2606_v20, %v2602_v45  ;;  %v7647_v45 = vpack.c.bf16 %v2613_v55, %v2609_v53  ;;  %v2611_v20 = vld [vmem:[#allocation7 + $0x90] sm:$0xff]  ;;  %v7659_v53 = vpack.c.bf16 %v2621_v50, %v2617_v16  ;;  %v2625_v16 = vld [vmem:[#allocation7 + $0x100] sm:$0xff]  ;;  %v2706_v18 = vld [vmem:[#allocation7 + $0x388] sm:$0xff] }
 0x519   :  { %5531 = vmatprep.subr.bf16.mxu1 %v7633_v32  ;;  %v7650_v29 = vpack.c.bf16 %v2615_v2, %v2611_v20  ;;  %v2619_v55 = vld [vmem:[#allocation7 + $0xd0] sm:$0xff]  ;;  %v7669_v50 = vpack.c.bf16 %v2632_v25, %v2628_v57  ;;  %v2640_v57 = vld [vmem:[#allocation7 + $0x178] sm:$0xff]  ;;  %v2633_v25 = vld [vmem:[#allocation7 + $0x140] sm:$0xff] }
 0x51a   :  { %8824 = vst [vmem:[#allocation20_spill] sm:$0xff] %v7631_v48  ;;  %5467 = vmatprep.subr.bf16.mxu0 %v7631_v48  ;;  %8830 = vst [vmem:[#allocation26_spill] sm:$0xff] %v7647_v45  ;;  %v2623_v20 = vld [vmem:[#allocation7 + $0xf0] sm:$0xff]  ;;  %v2698_v48 = vld [vmem:[#allocation7 + $0x348] sm:$0xff] }
 0x51b   :  { %8831 = vst [vmem:[#allocation27_spill] sm:$0xff] %v7650_v29  ;;  %8834 = vst [vmem:[#allocation30_spill] sm:$0xff] %v7659_v53  ;;  %v7662_v2 = vpack.c.bf16 %v2623_v20, %v2619_v55  ;;  %v2691_v32 = vld [vmem:[#allocation7 + $0x310] sm:$0xff]  ;;  %v2708_v37 = vld [vmem:[#allocation7 + $0x398] sm:$0xff] }
 0x51c   :  { %5469 = vmatpush1.bf16.msra.mxu0 %v7635_v43  ;;  %5533 = vmatpush1.bf16.msra.mxu1 %v7638_v63  ;;  %8837 = vst [vmem:[#allocation33_spill] sm:$0xff] %v7669_v50  ;;  %v2677_v63 = vld [vmem:[#allocation7 + $0x2a0] sm:$0xff]  ;;  %v2694_v43 = vld [vmem:[#allocation7 + $0x328] sm:$0xff] }
 0x51d   :  { %5471 = vmatprep.subr.bf16.mxu0 %v7643_v56  ;;  %5535 = vmatprep.subr.bf16.mxu1 %v7645_v23  ;;  %8835 = vst [vmem:[#allocation31_spill] sm:$0xff] %v7662_v2  ;;  %v2627_v23 = vld [vmem:[#allocation7 + $0x110] sm:$0xff] }
 0x520   :  { %5473 = vmatpush1.bf16.msra.mxu0 %v7647_v45  ;;  %5537 = vmatpush1.bf16.msra.mxu1 %v7650_v29  ;;  %v2626_v29 = vld [vmem:[#allocation7 + $0x108] sm:$0xff]  ;;  %v2629_v45 = vld [vmem:[#allocation7 + $0x120] sm:$0xff] }
 0x521   :  { %5475 = vmatprep.subr.bf16.mxu0 %v7655_v12  ;;  %5539 = vmatprep.subr.bf16.mxu1 %v7657_v59  ;;  %v7667_v60 = vpack.c.bf16 %v2630_v62, %v2626_v29  ;;  %v2631_v12 = vld [vmem:[#allocation7 + $0x130] sm:$0xff]  ;;  %v7672_v55 = vpack.c.bf16 %v2629_v45, %v2625_v16  ;;  %v2636_v29 = vld [vmem:[#allocation7 + $0x158] sm:$0xff]  ;;  %v2637_v59 = vld [vmem:[#allocation7 + $0x160] sm:$0xff] }
 0x522   :  { %v7674_v20 = vpack.c.bf16 %v2631_v12, %v2627_v23  ;;  %v7681_v56 = vpack.c.bf16 %v2640_v57, %v2636_v29  ;;  %v7683_v45 = vpack.c.bf16 %v2637_v59, %v2633_v25  ;;  %v2635_v23 = vld [vmem:[#allocation7 + $0x150] sm:$0xff]  ;;  %v2641_v59 = vld [vmem:[#allocation7 + $0x180] sm:$0xff] }
 0x523   :  { %8836 = vst [vmem:[#allocation32_spill] sm:$0xff] %v7667_v60  ;;  %8838 = vst [vmem:[#allocation34_spill] sm:$0xff] %v7672_v55  ;;  %v2639_v12 = vld [vmem:[#allocation7 + $0x170] sm:$0xff]  ;;  %v2645_v29 = vld [vmem:[#allocation7 + $0x1a0] sm:$0xff] }
 0x524   :  { %5477 = vmatpush1.bf16.msra.mxu0 %v7659_v53  ;;  %5541 = vmatpush1.bf16.msra.mxu1 %v7662_v2  ;;  %8839 = vst [vmem:[#allocation35_spill] sm:$0xff] %v7674_v20  ;;  %v2634_v53 = vld [vmem:[#allocation7 + $0x148] sm:$0xff]  ;;  %8841 = vst [vmem:[#allocation37_spill] sm:$0xff] %v7681_v56  ;;  %v7686_v16 = vpack.c.bf16 %v2639_v12, %v2635_v23  ;;  %v7695_v25 = vpack.c.bf16 %v2645_v29, %v2641_v59  ;;  %v2643_v23 = vld [vmem:[#allocation7 + $0x190] sm:$0xff] }
 0x525   :  { %5479 = vmatprep.subr.bf16.mxu0 %v7667_v60  ;;  %5543 = vmatprep.subr.bf16.mxu1 %v7669_v50  ;;  %v2638_v2 = vld [vmem:[#allocation7 + $0x168] sm:$0xff]  ;;  %8842 = vst [vmem:[#allocation38_spill] sm:$0xff] %v7683_v45  ;;  %v2647_v12 = vld [vmem:[#allocation7 + $0x1b0] sm:$0xff] }
 0x526   :  { %v7679_v62 = vpack.c.bf16 %v2638_v2, %v2634_v53  ;;  %8843 = vst [vmem:[#allocation39_spill] sm:$0xff] %v7686_v16  ;;  %v2646_v50 = vld [vmem:[#allocation7 + $0x1a8] sm:$0xff]  ;;  %v2648_v2 = vld [vmem:[#allocation7 + $0x1b8] sm:$0xff]  ;;  %8846 = vst [vmem:[#allocation42_spill] sm:$0xff] %v7695_v25 }
 0x527   :  { %v2678_v60 = vld [vmem:[#allocation7 + $0x2a8] sm:$0xff] }
 0x528   :  { %5481 = vmatpush1.bf16.msra.mxu0 %v7672_v55  ;;  %5545 = vmatpush1.bf16.msra.mxu1 %v7674_v20  ;;  %8840 = vst [vmem:[#allocation36_spill] sm:$0xff] %v7679_v62  ;;  %v2642_v55 = vld [vmem:[#allocation7 + $0x188] sm:$0xff]  ;;  %v2644_v20 = vld [vmem:[#allocation7 + $0x198] sm:$0xff] }
 0x529   :  { %5483 = vmatprep.subr.bf16.mxu0 %v7679_v62  ;;  %5547 = vmatprep.subr.bf16.mxu1 %v7681_v56  ;;  %v7691_v53 = vpack.c.bf16 %v2646_v50, %v2642_v55  ;;  %v7693_v57 = vpack.c.bf16 %v2648_v2, %v2644_v20  ;;  %v7698_v56 = vpack.c.bf16 %v2647_v12, %v2643_v23  ;;  %v2654_v62 = vld [vmem:[#allocation7 + $0x1e8] sm:$0xff]  ;;  %v2656_v55 = vld [vmem:[#allocation7 + $0x1f8] sm:$0xff]  ;;  %v2649_v20 = vld [vmem:[#allocation7 + $0x1c0] sm:$0xff] }
 0x52a   :  { %v2653_v2 = vld [vmem:[#allocation7 + $0x1e0] sm:$0xff]  ;;  %v2651_v23 = vld [vmem:[#allocation7 + $0x1d0] sm:$0xff] }
 0x52b   :  { %8844 = vst [vmem:[#allocation40_spill] sm:$0xff] %v7691_v53  ;;  %8845 = vst [vmem:[#allocation41_spill] sm:$0xff] %v7693_v57  ;;  %v7707_v29 = vpack.c.bf16 %v2653_v2, %v2649_v20  ;;  %v2655_v12 = vld [vmem:[#allocation7 + $0x1f0] sm:$0xff] }
 0x52c   :  { %5485 = vmatpush1.bf16.msra.mxu0 %v7683_v45  ;;  %5549 = vmatpush1.bf16.msra.mxu1 %v7686_v16  ;;  %8847 = vst [vmem:[#allocation43_spill] sm:$0xff] %v7698_v56  ;;  %v2650_v45 = vld [vmem:[#allocation7 + $0x1c8] sm:$0xff]  ;;  %v2652_v16 = vld [vmem:[#allocation7 + $0x1d8] sm:$0xff] }
 0x52d   :  { %5487 = vmatprep.subr.bf16.mxu0 %v7691_v53  ;;  %5551 = vmatprep.subr.bf16.mxu1 %v7693_v57  ;;  %v7703_v50 = vpack.c.bf16 %v2654_v62, %v2650_v45  ;;  %v7705_v59 = vpack.c.bf16 %v2656_v55, %v2652_v16  ;;  %8850 = vst [vmem:[#allocation46_spill] sm:$0xff] %v7707_v29  ;;  %v2662_v53 = vld [vmem:[#allocation7 + $0x228] sm:$0xff]  ;;  %v2664_v45 = vld [vmem:[#allocation7 + $0x238] sm:$0xff]  ;;  %v2657_v16 = vld [vmem:[#allocation7 + $0x200] sm:$0xff] }
 0x52e   :  { %v7710_v57 = vpack.c.bf16 %v2655_v12, %v2651_v23  ;;  %v2661_v55 = vld [vmem:[#allocation7 + $0x220] sm:$0xff]  ;;  %v2659_v23 = vld [vmem:[#allocation7 + $0x210] sm:$0xff] }
 0x52f   :  { %8848 = vst [vmem:[#allocation44_spill] sm:$0xff] %v7703_v50  ;;  %8849 = vst [vmem:[#allocation45_spill] sm:$0xff] %v7705_v59  ;;  %v7719_v2 = vpack.c.bf16 %v2661_v55, %v2657_v16  ;;  %v2663_v12 = vld [vmem:[#allocation7 + $0x230] sm:$0xff] }
 0x530   :  { %5489 = vmatpush1.bf16.msra.mxu0 %v7695_v25  ;;  %5553 = vmatpush1.bf16.msra.mxu1 %v7698_v56  ;;  %8851 = vst [vmem:[#allocation47_spill] sm:$0xff] %v7710_v57  ;;  %v2658_v25 = vld [vmem:[#allocation7 + $0x208] sm:$0xff]  ;;  %v2660_v56 = vld [vmem:[#allocation7 + $0x218] sm:$0xff] }
 0x531   :  { %5491 = vmatprep.subr.bf16.mxu0 %v7703_v50  ;;  %5555 = vmatprep.subr.bf16.mxu1 %v7705_v59  ;;  %v7715_v62 = vpack.c.bf16 %v2662_v53, %v2658_v25  ;;  %v7717_v20 = vpack.c.bf16 %v2664_v45, %v2660_v56  ;;  %8854 = vst [vmem:[#allocation50_spill] sm:$0xff] %v7719_v2  ;;  %v2670_v50 = vld [vmem:[#allocation7 + $0x268] sm:$0xff]  ;;  %v2672_v56 = vld [vmem:[#allocation7 + $0x278] sm:$0xff]  ;;  %v2665_v25 = vld [vmem:[#allocation7 + $0x240] sm:$0xff] }
 0x532   :  { %v7722_v59 = vpack.c.bf16 %v2663_v12, %v2659_v23  ;;  %v2669_v45 = vld [vmem:[#allocation7 + $0x260] sm:$0xff]  ;;  %v2667_v23 = vld [vmem:[#allocation7 + $0x250] sm:$0xff] }
 0x533   :  { %8852 = vst [vmem:[#allocation48_spill] sm:$0xff] %v7715_v62  ;;  %8853 = vst [vmem:[#allocation49_spill] sm:$0xff] %v7717_v20  ;;  %v7731_v55 = vpack.c.bf16 %v2669_v45, %v2665_v25  ;;  %v2671_v12 = vld [vmem:[#allocation7 + $0x270] sm:$0xff] }
 0x534   :  { %5493 = vmatpush1.bf16.msra.mxu0 %v7707_v29  ;;  %5557 = vmatpush1.bf16.msra.mxu1 %v7710_v57  ;;  %8855 = vst [vmem:[#allocation51_spill] sm:$0xff] %v7722_v59  ;;  %v2666_v29 = vld [vmem:[#allocation7 + $0x248] sm:$0xff]  ;;  %v2668_v57 = vld [vmem:[#allocation7 + $0x258] sm:$0xff]  ;;  %v2675_v25 = vld [vmem:[#allocation7 + $0x290] sm:$0xff] }
 0x535   :  { %5495 = vmatprep.subr.bf16.mxu0 %v7715_v62  ;;  %5559 = vmatprep.subr.bf16.mxu1 %v7717_v20  ;;  %v7727_v53 = vpack.c.bf16 %v2670_v50, %v2666_v29  ;;  %v7729_v16 = vpack.c.bf16 %v2672_v56, %v2668_v57  ;;  %8858 = vst [vmem:[#allocation54_spill] sm:$0xff] %v7731_v55  ;;  %v2674_v62 = vld [vmem:[#allocation7 + $0x288] sm:$0xff]  ;;  %v2680_v29 = vld [vmem:[#allocation7 + $0x2b8] sm:$0xff]  ;;  %v2679_v45 = vld [vmem:[#allocation7 + $0x2b0] sm:$0xff] }
 0x536   :  { %v7734_v20 = vpack.c.bf16 %v2671_v12, %v2667_v23  ;;  %v7737_v50 = vpack.c.bf16 %v2678_v60, %v2674_v62  ;;  %v2682_v23 = vld [vmem:[#allocation7 + $0x2c8] sm:$0xff]  ;;  %v7746_v12 = vpack.c.bf16 %v2679_v45, %v2675_v25  ;;  %v2684_v62 = vld [vmem:[#allocation7 + $0x2d8] sm:$0xff] }
 0x537   :  { %8856 = vst [vmem:[#allocation52_spill] sm:$0xff] %v7727_v53  ;;  %8857 = vst [vmem:[#allocation53_spill] sm:$0xff] %v7729_v16  ;;  %v2686_v60 = vld [vmem:[#allocation7 + $0x2e8] sm:$0xff] }
 0x538   :  { %5497 = vmatpush1.bf16.msra.mxu0 %v7719_v2  ;;  %5561 = vmatpush1.bf16.msra.mxu1 %v7722_v59  ;;  %8859 = vst [vmem:[#allocation55_spill] sm:$0xff] %v7734_v20  ;;  %v2676_v2 = vld [vmem:[#allocation7 + $0x298] sm:$0xff]  ;;  %8860 = vst [vmem:[#allocation56_spill] sm:$0xff] %v7737_v50  ;;  %v2673_v59 = vld [vmem:[#allocation7 + $0x280] sm:$0xff] }
 0x539   :  { %5499 = vmatprep.subr.bf16.mxu0 %v7727_v53  ;;  %5563 = vmatprep.subr.bf16.mxu1 %v7729_v16  ;;  %v7741_v57 = vpack.c.bf16 %v2680_v29, %v2676_v2  ;;  %v7743_v56 = vpack.c.bf16 %v2677_v63, %v2673_v59  ;;  %8863 = vst [vmem:[#allocation59_spill] sm:$0xff] %v7746_v12  ;;  %v2688_v16 = vld [vmem:[#allocation7 + $0x2f8] sm:$0xff]  ;;  %v2681_v2 = vld [vmem:[#allocation7 + $0x2c0] sm:$0xff]  ;;  %v2683_v63 = vld [vmem:[#allocation7 + $0x2d0] sm:$0xff] }
 0x53a   :  { %v7749_v53 = vpack.c.bf16 %v2686_v60, %v2682_v23  ;;  %v2685_v29 = vld [vmem:[#allocation7 + $0x2e0] sm:$0xff]  ;;  %v2687_v59 = vld [vmem:[#allocation7 + $0x2f0] sm:$0xff] }
 0x53b   :  { %8861 = vst [vmem:[#allocation57_spill] sm:$0xff] %v7741_v57  ;;  %8862 = vst [vmem:[#allocation58_spill] sm:$0xff] %v7743_v56  ;;  %v7755_v25 = vpack.c.bf16 %v2685_v29, %v2681_v2  ;;  %v7757_v45 = vpack.c.bf16 %v2687_v59, %v2683_v63  ;;  %v2689_v23 = vld [vmem:[#allocation7 + $0x300] sm:$0xff]  ;;  %v2700_v2 = vld [vmem:[#allocation7 + $0x358] sm:$0xff] }
 0x53c   :  { %5501 = vmatpush1.bf16.msra.mxu0 %v7731_v55  ;;  %5565 = vmatpush1.bf16.msra.mxu1 %v7734_v20  ;;  %8864 = vst [vmem:[#allocation60_spill] sm:$0xff] %v7749_v53  ;;  %v7751_v55 = vpack.c.bf16 %v2688_v16, %v2684_v62  ;;  %v2690_v20 = vld [vmem:[#allocation7 + $0x308] sm:$0xff]  ;;  %v2693_v62 = vld [vmem:[#allocation7 + $0x320] sm:$0xff]  ;;  %v2704_v29 = vld [vmem:[#allocation7 + $0x378] sm:$0xff] }
 0x53d   :  { %5503 = vmatprep.subr.bf16.mxu0 %v7737_v50  ;;  %5567 = vmatprep.subr.bf16.mxu1 %v7741_v57  ;;  %8866 = vst [vmem:[#allocation62_spill] sm:$0xff] %v7755_v25  ;;  %8867 = vst [vmem:[#allocation63_spill] sm:$0xff] %v7757_v45  ;;  %v2692_v50 = vld [vmem:[#allocation7 + $0x318] sm:$0xff]  ;;  %v7761_v16 = vpack.c.bf16 %v2694_v43, %v2690_v20  ;;  %v7767_v63 = vpack.c.bf16 %v2693_v62, %v2689_v23  ;;  %v2701_v43 = vld [vmem:[#allocation7 + $0x360] sm:$0xff] }
 0x53e   :  { %8865 = vst [vmem:[#allocation61_spill] sm:$0xff] %v7751_v55  ;;  %v2696_v57 = vld [vmem:[#allocation7 + $0x338] sm:$0xff]  ;;  %v2705_v23 = vld [vmem:[#allocation7 + $0x380] sm:$0xff] }
 0x53f   :  { %8868 = vst [vmem:[#allocation64_spill] sm:$0xff] %v7761_v16  ;;  %v7763_v60 = vpack.c.bf16 %v2696_v57, %v2692_v50  ;;  %8870 = vst [vmem:[#allocation66_spill] sm:$0xff] %v7767_v63  ;;  %v7775_v50 = vpack.c.bf16 %v2704_v29, %v2700_v2  ;;  %v2699_v57 = vld [vmem:[#allocation7 + $0x350] sm:$0xff]  ;;  %v2709_v62 = vld [vmem:[#allocation7 + $0x3a0] sm:$0xff] }
 0x540   :  { %5505 = vmatpush1.bf16.msra.mxu0 %v7743_v56  ;;  %5569 = vmatpush1.bf16.msra.mxu1 %v7746_v12  ;;  %v2695_v56 = vld [vmem:[#allocation7 + $0x330] sm:$0xff]  ;;  %v2702_v12 = vld [vmem:[#allocation7 + $0x368] sm:$0xff] }
 0x541   :  { %5507 = vmatprep.subr.bf16.mxu0 %v7749_v53  ;;  %5571 = vmatprep.subr.bf16.mxu1 %v7751_v55  ;;  %8869 = vst [vmem:[#allocation65_spill] sm:$0xff] %v7763_v60  ;;  %v7769_v59 = vpack.c.bf16 %v2695_v56, %v2691_v32  ;;  %v2697_v55 = vld [vmem:[#allocation7 + $0x340] sm:$0xff]  ;;  %v7773_v20 = vpack.c.bf16 %v2702_v12, %v2698_v48  ;;  %v2703_v53 = vld [vmem:[#allocation7 + $0x370] sm:$0xff] }
 0x542   :  { %v7779_v32 = vpack.c.bf16 %v2701_v43, %v2697_v55  ;;  %v7781_v56 = vpack.c.bf16 %v2703_v53, %v2699_v57  ;;  %v2707_v2 = vld [vmem:[#allocation7 + $0x390] sm:$0xff]  ;;  %v7791_v53 = vpack.c.bf16 %v2709_v62, %v2705_v23  ;;  %v2713_v43 = vld [vmem:[#allocation7 + $0x3c0] sm:$0xff] }
 0x543   :  { %8871 = vst [vmem:[#allocation67_spill] sm:$0xff] %v7769_v59  ;;  %v2711_v29 = vld [vmem:[#allocation7 + $0x3b0] sm:$0xff] }
 0x544   :  { %5509 = vmatpush1.bf16.msra.mxu0 %v7755_v25  ;;  %5573 = vmatpush1.bf16.msra.mxu1 %v7757_v45  ;;  %v2710_v25 = vld [vmem:[#allocation7 + $0x3a8] sm:$0xff]  ;;  %v2712_v45 = vld [vmem:[#allocation7 + $0x3b8] sm:$0xff]  ;;  %v7793_v55 = vpack.c.bf16 %v2711_v29, %v2707_v2  ;;  %v2719_v57 = vld [vmem:[#allocation7 + $0x3f0] sm:$0xff] }
 0x545   :  { %5511 = vmatprep.subr.bf16.mxu0 %v7761_v16  ;;  %5575 = vmatprep.subr.bf16.mxu1 %v7763_v60  ;;  %v7785_v48 = vpack.c.bf16 %v2710_v25, %v2706_v18  ;;  %v7787_v12 = vpack.c.bf16 %v2712_v45, %v2708_v37  ;;  %v2714_v60 = vld [vmem:[#allocation7 + $0x3c8] sm:$0xff]  ;;  %v2716_v16 = vld [vmem:[#allocation7 + $0x3d8] sm:$0xff]  ;;  %v2717_v25 = vld [vmem:[#allocation7 + $0x3e0] sm:$0xff] }
 0x546   :  { %v2715_v45 = vld [vmem:[#allocation7 + $0x3d0] sm:$0xff]  ;;  %v7803_v23 = vpack.c.bf16 %v2717_v25, %v2713_v43 }
 0x547   :  { %v7805_v62 = vpack.c.bf16 %v2719_v57, %v2715_v45 }
 0x548   :  { %5513 = vmatpush1.bf16.msra.mxu0 %v7767_v63  ;;  %5577 = vmatpush1.bf16.msra.mxu1 %v7769_v59  ;;  %v2718_v63 = vld [vmem:[#allocation7 + $0x3e8] sm:$0xff]  ;;  %v2720_v59 = vld [vmem:[#allocation7 + $0x3f8] sm:$0xff]  ;;  %8873 = vst [vmem:[#allocation69_spill] sm:$0xff] %v7803_v23 }
 0x549   :  { %5515 = vmatprep.subr.bf16.mxu0 %v7773_v20  ;;  %5579 = vmatprep.subr.bf16.mxu1 %v7775_v50  ;;  %v7797_v37 = vpack.c.bf16 %v2718_v63, %v2714_v60  ;;  %v7799_v18 = vpack.c.bf16 %v2720_v59, %v2716_v16  ;;  %8874 = vst [vmem:[#allocation70_spill] sm:$0xff] %v7805_v62 }
 0x54b   :  { %8872 = vst [vmem:[#allocation68_spill] sm:$0xff] %v7799_v18 }
 0x54c   :  { %5517 = vmatpush1.bf16.msra.mxu0 %v7779_v32  ;;  %5581 = vmatpush1.bf16.msra.mxu1 %v7781_v56 }
 0x54d   :  { %5519 = vmatprep.subr.bf16.mxu0 %v7785_v48  ;;  %5583 = vmatprep.subr.bf16.mxu1 %v7787_v12 }
 0x550   :  { %5521 = vmatpush1.bf16.msra.mxu0 %v7791_v53  ;;  %5585 = vmatpush1.bf16.msra.mxu1 %v7793_v55 }
 0x551   :  { %5523 = vmatprep.subr.bf16.mxu0 %v7797_v37  ;;  %5587 = vmatprep.subr.bf16.mxu1 %v7799_v18 }
 0x554   :  { %5525 = vmatpush1.bf16.msra.mxu0 %v7803_v23  ;;  %5589 = vmatpush1.bf16.msra.mxu1 %v7805_v62 }
 0x555   :  { %5591 = vmatprep.subr.bf16.mxu0 %v7501_v51  ;;  %5623 = vmatprep.subr.bf16.mxu1 %v7503_v7 }
 0x5ca   :  { %v2229_v16 = vpop.f32.mrb[14].mxu0  ;;  %v2300_v60 = vpop.f32.mrb[14].mxu1 }
 0x5cb   :  { %v2230_v63 = vadd.f32 %v2229_v16, %v8819_v34  ;;  %v2231_v59 = vpop.f32.mrb[15].mxu0  ;;  %v2302_v2 = vpop.f32.mrb[15].mxu1  ;;  %v2301_v62 = vadd.f32 %v2300_v60, %v8821_v14 }
 0x5cc   :  { %v2232_v29 = vadd.f32 %v2231_v59, %v7078_v9  ;;  %v2303_v45 = vadd.f32 %v2302_v2, %v8820_v49 }
 0x5cd   :  { %v4603_v43 = vmul.f32 -1.442695, %v2230_v63 }
 0x5ce   :  { %v4604_v25 = vmul.f32 -1.442695, %v2232_v29  ;;  %v4605_v57 = vmul.f32 -1.442695, %v2303_v45 }
 0x5cf   :  { %6290 = vpow2.f32 %v4603_v43 }
 0x5d0   :  { %6292 = vpow2.f32 %v4604_v25 }
 0x5d1   :  { %6294 = vpow2.f32 %v4605_v57 }
 0x5d2   :  { %6296 = vtanh.f32 %v2301_v62 }
 0x5d9   :  { %v6291_v51 = vpop.eup %6290 }
 0x5da   :  { %v6293_v23 = vpop.eup %6292  ;;  %v2308_v7 = vadd.f32 1.0, %v6291_v51 }
 0x5db   :  { %v2314_v18 = vadd.f32 1.0, %v6293_v23  ;;  %v6295_v16 = vpop.eup %6294 }
 0x5dc   :  { %6298 = vrcp.f32 %v2308_v7  ;;  %v6297_v34 = vpop.eup %6296  ;;  %v2321_v43 = vadd.f32 1.0, %v6295_v16  ;;  %v2332_v7 = vld [vmem:[#allocation2 + $0x20] sm:$0xff] }
 0x5dd   :  { %6300 = vrcp.f32 %v2314_v18 }
 0x5de   :  { %6302 = vrcp.f32 %v2321_v43 }
 0x5e6   :  { %v6299_v59 = vpop.eup %6298 }
 0x5e7   :  { %v6301_v63 = vpop.eup %6300  ;;  %v2325_v29 = vmul.f32 %v6299_v59, %v6297_v34 }
 0x5e8   :  { %v2324_v25 = vmul.f32 %v6301_v63, %v7512_v30  ;;  %v6303_v63 = vpop.eup %6302 }
 0x5ea   :  { %v2463_v2 = vpop.f32.mrb[16].mxu0  ;;  %v2534_v45 = vpop.f32.mrb[16].mxu1  ;;  %v7818_v49 = vadd.f32 %v2325_v29, %v2324_v25 }
 0x5eb   :  { %v2465_v60 = vpop.f32.mrb[17].mxu0  ;;  %v2536_v51 = vpop.f32.mrb[17].mxu1 }
 0x5ec   :  { %v2543_v57 = vcombine.low %v2463_v2, %v2465_v60  ;;  %v2544_v62 = vcombine.low %v2534_v45, %v2536_v51  ;;  %6304 = vtanh.f32 %v7818_v49 }
 0x5ee   :  { %v2551_v18 = vrot.slane %v2543_v57, %v6962_v28  ;;  %v2558_v23 = vrot.slane %v2544_v62, %v6962_v28 }
 0x5f0   :  { %v2559_v34 = vcombine.low %v2551_v18, %v2558_v23 }
 0x5f2   :  { %v2561_v16 = vadd.f32 %v2559_v34, %v2332_v7 }
 0x5f4   :  { %v4606_v59 = vmul.f32 -1.442695, %v2561_v16  ;;  %v2569_v30 = vrot.slane %v2561_v16, 2  ;;  %v2580_v25 = vrot.slane %v2561_v16, 6  ;;  %v2577_v60 = vrot.slane %v2561_v16, 4 }
 0x5f6   :  { %v6305_v14 = vpop.eup %6304  ;;  %6306 = vpow2.f32 %v4606_v59  ;;  %v4607_v29 = vmul.f32 -1.442695, %v2569_v30  ;;  %v4608_v2 = vmul.f32 -1.442695, %v2580_v25  ;;  %v8908_v25 = vld [vmem:[#allocation51_spill] sm:$0xff] }
 0x5f7   :  { %v2328_v43 = vmul.f32 %v6305_v14, %v6303_v63 }
 0x5f8   :  { %6308 = vpow2.f32 %v4607_v29 }
 0x5f9   :  { %2330 = vst [vmem:[#allocation10 + $0x6] sm:$0x3] %v2328_v43  ;;  %2785 = vmatprep.mubr.f32.mxu0 %v2328_v43  ;;  %2856 = vmatprep.mubr.f32.mxu1 %v2328_v43  ;;  %6310 = vpow2.f32 %v4608_v2  ;;  %v8909_v2 = vld [vmem:[#allocation52_spill] sm:$0xff] }
 0x600   :  { %v6307_v45 = vpop.eup %6306 }
 0x601   :  { %v2565_v51 = vadd.f32 1.0, %v6307_v45  ;;  %v8910_v45 = vld [vmem:[#allocation53_spill] sm:$0xff] }
 0x602   :  { %v6309_v57 = vpop.eup %6308 }
 0x603   :  { %6312 = vrcp.f32 %v2565_v51  ;;  %v2574_v62 = vadd.f32 1.0, %v6309_v57  ;;  %v6311_v18 = vpop.eup %6310  ;;  %v8912_v51 = vld [vmem:[#allocation55_spill] sm:$0xff]  ;;  %v8913_v57 = vld [vmem:[#allocation56_spill] sm:$0xff] }
 0x604   :  { %6314 = vtanh.f32 %v2577_v60  ;;  %v2585_v14 = vadd.f32 1.0, %v6311_v18  ;;  %v8911_v60 = vld [vmem:[#allocation54_spill] sm:$0xff] }
 0x605   :  { %6316 = vrcp.f32 %v2574_v62  ;;  %v8914_v62 = vld [vmem:[#allocation57_spill] sm:$0xff]  ;;  %v8915_v18 = vld [vmem:[#allocation58_spill] sm:$0xff] }
 0x606   :  { %6318 = vrcp.f32 %v2585_v14  ;;  %v8919_v14 = vld [vmem:[#allocation62_spill] sm:$0xff] }
 0x60d   :  { %v6313_v23 = vpop.eup %6312 }
 0x60e   :  { %v6315_v7 = vpop.eup %6314 }
 0x60f   :  { %v6317_v34 = vpop.eup %6316  ;;  %v2589_v30 = vmul.f32 %v6315_v7, %v6313_v23  ;;  %v8916_v23 = vld [vmem:[#allocation59_spill] sm:$0xff]  ;;  %v8917_v7 = vld [vmem:[#allocation60_spill] sm:$0xff] }
 0x610   :  { %v2588_v59 = vmul.f32 %v6317_v34, %v7518_v41  ;;  %v6319_v16 = vpop.eup %6318  ;;  %v8875_v41 = vld [vmem:[#allocation18_spill] sm:$0xff]  ;;  %v8918_v34 = vld [vmem:[#allocation61_spill] sm:$0xff] }
 0x612   :  { %v7824_v63 = vadd.f32 %v2589_v30, %v2588_v59  ;;  %v8920_v59 = vld [vmem:[#allocation63_spill] sm:$0xff]  ;;  %v8921_v30 = vld [vmem:[#allocation64_spill] sm:$0xff] }
 0x614   :  { %6320 = vtanh.f32 %v7824_v63 }
 0x61e   :  { %v6321_v29 = vpop.eup %6320 }
 0x61f   :  { %v2592_v43 = vmul.f32 %v6321_v29, %v6319_v16  ;;  %v8922_v16 = vld [vmem:[#allocation65_spill] sm:$0xff]  ;;  %v8923_v29 = vld [vmem:[#allocation66_spill] sm:$0xff] }
 0x621   :  { %2786 = vmatmul.mubr.f32.vlgmr.msra.gmra.mrb[18].mxu0 %v2592_v43  ;;  %2857 = vmatmul.mubr.f32.vlgmr.msra.gmra.mrb[18].mxu1 %v2592_v43 }
 0x622   :  { %5593 = vmatpush1.bf16.msra.mxu0 %v7521_v42  ;;  %5625 = vmatpush1.bf16.msra.mxu1 %v7523_v58  ;;  %v8876_v42 = vld [vmem:[#allocation19_spill] sm:$0xff]  ;;  %v8877_v58 = vld [vmem:[#allocation20_spill] sm:$0xff] }
 0x623   :  { %5595 = vmatprep.subr.bf16.mxu0 %v7527_v35  ;;  %5627 = vmatprep.subr.bf16.mxu1 %v7529_v39  ;;  %v8878_v35 = vld [vmem:[#allocation21_spill] sm:$0xff]  ;;  %v8879_v39 = vld [vmem:[#allocation22_spill] sm:$0xff] }
 0x624   :  { %3019 = vmatprep.mubr.f32.mxu0 %v8658_v5  ;;  %3090 = vmatprep.mubr.f32.mxu1 %v8658_v5 }
 0x626   :  { %5597 = vmatpush1.bf16.msra.mxu0 %v7535_v61  ;;  %5629 = vmatpush1.bf16.msra.mxu1 %v7537_v3  ;;  %v8880_v61 = vld [vmem:[#allocation23_spill] sm:$0xff]  ;;  %v8881_v3 = vld [vmem:[#allocation24_spill] sm:$0xff] }
 0x627   :  { %5599 = vmatprep.subr.bf16.mxu0 %v7541_v22  ;;  %5631 = vmatprep.subr.bf16.mxu1 %v7543_v44  ;;  %v8882_v22 = vld [vmem:[#allocation25_spill] sm:$0xff]  ;;  %v8883_v44 = vld [vmem:[#allocation26_spill] sm:$0xff] }
 0x62a   :  { %5601 = vmatpush1.bf16.msra.mxu0 %v7549_v40  ;;  %5633 = vmatpush1.bf16.msra.mxu1 %v7551_v6  ;;  %v8884_v40 = vld [vmem:[#allocation27_spill] sm:$0xff]  ;;  %v8885_v6 = vld [vmem:[#allocation28_spill] sm:$0xff] }
 0x62b   :  { %5603 = vmatprep.subr.bf16.mxu0 %v7555_v36  ;;  %5635 = vmatprep.subr.bf16.mxu1 %v7557_v21  ;;  %v8886_v36 = vld [vmem:[#allocation29_spill] sm:$0xff]  ;;  %v8887_v21 = vld [vmem:[#allocation30_spill] sm:$0xff] }
 0x62e   :  { %5605 = vmatpush1.bf16.msra.mxu0 %v7561_v0  ;;  %5637 = vmatpush1.bf16.msra.mxu1 %v7563_v17  ;;  %v8888_v0 = vld [vmem:[#allocation31_spill] sm:$0xff]  ;;  %v8889_v17 = vld [vmem:[#allocation32_spill] sm:$0xff] }
 0x62f   :  { %5607 = vmatprep.subr.bf16.mxu0 %v7567_v31  ;;  %5639 = vmatprep.subr.bf16.mxu1 %v7569_v24  ;;  %v8890_v31 = vld [vmem:[#allocation33_spill] sm:$0xff]  ;;  %v8891_v24 = vld [vmem:[#allocation34_spill] sm:$0xff] }
 0x632   :  { %5609 = vmatpush1.bf16.msra.mxu0 %v7573_v54  ;;  %5641 = vmatpush1.bf16.msra.mxu1 %v7575_v10  ;;  %v8892_v54 = vld [vmem:[#allocation35_spill] sm:$0xff]  ;;  %v8893_v10 = vld [vmem:[#allocation36_spill] sm:$0xff] }
 0x633   :  { %5611 = vmatprep.subr.bf16.mxu0 %v7579_v15  ;;  %5643 = vmatprep.subr.bf16.mxu1 %v7581_v13  ;;  %v8894_v15 = vld [vmem:[#allocation37_spill] sm:$0xff]  ;;  %v8895_v13 = vld [vmem:[#allocation38_spill] sm:$0xff] }
 0x636   :  { %5613 = vmatpush1.bf16.msra.mxu0 %v7585_v33  ;;  %5645 = vmatpush1.bf16.msra.mxu1 %v7587_v47  ;;  %v8896_v33 = vld [vmem:[#allocation39_spill] sm:$0xff]  ;;  %v8897_v47 = vld [vmem:[#allocation40_spill] sm:$0xff] }
 0x637   :  { %5615 = vmatprep.subr.bf16.mxu0 %v7591_v26  ;;  %5647 = vmatprep.subr.bf16.mxu1 %v7593_v38  ;;  %v8898_v26 = vld [vmem:[#allocation41_spill] sm:$0xff]  ;;  %v8899_v38 = vld [vmem:[#allocation42_spill] sm:$0xff] }
 0x63a   :  { %5617 = vmatpush1.bf16.msra.mxu0 %v7597_v52  ;;  %5649 = vmatpush1.bf16.msra.mxu1 %v7599_v1  ;;  %v8900_v52 = vld [vmem:[#allocation43_spill] sm:$0xff]  ;;  %v8901_v1 = vld [vmem:[#allocation44_spill] sm:$0xff] }
 0x63b   :  { %5619 = vmatprep.subr.bf16.mxu0 %v7603_v27  ;;  %5651 = vmatprep.subr.bf16.mxu1 %v7605_v46  ;;  %v8902_v27 = vld [vmem:[#allocation45_spill] sm:$0xff]  ;;  %v8903_v46 = vld [vmem:[#allocation46_spill] sm:$0xff] }
 0x63e   :  { %5621 = vmatpush1.bf16.msra.mxu0 %v7609_v4  ;;  %5653 = vmatpush1.bf16.msra.mxu1 %v7611_v19  ;;  %v8904_v4 = vld [vmem:[#allocation47_spill] sm:$0xff]  ;;  %v8905_v19 = vld [vmem:[#allocation48_spill] sm:$0xff] }
 0x63f   :  { %5655 = vmatprep.subr.bf16.mxu0 %v7619_v11  ;;  %5719 = vmatprep.subr.bf16.mxu1 %v7621_v8  ;;  %v8906_v11 = vld [vmem:[#allocation49_spill] sm:$0xff]  ;;  %v8907_v8 = vld [vmem:[#allocation50_spill] sm:$0xff] }
 0x641   :  { %3020 = vmatmul.mubr.f32.vlgmr.msra.gmra.mrb[20].mxu0 %v2592_v43  ;;  %3091 = vmatmul.mubr.f32.vlgmr.msra.gmra.mrb[20].mxu1 %v2592_v43  ;;  %v8924_v43 = vld [vmem:[#allocation67_spill] sm:$0xff] }
 0x642   :  { %5657 = vmatpush1.bf16.msra.mxu0 %v8875_v41  ;;  %5721 = vmatpush1.bf16.msra.mxu1 %v8876_v42  ;;  %v8925_v41 = vld [vmem:[#allocation68_spill] sm:$0xff]  ;;  %v8926_v42 = vld [vmem:[#allocation69_spill] sm:$0xff] }
 0x643   :  { %5659 = vmatprep.subr.bf16.mxu0 %v8877_v58  ;;  %5723 = vmatprep.subr.bf16.mxu1 %v8878_v35  ;;  %v3452_v58 = vld [vmem:[#allocation5 + $0x18] sm:$0xff] }
 0x646   :  { %5661 = vmatpush1.bf16.msra.mxu0 %v8879_v39  ;;  %5725 = vmatpush1.bf16.msra.mxu1 %v8880_v61 }
 0x647   :  { %5663 = vmatprep.subr.bf16.mxu0 %v8881_v3  ;;  %5727 = vmatprep.subr.bf16.mxu1 %v8882_v22 }
 0x64a   :  { %5665 = vmatpush1.bf16.msra.mxu0 %v8883_v44  ;;  %5729 = vmatpush1.bf16.msra.mxu1 %v8884_v40  ;;  %v8929_v40 = vld [vmem:[#allocation16_spill] sm:$0xff] }
 0x64b   :  { %5667 = vmatprep.subr.bf16.mxu0 %v8885_v6  ;;  %5731 = vmatprep.subr.bf16.mxu1 %v8886_v36 }
 0x64e   :  { %5669 = vmatpush1.bf16.msra.mxu0 %v8887_v21  ;;  %5733 = vmatpush1.bf16.msra.mxu1 %v8888_v0  ;;  %v8930_v21 = vld [vmem:[#allocation17_spill] sm:$0xff] }
 0x64f   :  { %5671 = vmatprep.subr.bf16.mxu0 %v8889_v17  ;;  %5735 = vmatprep.subr.bf16.mxu1 %v8890_v31 }
 0x652   :  { %5673 = vmatpush1.bf16.msra.mxu0 %v8891_v24  ;;  %5737 = vmatpush1.bf16.msra.mxu1 %v8892_v54 }
 0x653   :  { %5675 = vmatprep.subr.bf16.mxu0 %v8893_v10  ;;  %5739 = vmatprep.subr.bf16.mxu1 %v8894_v15 }
 0x656   :  { %5677 = vmatpush1.bf16.msra.mxu0 %v8895_v13  ;;  %5741 = vmatpush1.bf16.msra.mxu1 %v8896_v33 }
 0x657   :  { %5679 = vmatprep.subr.bf16.mxu0 %v8897_v47  ;;  %5743 = vmatprep.subr.bf16.mxu1 %v8898_v26 }
 0x65a   :  { %5681 = vmatpush1.bf16.msra.mxu0 %v8899_v38  ;;  %5745 = vmatpush1.bf16.msra.mxu1 %v8900_v52 }
 0x65b   :  { %5683 = vmatprep.subr.bf16.mxu0 %v8901_v1  ;;  %5747 = vmatprep.subr.bf16.mxu1 %v8902_v27 }
 0x65e   :  { %5685 = vmatpush1.bf16.msra.mxu0 %v8903_v46  ;;  %5749 = vmatpush1.bf16.msra.mxu1 %v8904_v4 }
 0x65f   :  { %5687 = vmatprep.subr.bf16.mxu0 %v8905_v19  ;;  %5751 = vmatprep.subr.bf16.mxu1 %v8906_v11 }
 0x662   :  { %5689 = vmatpush1.bf16.msra.mxu0 %v8907_v8  ;;  %5753 = vmatpush1.bf16.msra.mxu1 %v8908_v25 }
 0x663   :  { %5691 = vmatprep.subr.bf16.mxu0 %v8909_v2  ;;  %5755 = vmatprep.subr.bf16.mxu1 %v8910_v45  ;;  %v2890_v2 = vld [vmem:[#allocation2 + $0x28] sm:$0xff] }
 0x666   :  { %5693 = vmatpush1.bf16.msra.mxu0 %v8911_v60  ;;  %5757 = vmatpush1.bf16.msra.mxu1 %v8912_v51 }
 0x667   :  { %5695 = vmatprep.subr.bf16.mxu0 %v8913_v57  ;;  %5759 = vmatprep.subr.bf16.mxu1 %v8914_v62 }
 0x66a   :  { %5697 = vmatpush1.bf16.msra.mxu0 %v8915_v18  ;;  %5761 = vmatpush1.bf16.msra.mxu1 %v8916_v23 }
 0x66b   :  { %5699 = vmatprep.subr.bf16.mxu0 %v8917_v7  ;;  %5763 = vmatprep.subr.bf16.mxu1 %v8918_v34 }
 0x66e   :  { %5701 = vmatpush1.bf16.msra.mxu0 %v8919_v14  ;;  %5765 = vmatpush1.bf16.msra.mxu1 %v8920_v59 }
 0x66f   :  { %5703 = vmatprep.subr.bf16.mxu0 %v8921_v30  ;;  %5767 = vmatprep.subr.bf16.mxu1 %v8922_v16 }
 0x672   :  { %5705 = vmatpush1.bf16.msra.mxu0 %v8923_v29  ;;  %5769 = vmatpush1.bf16.msra.mxu1 %v8924_v43 }
 0x673   :  { %5707 = vmatprep.subr.bf16.mxu0 %v7773_v20  ;;  %5771 = vmatprep.subr.bf16.mxu1 %v7775_v50  ;;  %v8927_v20 = vld [vmem:[#allocation70_spill] sm:$0xff] }
 0x674   :  { %v3450_v50 = vld [vmem:[#allocation5 + $0x8] sm:$0xff] }
 0x676   :  { %5709 = vmatpush1.bf16.msra.mxu0 %v7779_v32  ;;  %5773 = vmatpush1.bf16.msra.mxu1 %v7781_v56  ;;  %v3454_v32 = vld [vmem:[#allocation5 + $0x28] sm:$0xff] }
 0x677   :  { %5711 = vmatprep.subr.bf16.mxu0 %v7785_v48  ;;  %5775 = vmatprep.subr.bf16.mxu1 %v7787_v12  ;;  %v7923_v56 = vpack.c.bf16 %v3454_v32, %v3450_v50  ;;  %v3456_v48 = vld [vmem:[#allocation5 + $0x38] sm:$0xff] }
 0x678   :  { %v7925_v35 = vpack.c.bf16 %v3456_v48, %v3452_v58 }
 0x67a   :  { %5713 = vmatpush1.bf16.msra.mxu0 %v7791_v53  ;;  %5777 = vmatpush1.bf16.msra.mxu1 %v7793_v55  ;;  %v8928_v55 = vld [vmem:[#allocation15_spill] sm:$0xff] }
 0x67b   :  { %5715 = vmatprep.subr.bf16.mxu0 %v7797_v37  ;;  %5779 = vmatprep.subr.bf16.mxu1 %v8925_v41 }
 0x67e   :  { %5717 = vmatpush1.bf16.msra.mxu0 %v8926_v42  ;;  %5781 = vmatpush1.bf16.msra.mxu1 %v8927_v20 }
 0x67f   :  { %5783 = vmatprep.subr.bf16.mxu0 %v7923_v56  ;;  %5815 = vmatprep.subr.bf16.mxu1 %v7925_v35 }
 0x6f4   :  { %v2787_v12 = vpop.f32.mrb[18].mxu0  ;;  %v2858_v53 = vpop.f32.mrb[18].mxu1 }
 0x6f5   :  { %v2788_v37 = vadd.f32 %v2787_v12, %v8928_v55  ;;  %v2789_v39 = vpop.f32.mrb[19].mxu0  ;;  %v2860_v61 = vpop.f32.mrb[19].mxu1  ;;  %v2859_v0 = vadd.f32 %v2858_v53, %v8930_v21  ;;  %v3449_v12 = vld [vmem:[#allocation5] sm:$0xff] }
 0x6f6   :  { %v2790_v3 = vadd.f32 %v2789_v39, %v7078_v9  ;;  %v2861_v6 = vadd.f32 %v2860_v61, %v8929_v40  ;;  %v3453_v53 = vld [vmem:[#allocation5 + $0x20] sm:$0xff]  ;;  %v3455_v39 = vld [vmem:[#allocation5 + $0x30] sm:$0xff]  ;;  %v3458_v61 = vld [vmem:[#allocation5 + $0x48] sm:$0xff] }
 0x6f7   :  { %v4609_v22 = vmul.f32 -1.442695, %v2788_v37  ;;  %v3451_v37 = vld [vmem:[#allocation5 + $0x10] sm:$0xff] }
 0x6f8   :  { %v4610_v44 = vmul.f32 -1.442695, %v2790_v3  ;;  %v4611_v36 = vmul.f32 -1.442695, %v2861_v6  ;;  %v3462_v3 = vld [vmem:[#allocation5 + $0x68] sm:$0xff] }
 0x6f9   :  { %6322 = vpow2.f32 %v4609_v22  ;;  %v3460_v22 = vld [vmem:[#allocation5 + $0x58] sm:$0xff] }
 0x6fa   :  { %6324 = vpow2.f32 %v4610_v44  ;;  %v3464_v44 = vld [vmem:[#allocation5 + $0x78] sm:$0xff] }
 0x6fb   :  { %6326 = vpow2.f32 %v4611_v36 }
 0x6fc   :  { %6328 = vtanh.f32 %v2859_v0  ;;  %v7943_v0 = vpack.c.bf16 %v3453_v53, %v3449_v12  ;;  %v3487_v12 = vld [vmem:[#allocation5 + $0x130] sm:$0xff]  ;;  %v3490_v53 = vld [vmem:[#allocation5 + $0x148] sm:$0xff] }
 0x703   :  { %v6323_v17 = vpop.eup %6322 }
 0x704   :  { %v6325_v31 = vpop.eup %6324  ;;  %v2866_v24 = vadd.f32 1.0, %v6323_v17  ;;  %v7945_v17 = vpack.c.bf16 %v3455_v39, %v3451_v37  ;;  %v3494_v37 = vld [vmem:[#allocation5 + $0x168] sm:$0xff]  ;;  %v3492_v39 = vld [vmem:[#allocation5 + $0x158] sm:$0xff] }
 0x705   :  { %v2872_v54 = vadd.f32 1.0, %v6325_v31  ;;  %v6327_v10 = vpop.eup %6326  ;;  %v3461_v31 = vld [vmem:[#allocation5 + $0x60] sm:$0xff] }
 0x706   :  { %6330 = vrcp.f32 %v2866_v24  ;;  %v6329_v15 = vpop.eup %6328  ;;  %v2879_v26 = vadd.f32 1.0, %v6327_v10  ;;  %v7951_v10 = vpack.c.bf16 %v3464_v44, %v3460_v22  ;;  %v3489_v44 = vld [vmem:[#allocation5 + $0x140] sm:$0xff] }
 0x707   :  { %6332 = vrcp.f32 %v2872_v54  ;;  %v7949_v54 = vpack.c.bf16 %v3462_v3, %v3458_v61  ;;  %v3496_v61 = vld [vmem:[#allocation5 + $0x178] sm:$0xff] }
 0x708   :  { %6334 = vrcp.f32 %v2879_v26  ;;  %v3468_v26 = vld [vmem:[#allocation5 + $0x98] sm:$0xff] }
 0x710   :  { %v6331_v13 = vpop.eup %6330 }
 0x711   :  { %v6333_v33 = vpop.eup %6332  ;;  %v2883_v47 = vmul.f32 %v6331_v13, %v6329_v15  ;;  %v3459_v15 = vld [vmem:[#allocation5 + $0x50] sm:$0xff] }
 0x712   :  { %v2882_v38 = vmul.f32 %v6333_v33, %v7818_v49  ;;  %v6335_v57 = vpop.eup %6334  ;;  %v3463_v13 = vld [vmem:[#allocation5 + $0x70] sm:$0xff]  ;;  %v3466_v33 = vld [vmem:[#allocation5 + $0x88] sm:$0xff] }
 0x714   :  { %v3021_v52 = vpop.f32.mrb[20].mxu0  ;;  %v3092_v1 = vpop.f32.mrb[20].mxu1  ;;  %v7934_v27 = vadd.f32 %v2883_v47, %v2882_v38  ;;  %v3470_v47 = vld [vmem:[#allocation5 + $0xa8] sm:$0xff]  ;;  %v3472_v38 = vld [vmem:[#allocation5 + $0xb8] sm:$0xff] }
 0x715   :  { %v3023_v46 = vpop.f32.mrb[21].mxu0  ;;  %v3094_v4 = vpop.f32.mrb[21].mxu1 }
 0x716   :  { %v3101_v19 = vcombine.low %v3021_v52, %v3023_v46  ;;  %v3102_v11 = vcombine.low %v3092_v1, %v3094_v4  ;;  %6336 = vtanh.f32 %v7934_v27  ;;  %v7959_v1 = vpack.c.bf16 %v3463_v13, %v3459_v15  ;;  %v3465_v46 = vld [vmem:[#allocation5 + $0x80] sm:$0xff]  ;;  %v3495_v15 = vld [vmem:[#allocation5 + $0x170] sm:$0xff]  ;;  %v3498_v13 = vld [vmem:[#allocation5 + $0x188] sm:$0xff] }
 0x717   :  { %v3469_v4 = vld [vmem:[#allocation5 + $0xa0] sm:$0xff] }
 0x718   :  { %v3109_v8 = vrot.slane %v3101_v19, %v6962_v28  ;;  %v3116_v25 = vrot.slane %v3102_v11, %v6962_v28  ;;  %v7963_v19 = vpack.c.bf16 %v3470_v47, %v3466_v33  ;;  %v7965_v11 = vpack.c.bf16 %v3472_v38, %v3468_v26  ;;  %v3502_v33 = vld [vmem:[#allocation5 + $0x1a8] sm:$0xff]  ;;  %v3500_v47 = vld [vmem:[#allocation5 + $0x198] sm:$0xff] }
 0x719   :  { %v3504_v26 = vld [vmem:[#allocation5 + $0x1b8] sm:$0xff] }
 0x71a   :  { %v3117_v45 = vcombine.low %v3109_v8, %v3116_v25  ;;  %v3467_v8 = vld [vmem:[#allocation5 + $0x90] sm:$0xff] }
 0x71b   :  { %v3471_v25 = vld [vmem:[#allocation5 + $0xb0] sm:$0xff] }
 0x71c   :  { %v3119_v60 = vadd.f32 %v3117_v45, %v2890_v2  ;;  %v3474_v2 = vld [vmem:[#allocation5 + $0xc8] sm:$0xff] }
 0x71d   :  { %v3478_v45 = vld [vmem:[#allocation5 + $0xe8] sm:$0xff] }
 0x71e   :  { %v4612_v51 = vmul.f32 -1.442695, %v3119_v60  ;;  %v3127_v49 = vrot.slane %v3119_v60, 2  ;;  %v3138_v7 = vrot.slane %v3119_v60, 6  ;;  %v3135_v59 = vrot.slane %v3119_v60, 4  ;;  %v3476_v60 = vld [vmem:[#allocation5 + $0xd8] sm:$0xff] }
 0x720   :  { %v6337_v62 = vpop.eup %6336  ;;  %6338 = vpow2.f32 %v4612_v51  ;;  %v4613_v18 = vmul.f32 -1.442695, %v3127_v49  ;;  %v4614_v34 = vmul.f32 -1.442695, %v3138_v7  ;;  %v3480_v51 = vld [vmem:[#allocation5 + $0xf8] sm:$0xff]  ;;  %v7971_v49 = vpack.c.bf16 %v3469_v4, %v3465_v46  ;;  %v3497_v4 = vld [vmem:[#allocation5 + $0x180] sm:$0xff] }
 0x721   :  { %v2886_v23 = vmul.f32 %v6337_v62, %v6335_v57  ;;  %v7973_v57 = vpack.c.bf16 %v3471_v25, %v3467_v8  ;;  %v3473_v62 = vld [vmem:[#allocation5 + $0xc0] sm:$0xff]  ;;  %v7979_v7 = vpack.c.bf16 %v3480_v51, %v3476_v60  ;;  %v8013_v25 = vpack.c.bf16 %v3502_v33, %v3498_v13  ;;  %v3503_v60 = vld [vmem:[#allocation5 + $0x1b0] sm:$0xff]  ;;  %v3506_v51 = vld [vmem:[#allocation5 + $0x1c8] sm:$0xff] }
 0x722   :  { %6340 = vpow2.f32 %v4613_v18  ;;  %v3477_v18 = vld [vmem:[#allocation5 + $0xe0] sm:$0xff] }
 0x723   :  { %2888 = vst [vmem:[#allocation10 + $0x8] sm:$0x3] %v2886_v23  ;;  %3343 = vmatprep.mubr.f32.mxu0 %v2886_v23  ;;  %3414 = vmatprep.mubr.f32.mxu1 %v2886_v23  ;;  %6342 = vpow2.f32 %v4614_v34  ;;  %v7977_v23 = vpack.c.bf16 %v3478_v45, %v3474_v2  ;;  %v3475_v34 = vld [vmem:[#allocation5 + $0xd0] sm:$0xff]  ;;  %v3501_v8 = vld [vmem:[#allocation5 + $0x1a0] sm:$0xff]  ;;  %v8015_v2 = vpack.c.bf16 %v3504_v26, %v3500_v47 }
 0x724   :  { %v3499_v45 = vld [vmem:[#allocation5 + $0x190] sm:$0xff] }
 0x725   :  { %v3711_v47 = vld [vmem:[#allocation7 + $0x10] sm:$0xff] }
 0x726   :  { %v3715_v26 = vld [vmem:[#allocation7 + $0x30] sm:$0xff] }
 0x72a   :  { %v6339_v14 = vpop.eup %6338 }
 0x72b   :  { %v3123_v30 = vadd.f32 1.0, %v6339_v14  ;;  %v3479_v14 = vld [vmem:[#allocation5 + $0xf0] sm:$0xff] }
 0x72c   :  { %v6341_v16 = vpop.eup %6340 }
 0x72d   :  { %6344 = vrcp.f32 %v3123_v30  ;;  %v3132_v29 = vadd.f32 1.0, %v6341_v16  ;;  %v6343_v43 = vpop.eup %6342  ;;  %v3486_v30 = vld [vmem:[#allocation5 + $0x128] sm:$0xff]  ;;  %v3484_v16 = vld [vmem:[#allocation5 + $0x118] sm:$0xff] }
 0x72e   :  { %6346 = vtanh.f32 %v3135_v59  ;;  %v3143_v50 = vadd.f32 1.0, %v6343_v43  ;;  %v3482_v59 = vld [vmem:[#allocation5 + $0x108] sm:$0xff]  ;;  %v7983_v43 = vpack.c.bf16 %v3477_v18, %v3473_v62  ;;  %v3508_v18 = vld [vmem:[#allocation5 + $0x1d8] sm:$0xff] }
 0x72f   :  { %6348 = vrcp.f32 %v3132_v29  ;;  %v3488_v29 = vld [vmem:[#allocation5 + $0x138] sm:$0xff]  ;;  %v3510_v62 = vld [vmem:[#allocation5 + $0x1e8] sm:$0xff] }
 0x730   :  { %6350 = vrcp.f32 %v3143_v50  ;;  %v7989_v50 = vpack.c.bf16 %v3486_v30, %v3482_v59  ;;  %v8021_v59 = vpack.c.bf16 %v3503_v60, %v3499_v45  ;;  %v3505_v30 = vld [vmem:[#allocation5 + $0x1c0] sm:$0xff]  ;;  %v3720_v45 = vld [vmem:[#allocation7 + $0x58] sm:$0xff] }
 0x737   :  { %v6345_v41 = vpop.eup %6344 }
 0x738   :  { %v6347_v42 = vpop.eup %6346 }
 0x739   :  { %v6349_v20 = vpop.eup %6348  ;;  %v3147_v58 = vmul.f32 %v6347_v42, %v6345_v41  ;;  %v7985_v41 = vpack.c.bf16 %v3479_v14, %v3475_v34  ;;  %v3481_v42 = vld [vmem:[#allocation5 + $0x100] sm:$0xff]  ;;  %v3512_v34 = vld [vmem:[#allocation5 + $0x1f8] sm:$0xff]  ;;  %v8019_v14 = vpack.c.bf16 %v3501_v8, %v3497_v4  ;;  %v8048_v4 = vpack.c.bf16 %v3715_v26, %v3711_v47  ;;  %v3722_v8 = vld [vmem:[#allocation7 + $0x68] sm:$0xff] }
 0x73a   :  { %v3146_v32 = vmul.f32 %v6349_v20, %v7824_v63  ;;  %v6351_v6 = vpop.eup %6350  ;;  %v3457_v63 = vld [vmem:[#allocation5 + $0x40] sm:$0xff] }
 0x73b   :  { %v7957_v52 = vpack.c.bf16 %v3461_v31, %v3457_v63  ;;  %v3485_v20 = vld [vmem:[#allocation5 + $0x120] sm:$0xff]  ;;  %v8003_v63 = vpack.c.bf16 %v3496_v61, %v3492_v39  ;;  %v3491_v31 = vld [vmem:[#allocation5 + $0x150] sm:$0xff]  ;;  %v3714_v39 = vld [vmem:[#allocation7 + $0x28] sm:$0xff]  ;;  %8932 = vst [vmem:[#allocation19_spill] sm:$0xff] %v8048_v4 }
 0x73c   :  { %v7940_v48 = vadd.f32 %v3147_v58, %v3146_v32  ;;  %v7991_v32 = vpack.c.bf16 %v3488_v29, %v3484_v16  ;;  %v3483_v58 = vld [vmem:[#allocation5 + $0x110] sm:$0xff]  ;;  %v7995_v3 = vpack.c.bf16 %v3485_v20, %v3481_v42  ;;  %v8009_v46 = vpack.c.bf16 %v3495_v15, %v3491_v31  ;;  %v3509_v42 = vld [vmem:[#allocation5 + $0x1e0] sm:$0xff]  ;;  %v3712_v61 = vld [vmem:[#allocation7 + $0x18] sm:$0xff] }
 0x73d   :  { %v7997_v22 = vpack.c.bf16 %v3487_v12, %v3483_v58  ;;  %v8025_v16 = vpack.c.bf16 %v3510_v62, %v3506_v51  ;;  %v8027_v29 = vpack.c.bf16 %v3512_v34, %v3508_v18  ;;  %v3507_v20 = vld [vmem:[#allocation5 + $0x1d0] sm:$0xff]  ;;  %v8031_v12 = vpack.c.bf16 %v3509_v42, %v3505_v30  ;;  %v3709_v31 = vld [vmem:[#allocation7] sm:$0xff]  ;;  %v3724_v51 = vld [vmem:[#allocation7 + $0x78] sm:$0xff] }
 0x73e   :  { %6352 = vtanh.f32 %v7940_v48  ;;  %v3511_v58 = vld [vmem:[#allocation5 + $0x1f0] sm:$0xff]  ;;  %v3713_v15 = vld [vmem:[#allocation7 + $0x20] sm:$0xff]  ;;  %v8055_v34 = vpack.c.bf16 %v3724_v51, %v3720_v45 }
 0x73f   :  { %v8045_v33 = vpack.c.bf16 %v3713_v15, %v3709_v31  ;;  %v3717_v62 = vld [vmem:[#allocation7 + $0x40] sm:$0xff]  ;;  %v3719_v42 = vld [vmem:[#allocation7 + $0x50] sm:$0xff]  ;;  %v3732_v31 = vld [vmem:[#allocation7 + $0xb8] sm:$0xff] }
 0x740   :  { %v3721_v18 = vld [vmem:[#allocation7 + $0x60] sm:$0xff]  ;;  %8934 = vst [vmem:[#allocation21_spill] sm:$0xff] %v8055_v34  ;;  %v3731_v45 = vld [vmem:[#allocation7 + $0xb0] sm:$0xff] }
 0x741   :  { %8931 = vst [vmem:[#allocation18_spill] sm:$0xff] %v8045_v33  ;;  %v8057_v30 = vpack.c.bf16 %v3721_v18, %v3717_v62  ;;  %v3725_v15 = vld [vmem:[#allocation7 + $0x80] sm:$0xff]  ;;  %v3734_v62 = vld [vmem:[#allocation7 + $0xc8] sm:$0xff] }
 0x742   :  { %v3729_v47 = vld [vmem:[#allocation7 + $0xa0] sm:$0xff]  ;;  %v3738_v18 = vld [vmem:[#allocation7 + $0xe8] sm:$0xff] }
 0x743   :  { %8935 = vst [vmem:[#allocation22_spill] sm:$0xff] %v8057_v30 }
 0x748   :  { %v6353_v36 = vpop.eup %6352 }
 0x749   :  { %v7947_v24 = vmul.f32 %v6353_v36, %v6351_v6  ;;  %v3493_v6 = vld [vmem:[#allocation5 + $0x160] sm:$0xff]  ;;  %v8001_v36 = vpack.c.bf16 %v3494_v37, %v3490_v53  ;;  %v8033_v53 = vpack.c.bf16 %v3511_v58, %v3507_v20  ;;  %v3710_v37 = vld [vmem:[#allocation7 + $0x8] sm:$0xff]  ;;  %v3723_v20 = vld [vmem:[#allocation7 + $0x70] sm:$0xff] }
 0x74a   :  { %v8007_v38 = vpack.c.bf16 %v3493_v6, %v3489_v44  ;;  %v8041_v44 = vpack.c.bf16 %v3714_v39, %v3710_v37  ;;  %v3716_v6 = vld [vmem:[#allocation7 + $0x38] sm:$0xff]  ;;  %v8060_v58 = vpack.c.bf16 %v3723_v20, %v3719_v42  ;;  %v3726_v37 = vld [vmem:[#allocation7 + $0x88] sm:$0xff]  ;;  %v8077_v20 = vpack.c.bf16 %v3738_v18, %v3734_v62 }
 0x74b   :  { %3344 = vmatmul.mubr.f32.vlgmr.msra.gmra.mrb[22].mxu0 %v7947_v24  ;;  %3415 = vmatmul.mubr.f32.vlgmr.msra.gmra.mrb[22].mxu1 %v7947_v24  ;;  %v8043_v13 = vpack.c.bf16 %v3716_v6, %v3712_v61  ;;  %v3730_v39 = vld [vmem:[#allocation7 + $0xa8] sm:$0xff]  ;;  %v3728_v61 = vld [vmem:[#allocation7 + $0x98] sm:$0xff] }
 0x74c   :  { %5785 = vmatpush1.bf16.msra.mxu0 %v7943_v0  ;;  %5817 = vmatpush1.bf16.msra.mxu1 %v7945_v17  ;;  %8936 = vst [vmem:[#allocation23_spill] sm:$0xff] %v8060_v58  ;;  %v8065_v6 = vpack.c.bf16 %v3730_v39, %v3726_v37  ;;  %v8067_v26 = vpack.c.bf16 %v3732_v31, %v3728_v61  ;;  %v3736_v42 = vld [vmem:[#allocation7 + $0xd8] sm:$0xff]  ;;  %8941 = vst [vmem:[#allocation28_spill] sm:$0xff] %v8077_v20  ;;  %v3733_v39 = vld [vmem:[#allocation7 + $0xc0] sm:$0xff] }
 0x74d   :  { %5787 = vmatprep.subr.bf16.mxu0 %v7949_v54  ;;  %5819 = vmatprep.subr.bf16.mxu1 %v7951_v10  ;;  %v3740_v37 = vld [vmem:[#allocation7 + $0xf8] sm:$0xff]  ;;  %v3737_v61 = vld [vmem:[#allocation7 + $0xe0] sm:$0xff]  ;;  %v3746_v62 = vld [vmem:[#allocation7 + $0x128] sm:$0xff] }
 0x74e   :  { %3577 = vmatprep.mubr.f32.mxu0 %v8658_v5  ;;  %3648 = vmatprep.mubr.f32.mxu1 %v8658_v5  ;;  %8937 = vst [vmem:[#allocation24_spill] sm:$0xff] %v8065_v6  ;;  %8938 = vst [vmem:[#allocation25_spill] sm:$0xff] %v8067_v26  ;;  %v8079_v31 = vpack.c.bf16 %v3740_v37, %v3736_v42  ;;  %v3744_v42 = vld [vmem:[#allocation7 + $0x118] sm:$0xff] }
 0x74f   :  { %v3748_v37 = vld [vmem:[#allocation7 + $0x138] sm:$0xff] }
 0x750   :  { %5789 = vmatpush1.bf16.msra.mxu0 %v7957_v52  ;;  %5821 = vmatpush1.bf16.msra.mxu1 %v7959_v1  ;;  %8942 = vst [vmem:[#allocation29_spill] sm:$0xff] %v8079_v31 }
 0x751   :  { %5791 = vmatprep.subr.bf16.mxu0 %v7963_v19  ;;  %5823 = vmatprep.subr.bf16.mxu1 %v7965_v11 }
 0x754   :  { %5793 = vmatpush1.bf16.msra.mxu0 %v7971_v49  ;;  %5825 = vmatpush1.bf16.msra.mxu1 %v7973_v57 }
 0x755   :  { %5795 = vmatprep.subr.bf16.mxu0 %v7977_v23  ;;  %5827 = vmatprep.subr.bf16.mxu1 %v7979_v7 }
 0x758   :  { %5797 = vmatpush1.bf16.msra.mxu0 %v7983_v43  ;;  %5829 = vmatpush1.bf16.msra.mxu1 %v7985_v41 }
 0x759   :  { %5799 = vmatprep.subr.bf16.mxu0 %v7989_v50  ;;  %5831 = vmatprep.subr.bf16.mxu1 %v7991_v32 }
 0x75c   :  { %5801 = vmatpush1.bf16.msra.mxu0 %v7995_v3  ;;  %5833 = vmatpush1.bf16.msra.mxu1 %v7997_v22 }
 0x75d   :  { %5803 = vmatprep.subr.bf16.mxu0 %v8001_v36  ;;  %5835 = vmatprep.subr.bf16.mxu1 %v8003_v63 }
 0x760   :  { %5805 = vmatpush1.bf16.msra.mxu0 %v8007_v38  ;;  %5837 = vmatpush1.bf16.msra.mxu1 %v8009_v46 }
 0x761   :  { %5807 = vmatprep.subr.bf16.mxu0 %v8013_v25  ;;  %5839 = vmatprep.subr.bf16.mxu1 %v8015_v2 }
 0x764   :  { %5809 = vmatpush1.bf16.msra.mxu0 %v8019_v14  ;;  %5841 = vmatpush1.bf16.msra.mxu1 %v8021_v59 }
 0x765   :  { %5811 = vmatprep.subr.bf16.mxu0 %v8025_v16  ;;  %5843 = vmatprep.subr.bf16.mxu1 %v8027_v29 }
 0x768   :  { %5813 = vmatpush1.bf16.msra.mxu0 %v8031_v12  ;;  %5845 = vmatpush1.bf16.msra.mxu1 %v8033_v53 }
 0x769   :  { %5847 = vmatprep.subr.bf16.mxu0 %v8041_v44  ;;  %5911 = vmatprep.subr.bf16.mxu1 %v8043_v13 }
 0x76b   :  { %3578 = vmatmul.mubr.f32.vlgmr.msra.gmra.mrb[24].mxu0 %v7947_v24  ;;  %3649 = vmatmul.mubr.f32.vlgmr.msra.gmra.mrb[24].mxu1 %v7947_v24  ;;  %v3718_v24 = vld [vmem:[#allocation7 + $0x48] sm:$0xff] }
 0x76c   :  { %5849 = vmatpush1.bf16.msra.mxu0 %v8045_v33  ;;  %5913 = vmatpush1.bf16.msra.mxu1 %v8048_v4  ;;  %v8053_v60 = vpack.c.bf16 %v3722_v8, %v3718_v24  ;;  %v8069_v24 = vpack.c.bf16 %v3729_v47, %v3725_v15  ;;  %v3727_v8 = vld [vmem:[#allocation7 + $0x90] sm:$0xff]  ;;  %v8081_v15 = vpack.c.bf16 %v3737_v61, %v3733_v39  ;;  %v3741_v39 = vld [vmem:[#allocation7 + $0x100] sm:$0xff]  ;;  %v3822_v4 = vld [vmem:[#allocation7 + $0x388] sm:$0xff] }
 0x76d   :  { %5915 = vmatprep.subr.bf16.mxu1 %v8055_v34  ;;  %v8072_v51 = vpack.c.bf16 %v3731_v45, %v3727_v8  ;;  %v3735_v47 = vld [vmem:[#allocation7 + $0xd0] sm:$0xff]  ;;  %v8091_v61 = vpack.c.bf16 %v3748_v37, %v3744_v42  ;;  %v3756_v42 = vld [vmem:[#allocation7 + $0x178] sm:$0xff]  ;;  %v3749_v37 = vld [vmem:[#allocation7 + $0x140] sm:$0xff] }
 0x76e   :  { %8933 = vst [vmem:[#allocation20_spill] sm:$0xff] %v8053_v60  ;;  %5851 = vmatprep.subr.bf16.mxu0 %v8053_v60  ;;  %8939 = vst [vmem:[#allocation26_spill] sm:$0xff] %v8069_v24  ;;  %v3739_v8 = vld [vmem:[#allocation7 + $0xf0] sm:$0xff]  ;;  %v3814_v60 = vld [vmem:[#allocation7 + $0x348] sm:$0xff] }
 0x76f   :  { %8940 = vst [vmem:[#allocation27_spill] sm:$0xff] %v8072_v51  ;;  %8943 = vst [vmem:[#allocation30_spill] sm:$0xff] %v8081_v15  ;;  %v8084_v45 = vpack.c.bf16 %v3739_v8, %v3735_v47  ;;  %v3807_v34 = vld [vmem:[#allocation7 + $0x310] sm:$0xff]  ;;  %v3824_v33 = vld [vmem:[#allocation7 + $0x398] sm:$0xff] }
 0x770   :  { %5853 = vmatpush1.bf16.msra.mxu0 %v8057_v30  ;;  %5917 = vmatpush1.bf16.msra.mxu1 %v8060_v58  ;;  %8946 = vst [vmem:[#allocation33_spill] sm:$0xff] %v8091_v61  ;;  %v3793_v58 = vld [vmem:[#allocation7 + $0x2a0] sm:$0xff]  ;;  %v3810_v30 = vld [vmem:[#allocation7 + $0x328] sm:$0xff] }
 0x771   :  { %5855 = vmatprep.subr.bf16.mxu0 %v8065_v6  ;;  %5919 = vmatprep.subr.bf16.mxu1 %v8067_v26  ;;  %8944 = vst [vmem:[#allocation31_spill] sm:$0xff] %v8084_v45  ;;  %v3743_v26 = vld [vmem:[#allocation7 + $0x110] sm:$0xff] }
 0x774   :  { %5857 = vmatpush1.bf16.msra.mxu0 %v8069_v24  ;;  %5921 = vmatpush1.bf16.msra.mxu1 %v8072_v51  ;;  %v3742_v51 = vld [vmem:[#allocation7 + $0x108] sm:$0xff]  ;;  %v3745_v24 = vld [vmem:[#allocation7 + $0x120] sm:$0xff] }
 0x775   :  { %5859 = vmatprep.subr.bf16.mxu0 %v8077_v20  ;;  %5923 = vmatprep.subr.bf16.mxu1 %v8079_v31  ;;  %v8089_v18 = vpack.c.bf16 %v3746_v62, %v3742_v51  ;;  %v3747_v20 = vld [vmem:[#allocation7 + $0x130] sm:$0xff]  ;;  %v8094_v47 = vpack.c.bf16 %v3745_v24, %v3741_v39  ;;  %v3752_v51 = vld [vmem:[#allocation7 + $0x158] sm:$0xff]  ;;  %v3753_v31 = vld [vmem:[#allocation7 + $0x160] sm:$0xff] }
 0x776   :  { %v8096_v8 = vpack.c.bf16 %v3747_v20, %v3743_v26  ;;  %v8103_v6 = vpack.c.bf16 %v3756_v42, %v3752_v51  ;;  %v8105_v24 = vpack.c.bf16 %v3753_v31, %v3749_v37  ;;  %v3751_v26 = vld [vmem:[#allocation7 + $0x150] sm:$0xff]  ;;  %v3757_v31 = vld [vmem:[#allocation7 + $0x180] sm:$0xff] }
 0x777   :  { %8945 = vst [vmem:[#allocation32_spill] sm:$0xff] %v8089_v18  ;;  %8947 = vst [vmem:[#allocation34_spill] sm:$0xff] %v8094_v47  ;;  %v3755_v20 = vld [vmem:[#allocation7 + $0x170] sm:$0xff]  ;;  %v3761_v51 = vld [vmem:[#allocation7 + $0x1a0] sm:$0xff] }
 0x778   :  { %5861 = vmatpush1.bf16.msra.mxu0 %v8081_v15  ;;  %5925 = vmatpush1.bf16.msra.mxu1 %v8084_v45  ;;  %8948 = vst [vmem:[#allocation35_spill] sm:$0xff] %v8096_v8  ;;  %v3750_v15 = vld [vmem:[#allocation7 + $0x148] sm:$0xff]  ;;  %8950 = vst [vmem:[#allocation37_spill] sm:$0xff] %v8103_v6  ;;  %v8108_v39 = vpack.c.bf16 %v3755_v20, %v3751_v26  ;;  %v8117_v37 = vpack.c.bf16 %v3761_v51, %v3757_v31  ;;  %v3759_v26 = vld [vmem:[#allocation7 + $0x190] sm:$0xff] }
 0x779   :  { %5863 = vmatprep.subr.bf16.mxu0 %v8089_v18  ;;  %5927 = vmatprep.subr.bf16.mxu1 %v8091_v61  ;;  %v3754_v45 = vld [vmem:[#allocation7 + $0x168] sm:$0xff]  ;;  %8951 = vst [vmem:[#allocation38_spill] sm:$0xff] %v8105_v24  ;;  %v3763_v20 = vld [vmem:[#allocation7 + $0x1b0] sm:$0xff] }
 0x77a   :  { %v8101_v62 = vpack.c.bf16 %v3754_v45, %v3750_v15  ;;  %8952 = vst [vmem:[#allocation39_spill] sm:$0xff] %v8108_v39  ;;  %v3762_v61 = vld [vmem:[#allocation7 + $0x1a8] sm:$0xff]  ;;  %v3764_v45 = vld [vmem:[#allocation7 + $0x1b8] sm:$0xff]  ;;  %8955 = vst [vmem:[#allocation42_spill] sm:$0xff] %v8117_v37 }
 0x77b   :  { %v3794_v18 = vld [vmem:[#allocation7 + $0x2a8] sm:$0xff] }
 0x77c   :  { %5865 = vmatpush1.bf16.msra.mxu0 %v8094_v47  ;;  %5929 = vmatpush1.bf16.msra.mxu1 %v8096_v8  ;;  %8949 = vst [vmem:[#allocation36_spill] sm:$0xff] %v8101_v62  ;;  %v3758_v47 = vld [vmem:[#allocation7 + $0x188] sm:$0xff]  ;;  %v3760_v8 = vld [vmem:[#allocation7 + $0x198] sm:$0xff] }
 0x77d   :  { %5867 = vmatprep.subr.bf16.mxu0 %v8101_v62  ;;  %5931 = vmatprep.subr.bf16.mxu1 %v8103_v6  ;;  %v8113_v15 = vpack.c.bf16 %v3762_v61, %v3758_v47  ;;  %v8115_v42 = vpack.c.bf16 %v3764_v45, %v3760_v8  ;;  %v8120_v6 = vpack.c.bf16 %v3763_v20, %v3759_v26  ;;  %v3770_v62 = vld [vmem:[#allocation7 + $0x1e8] sm:$0xff]  ;;  %v3772_v47 = vld [vmem:[#allocation7 + $0x1f8] sm:$0xff]  ;;  %v3765_v8 = vld [vmem:[#allocation7 + $0x1c0] sm:$0xff] }
 0x77e   :  { %v3769_v45 = vld [vmem:[#allocation7 + $0x1e0] sm:$0xff]  ;;  %v3767_v26 = vld [vmem:[#allocation7 + $0x1d0] sm:$0xff] }
 0x77f   :  { %8953 = vst [vmem:[#allocation40_spill] sm:$0xff] %v8113_v15  ;;  %8954 = vst [vmem:[#allocation41_spill] sm:$0xff] %v8115_v42  ;;  %v8129_v51 = vpack.c.bf16 %v3769_v45, %v3765_v8  ;;  %v3771_v20 = vld [vmem:[#allocation7 + $0x1f0] sm:$0xff] }
 0x780   :  { %5869 = vmatpush1.bf16.msra.mxu0 %v8105_v24  ;;  %5933 = vmatpush1.bf16.msra.mxu1 %v8108_v39  ;;  %8956 = vst [vmem:[#allocation43_spill] sm:$0xff] %v8120_v6  ;;  %v3766_v24 = vld [vmem:[#allocation7 + $0x1c8] sm:$0xff]  ;;  %v3768_v39 = vld [vmem:[#allocation7 + $0x1d8] sm:$0xff] }
 0x781   :  { %5871 = vmatprep.subr.bf16.mxu0 %v8113_v15  ;;  %5935 = vmatprep.subr.bf16.mxu1 %v8115_v42  ;;  %v8125_v61 = vpack.c.bf16 %v3770_v62, %v3766_v24  ;;  %v8127_v31 = vpack.c.bf16 %v3772_v47, %v3768_v39  ;;  %8959 = vst [vmem:[#allocation46_spill] sm:$0xff] %v8129_v51  ;;  %v3778_v15 = vld [vmem:[#allocation7 + $0x228] sm:$0xff]  ;;  %v3780_v24 = vld [vmem:[#allocation7 + $0x238] sm:$0xff]  ;;  %v3773_v39 = vld [vmem:[#allocation7 + $0x200] sm:$0xff] }
 0x782   :  { %v8132_v42 = vpack.c.bf16 %v3771_v20, %v3767_v26  ;;  %v3777_v47 = vld [vmem:[#allocation7 + $0x220] sm:$0xff]  ;;  %v3775_v26 = vld [vmem:[#allocation7 + $0x210] sm:$0xff] }
 0x783   :  { %8957 = vst [vmem:[#allocation44_spill] sm:$0xff] %v8125_v61  ;;  %8958 = vst [vmem:[#allocation45_spill] sm:$0xff] %v8127_v31  ;;  %v8141_v45 = vpack.c.bf16 %v3777_v47, %v3773_v39  ;;  %v3779_v20 = vld [vmem:[#allocation7 + $0x230] sm:$0xff] }
 0x784   :  { %5873 = vmatpush1.bf16.msra.mxu0 %v8117_v37  ;;  %5937 = vmatpush1.bf16.msra.mxu1 %v8120_v6  ;;  %8960 = vst [vmem:[#allocation47_spill] sm:$0xff] %v8132_v42  ;;  %v3774_v37 = vld [vmem:[#allocation7 + $0x208] sm:$0xff]  ;;  %v3776_v6 = vld [vmem:[#allocation7 + $0x218] sm:$0xff] }
 0x785   :  { %5875 = vmatprep.subr.bf16.mxu0 %v8125_v61  ;;  %5939 = vmatprep.subr.bf16.mxu1 %v8127_v31  ;;  %v8137_v62 = vpack.c.bf16 %v3778_v15, %v3774_v37  ;;  %v8139_v8 = vpack.c.bf16 %v3780_v24, %v3776_v6  ;;  %8963 = vst [vmem:[#allocation50_spill] sm:$0xff] %v8141_v45  ;;  %v3786_v61 = vld [vmem:[#allocation7 + $0x268] sm:$0xff]  ;;  %v3788_v6 = vld [vmem:[#allocation7 + $0x278] sm:$0xff]  ;;  %v3781_v37 = vld [vmem:[#allocation7 + $0x240] sm:$0xff] }
 0x786   :  { %v8144_v31 = vpack.c.bf16 %v3779_v20, %v3775_v26  ;;  %v3785_v24 = vld [vmem:[#allocation7 + $0x260] sm:$0xff]  ;;  %v3783_v26 = vld [vmem:[#allocation7 + $0x250] sm:$0xff] }
 0x787   :  { %8961 = vst [vmem:[#allocation48_spill] sm:$0xff] %v8137_v62  ;;  %8962 = vst [vmem:[#allocation49_spill] sm:$0xff] %v8139_v8  ;;  %v8153_v47 = vpack.c.bf16 %v3785_v24, %v3781_v37  ;;  %v3787_v20 = vld [vmem:[#allocation7 + $0x270] sm:$0xff] }
 0x788   :  { %5877 = vmatpush1.bf16.msra.mxu0 %v8129_v51  ;;  %5941 = vmatpush1.bf16.msra.mxu1 %v8132_v42  ;;  %8964 = vst [vmem:[#allocation51_spill] sm:$0xff] %v8144_v31  ;;  %v3782_v51 = vld [vmem:[#allocation7 + $0x248] sm:$0xff]  ;;  %v3784_v42 = vld [vmem:[#allocation7 + $0x258] sm:$0xff]  ;;  %v3791_v37 = vld [vmem:[#allocation7 + $0x290] sm:$0xff] }
 0x789   :  { %5879 = vmatprep.subr.bf16.mxu0 %v8137_v62  ;;  %5943 = vmatprep.subr.bf16.mxu1 %v8139_v8  ;;  %v8149_v15 = vpack.c.bf16 %v3786_v61, %v3782_v51  ;;  %v8151_v39 = vpack.c.bf16 %v3788_v6, %v3784_v42  ;;  %8967 = vst [vmem:[#allocation54_spill] sm:$0xff] %v8153_v47  ;;  %v3790_v62 = vld [vmem:[#allocation7 + $0x288] sm:$0xff]  ;;  %v3796_v51 = vld [vmem:[#allocation7 + $0x2b8] sm:$0xff]  ;;  %v3795_v24 = vld [vmem:[#allocation7 + $0x2b0] sm:$0xff] }
 0x78a   :  { %v8156_v8 = vpack.c.bf16 %v3787_v20, %v3783_v26  ;;  %v8159_v61 = vpack.c.bf16 %v3794_v18, %v3790_v62  ;;  %v3798_v26 = vld [vmem:[#allocation7 + $0x2c8] sm:$0xff]  ;;  %v8168_v20 = vpack.c.bf16 %v3795_v24, %v3791_v37  ;;  %v3800_v62 = vld [vmem:[#allocation7 + $0x2d8] sm:$0xff] }
 0x78b   :  { %8965 = vst [vmem:[#allocation52_spill] sm:$0xff] %v8149_v15  ;;  %8966 = vst [vmem:[#allocation53_spill] sm:$0xff] %v8151_v39  ;;  %v3802_v18 = vld [vmem:[#allocation7 + $0x2e8] sm:$0xff] }
 0x78c   :  { %5881 = vmatpush1.bf16.msra.mxu0 %v8141_v45  ;;  %5945 = vmatpush1.bf16.msra.mxu1 %v8144_v31  ;;  %8968 = vst [vmem:[#allocation55_spill] sm:$0xff] %v8156_v8  ;;  %v3792_v45 = vld [vmem:[#allocation7 + $0x298] sm:$0xff]  ;;  %8969 = vst [vmem:[#allocation56_spill] sm:$0xff] %v8159_v61  ;;  %v3789_v31 = vld [vmem:[#allocation7 + $0x280] sm:$0xff] }
 0x78d   :  { %5883 = vmatprep.subr.bf16.mxu0 %v8149_v15  ;;  %5947 = vmatprep.subr.bf16.mxu1 %v8151_v39  ;;  %v8163_v42 = vpack.c.bf16 %v3796_v51, %v3792_v45  ;;  %v8165_v6 = vpack.c.bf16 %v3793_v58, %v3789_v31  ;;  %8972 = vst [vmem:[#allocation59_spill] sm:$0xff] %v8168_v20  ;;  %v3804_v39 = vld [vmem:[#allocation7 + $0x2f8] sm:$0xff]  ;;  %v3797_v45 = vld [vmem:[#allocation7 + $0x2c0] sm:$0xff]  ;;  %v3799_v58 = vld [vmem:[#allocation7 + $0x2d0] sm:$0xff] }
 0x78e   :  { %v8171_v15 = vpack.c.bf16 %v3802_v18, %v3798_v26  ;;  %v3801_v51 = vld [vmem:[#allocation7 + $0x2e0] sm:$0xff]  ;;  %v3803_v31 = vld [vmem:[#allocation7 + $0x2f0] sm:$0xff] }
 0x78f   :  { %8970 = vst [vmem:[#allocation57_spill] sm:$0xff] %v8163_v42  ;;  %8971 = vst [vmem:[#allocation58_spill] sm:$0xff] %v8165_v6  ;;  %v8177_v37 = vpack.c.bf16 %v3801_v51, %v3797_v45  ;;  %v8179_v24 = vpack.c.bf16 %v3803_v31, %v3799_v58  ;;  %v3805_v26 = vld [vmem:[#allocation7 + $0x300] sm:$0xff]  ;;  %v3816_v45 = vld [vmem:[#allocation7 + $0x358] sm:$0xff] }
 0x790   :  { %5885 = vmatpush1.bf16.msra.mxu0 %v8153_v47  ;;  %5949 = vmatpush1.bf16.msra.mxu1 %v8156_v8  ;;  %8973 = vst [vmem:[#allocation60_spill] sm:$0xff] %v8171_v15  ;;  %v8173_v47 = vpack.c.bf16 %v3804_v39, %v3800_v62  ;;  %v3806_v8 = vld [vmem:[#allocation7 + $0x308] sm:$0xff]  ;;  %v3809_v62 = vld [vmem:[#allocation7 + $0x320] sm:$0xff]  ;;  %v3820_v51 = vld [vmem:[#allocation7 + $0x378] sm:$0xff] }
 0x791   :  { %5887 = vmatprep.subr.bf16.mxu0 %v8159_v61  ;;  %5951 = vmatprep.subr.bf16.mxu1 %v8163_v42  ;;  %8975 = vst [vmem:[#allocation62_spill] sm:$0xff] %v8177_v37  ;;  %8976 = vst [vmem:[#allocation63_spill] sm:$0xff] %v8179_v24  ;;  %v3808_v61 = vld [vmem:[#allocation7 + $0x318] sm:$0xff]  ;;  %v8183_v39 = vpack.c.bf16 %v3810_v30, %v3806_v8  ;;  %v8189_v58 = vpack.c.bf16 %v3809_v62, %v3805_v26  ;;  %v3817_v30 = vld [vmem:[#allocation7 + $0x360] sm:$0xff] }
 0x792   :  { %8974 = vst [vmem:[#allocation61_spill] sm:$0xff] %v8173_v47  ;;  %v3812_v42 = vld [vmem:[#allocation7 + $0x338] sm:$0xff]  ;;  %v3821_v26 = vld [vmem:[#allocation7 + $0x380] sm:$0xff] }
 0x793   :  { %8977 = vst [vmem:[#allocation64_spill] sm:$0xff] %v8183_v39  ;;  %v8185_v18 = vpack.c.bf16 %v3812_v42, %v3808_v61  ;;  %8979 = vst [vmem:[#allocation66_spill] sm:$0xff] %v8189_v58  ;;  %v8197_v61 = vpack.c.bf16 %v3820_v51, %v3816_v45  ;;  %v3815_v42 = vld [vmem:[#allocation7 + $0x350] sm:$0xff]  ;;  %v3825_v62 = vld [vmem:[#allocation7 + $0x3a0] sm:$0xff] }
 0x794   :  { %5889 = vmatpush1.bf16.msra.mxu0 %v8165_v6  ;;  %5953 = vmatpush1.bf16.msra.mxu1 %v8168_v20  ;;  %v3811_v6 = vld [vmem:[#allocation7 + $0x330] sm:$0xff]  ;;  %v3818_v20 = vld [vmem:[#allocation7 + $0x368] sm:$0xff] }
 0x795   :  { %5891 = vmatprep.subr.bf16.mxu0 %v8171_v15  ;;  %5955 = vmatprep.subr.bf16.mxu1 %v8173_v47  ;;  %8978 = vst [vmem:[#allocation65_spill] sm:$0xff] %v8185_v18  ;;  %v8191_v31 = vpack.c.bf16 %v3811_v6, %v3807_v34  ;;  %v3813_v47 = vld [vmem:[#allocation7 + $0x340] sm:$0xff]  ;;  %v8195_v8 = vpack.c.bf16 %v3818_v20, %v3814_v60  ;;  %v3819_v15 = vld [vmem:[#allocation7 + $0x370] sm:$0xff] }
 0x796   :  { %v8201_v34 = vpack.c.bf16 %v3817_v30, %v3813_v47  ;;  %v8203_v6 = vpack.c.bf16 %v3819_v15, %v3815_v42  ;;  %v3823_v45 = vld [vmem:[#allocation7 + $0x390] sm:$0xff]  ;;  %v8213_v15 = vpack.c.bf16 %v3825_v62, %v3821_v26  ;;  %v3829_v30 = vld [vmem:[#allocation7 + $0x3c0] sm:$0xff] }
 0x797   :  { %8980 = vst [vmem:[#allocation67_spill] sm:$0xff] %v8191_v31  ;;  %v3827_v51 = vld [vmem:[#allocation7 + $0x3b0] sm:$0xff] }
 0x798   :  { %5893 = vmatpush1.bf16.msra.mxu0 %v8177_v37  ;;  %5957 = vmatpush1.bf16.msra.mxu1 %v8179_v24  ;;  %v3826_v37 = vld [vmem:[#allocation7 + $0x3a8] sm:$0xff]  ;;  %v3828_v24 = vld [vmem:[#allocation7 + $0x3b8] sm:$0xff]  ;;  %v8215_v47 = vpack.c.bf16 %v3827_v51, %v3823_v45  ;;  %v3835_v42 = vld [vmem:[#allocation7 + $0x3f0] sm:$0xff] }
 0x799   :  { %5895 = vmatprep.subr.bf16.mxu0 %v8183_v39  ;;  %5959 = vmatprep.subr.bf16.mxu1 %v8185_v18  ;;  %v8207_v60 = vpack.c.bf16 %v3826_v37, %v3822_v4  ;;  %v8209_v20 = vpack.c.bf16 %v3828_v24, %v3824_v33  ;;  %v3830_v18 = vld [vmem:[#allocation7 + $0x3c8] sm:$0xff]  ;;  %v3832_v39 = vld [vmem:[#allocation7 + $0x3d8] sm:$0xff]  ;;  %v3833_v37 = vld [vmem:[#allocation7 + $0x3e0] sm:$0xff] }
 0x79a   :  { %v3831_v24 = vld [vmem:[#allocation7 + $0x3d0] sm:$0xff]  ;;  %v8225_v26 = vpack.c.bf16 %v3833_v37, %v3829_v30 }
 0x79b   :  { %v8227_v62 = vpack.c.bf16 %v3835_v42, %v3831_v24 }
 0x79c   :  { %5897 = vmatpush1.bf16.msra.mxu0 %v8189_v58  ;;  %5961 = vmatpush1.bf16.msra.mxu1 %v8191_v31  ;;  %v3834_v58 = vld [vmem:[#allocation7 + $0x3e8] sm:$0xff]  ;;  %v3836_v31 = vld [vmem:[#allocation7 + $0x3f8] sm:$0xff]  ;;  %8982 = vst [vmem:[#allocation69_spill] sm:$0xff] %v8225_v26 }
 0x79d   :  { %5899 = vmatprep.subr.bf16.mxu0 %v8195_v8  ;;  %5963 = vmatprep.subr.bf16.mxu1 %v8197_v61  ;;  %v8219_v33 = vpack.c.bf16 %v3834_v58, %v3830_v18  ;;  %v8221_v4 = vpack.c.bf16 %v3836_v31, %v3832_v39  ;;  %8983 = vst [vmem:[#allocation70_spill] sm:$0xff] %v8227_v62 }
 0x79f   :  { %8981 = vst [vmem:[#allocation68_spill] sm:$0xff] %v8221_v4 }
 0x7a0   :  { %5901 = vmatpush1.bf16.msra.mxu0 %v8201_v34  ;;  %5965 = vmatpush1.bf16.msra.mxu1 %v8203_v6 }
 0x7a1   :  { %5903 = vmatprep.subr.bf16.mxu0 %v8207_v60  ;;  %5967 = vmatprep.subr.bf16.mxu1 %v8209_v20 }
 0x7a4   :  { %5905 = vmatpush1.bf16.msra.mxu0 %v8213_v15  ;;  %5969 = vmatpush1.bf16.msra.mxu1 %v8215_v47 }
 0x7a5   :  { %5907 = vmatprep.subr.bf16.mxu0 %v8219_v33  ;;  %5971 = vmatprep.subr.bf16.mxu1 %v8221_v4 }
 0x7a8   :  { %5909 = vmatpush1.bf16.msra.mxu0 %v8225_v26  ;;  %5973 = vmatpush1.bf16.msra.mxu1 %v8227_v62 }
 0x7a9   :  { %5975 = vmatprep.subr.bf16.mxu0 %v7923_v56  ;;  %6007 = vmatprep.subr.bf16.mxu1 %v7925_v35 }
 0x81e   :  { %v3345_v39 = vpop.f32.mrb[22].mxu0  ;;  %v3416_v18 = vpop.f32.mrb[22].mxu1 }
 0x81f   :  { %v3346_v58 = vadd.f32 %v3345_v39, %v8928_v55  ;;  %v3347_v31 = vpop.f32.mrb[23].mxu0  ;;  %v3418_v45 = vpop.f32.mrb[23].mxu1  ;;  %v3417_v62 = vadd.f32 %v3416_v18, %v8930_v21 }
 0x820   :  { %v3348_v51 = vadd.f32 %v3347_v31, %v7078_v9  ;;  %v3419_v24 = vadd.f32 %v3418_v45, %v8929_v40 }
 0x821   :  { %v4615_v30 = vmul.f32 -1.442695, %v3346_v58 }
 0x822   :  { %v4616_v37 = vmul.f32 -1.442695, %v3348_v51  ;;  %v4617_v42 = vmul.f32 -1.442695, %v3419_v24 }
 0x823   :  { %6354 = vpow2.f32 %v4615_v30 }
 0x824   :  { %6356 = vpow2.f32 %v4616_v37 }
 0x825   :  { %6358 = vpow2.f32 %v4617_v42 }
 0x826   :  { %6360 = vtanh.f32 %v3417_v62 }
 0x82d   :  { %v6355_v56 = vpop.eup %6354 }
 0x82e   :  { %v6357_v26 = vpop.eup %6356  ;;  %v3424_v35 = vadd.f32 1.0, %v6355_v56 }
 0x82f   :  { %v3430_v4 = vadd.f32 1.0, %v6357_v26  ;;  %v6359_v39 = vpop.eup %6358 }
 0x830   :  { %6362 = vrcp.f32 %v3424_v35  ;;  %v6361_v55 = vpop.eup %6360  ;;  %v3437_v30 = vadd.f32 1.0, %v6359_v39  ;;  %v3448_v35 = vld [vmem:[#allocation2 + $0x30] sm:$0xff] }
 0x831   :  { %6364 = vrcp.f32 %v3430_v4 }
 0x832   :  { %6366 = vrcp.f32 %v3437_v30 }
 0x83a   :  { %v6363_v31 = vpop.eup %6362 }
 0x83b   :  { %v6365_v58 = vpop.eup %6364  ;;  %v3441_v51 = vmul.f32 %v6363_v31, %v6361_v55 }
 0x83c   :  { %v3440_v37 = vmul.f32 %v6365_v58, %v7934_v27  ;;  %v6367_v58 = vpop.eup %6366 }
 0x83e   :  { %v3579_v45 = vpop.f32.mrb[24].mxu0  ;;  %v3650_v24 = vpop.f32.mrb[24].mxu1  ;;  %v8240_v40 = vadd.f32 %v3441_v51, %v3440_v37 }
 0x83f   :  { %v3581_v18 = vpop.f32.mrb[25].mxu0  ;;  %v3652_v56 = vpop.f32.mrb[25].mxu1 }
 0x840   :  { %v3659_v42 = vcombine.low %v3579_v45, %v3581_v18  ;;  %v3660_v62 = vcombine.low %v3650_v24, %v3652_v56  ;;  %6368 = vtanh.f32 %v8240_v40 }
 0x842   :  { %v3667_v4 = vrot.slane %v3659_v42, %v6962_v28  ;;  %v3674_v26 = vrot.slane %v3660_v62, %v6962_v28 }
 0x844   :  { %v3675_v55 = vcombine.low %v3667_v4, %v3674_v26 }
 0x846   :  { %v3677_v39 = vadd.f32 %v3675_v55, %v3448_v35 }
 0x848   :  { %v4618_v31 = vmul.f32 -1.442695, %v3677_v39  ;;  %v3685_v27 = vrot.slane %v3677_v39, 2  ;;  %v3696_v37 = vrot.slane %v3677_v39, 6  ;;  %v3693_v18 = vrot.slane %v3677_v39, 4 }
 0x84a   :  { %v6369_v21 = vpop.eup %6368  ;;  %6370 = vpow2.f32 %v4618_v31  ;;  %v4619_v51 = vmul.f32 -1.442695, %v3685_v27  ;;  %v4620_v45 = vmul.f32 -1.442695, %v3696_v37  ;;  %v9018_v37 = vld [vmem:[#allocation52_spill] sm:$0xff] }
 0x84b   :  { %v3444_v30 = vmul.f32 %v6369_v21, %v6367_v58 }
 0x84c   :  { %6372 = vpow2.f32 %v4619_v51 }
 0x84d   :  { %3446 = vst [vmem:[#allocation10 + $0xa] sm:$0x3] %v3444_v30  ;;  %3901 = vmatprep.mubr.f32.mxu0 %v3444_v30  ;;  %3972 = vmatprep.mubr.f32.mxu1 %v3444_v30  ;;  %6374 = vpow2.f32 %v4620_v45  ;;  %v9019_v45 = vld [vmem:[#allocation53_spill] sm:$0xff] }
 0x854   :  { %v6371_v24 = vpop.eup %6370 }
 0x855   :  { %v3681_v56 = vadd.f32 1.0, %v6371_v24  ;;  %v9020_v24 = vld [vmem:[#allocation54_spill] sm:$0xff] }
 0x856   :  { %v6373_v42 = vpop.eup %6372 }
 0x857   :  { %6376 = vrcp.f32 %v3681_v56  ;;  %v3690_v62 = vadd.f32 1.0, %v6373_v42  ;;  %v6375_v4 = vpop.eup %6374  ;;  %v9022_v56 = vld [vmem:[#allocation56_spill] sm:$0xff]  ;;  %v9023_v42 = vld [vmem:[#allocation57_spill] sm:$0xff] }
 0x858   :  { %6378 = vtanh.f32 %v3693_v18  ;;  %v3701_v21 = vadd.f32 1.0, %v6375_v4  ;;  %v9021_v18 = vld [vmem:[#allocation55_spill] sm:$0xff] }
 0x859   :  { %6380 = vrcp.f32 %v3690_v62  ;;  %v9024_v62 = vld [vmem:[#allocation58_spill] sm:$0xff]  ;;  %v9025_v4 = vld [vmem:[#allocation59_spill] sm:$0xff] }
 0x85a   :  { %6382 = vrcp.f32 %v3701_v21  ;;  %v9029_v21 = vld [vmem:[#allocation63_spill] sm:$0xff] }
 0x861   :  { %v6377_v26 = vpop.eup %6376 }
 0x862   :  { %v6379_v35 = vpop.eup %6378 }
 0x863   :  { %v6381_v55 = vpop.eup %6380  ;;  %v3705_v27 = vmul.f32 %v6379_v35, %v6377_v26  ;;  %v9026_v26 = vld [vmem:[#allocation60_spill] sm:$0xff]  ;;  %v9027_v35 = vld [vmem:[#allocation61_spill] sm:$0xff] }
 0x864   :  { %v3704_v31 = vmul.f32 %v6381_v55, %v7940_v48  ;;  %v6383_v39 = vpop.eup %6382  ;;  %v8985_v48 = vld [vmem:[#allocation19_spill] sm:$0xff]  ;;  %v9028_v55 = vld [vmem:[#allocation62_spill] sm:$0xff] }
 0x866   :  { %v8246_v58 = vadd.f32 %v3705_v27, %v3704_v31  ;;  %v9030_v31 = vld [vmem:[#allocation64_spill] sm:$0xff]  ;;  %v9031_v27 = vld [vmem:[#allocation65_spill] sm:$0xff] }
 0x868   :  { %6384 = vtanh.f32 %v8246_v58 }
 0x872   :  { %v6385_v51 = vpop.eup %6384 }
 0x873   :  { %v3708_v30 = vmul.f32 %v6385_v51, %v6383_v39  ;;  %v9032_v39 = vld [vmem:[#allocation66_spill] sm:$0xff]  ;;  %v9033_v51 = vld [vmem:[#allocation67_spill] sm:$0xff] }
 0x875   :  { %3902 = vmatmul.mubr.f32.vlgmr.msra.gmra.mrb[26].mxu0 %v3708_v30  ;;  %3973 = vmatmul.mubr.f32.vlgmr.msra.gmra.mrb[26].mxu1 %v3708_v30 }
 0x876   :  { %5977 = vmatpush1.bf16.msra.mxu0 %v7943_v0  ;;  %6009 = vmatpush1.bf16.msra.mxu1 %v7945_v17  ;;  %v8986_v0 = vld [vmem:[#allocation20_spill] sm:$0xff]  ;;  %v8987_v17 = vld [vmem:[#allocation21_spill] sm:$0xff] }
 0x877   :  { %5979 = vmatprep.subr.bf16.mxu0 %v7949_v54  ;;  %6011 = vmatprep.subr.bf16.mxu1 %v7951_v10  ;;  %v8988_v54 = vld [vmem:[#allocation22_spill] sm:$0xff]  ;;  %v8989_v10 = vld [vmem:[#allocation23_spill] sm:$0xff] }
 0x878   :  { %4135 = vmatprep.mubr.f32.mxu0 %v8658_v5  ;;  %4206 = vmatprep.mubr.f32.mxu1 %v8658_v5  ;;  %v8984_v5 = vld [vmem:[#allocation18_spill] sm:$0xff] }
 0x87a   :  { %5981 = vmatpush1.bf16.msra.mxu0 %v7957_v52  ;;  %6013 = vmatpush1.bf16.msra.mxu1 %v7959_v1  ;;  %v8990_v52 = vld [vmem:[#allocation24_spill] sm:$0xff]  ;;  %v8991_v1 = vld [vmem:[#allocation25_spill] sm:$0xff] }
 0x87b   :  { %5983 = vmatprep.subr.bf16.mxu0 %v7963_v19  ;;  %6015 = vmatprep.subr.bf16.mxu1 %v7965_v11  ;;  %v8992_v19 = vld [vmem:[#allocation26_spill] sm:$0xff]  ;;  %v8993_v11 = vld [vmem:[#allocation27_spill] sm:$0xff] }
 0x87e   :  { %5985 = vmatpush1.bf16.msra.mxu0 %v7971_v49  ;;  %6017 = vmatpush1.bf16.msra.mxu1 %v7973_v57  ;;  %v8994_v49 = vld [vmem:[#allocation28_spill] sm:$0xff]  ;;  %v8995_v57 = vld [vmem:[#allocation29_spill] sm:$0xff] }
 0x87f   :  { %5987 = vmatprep.subr.bf16.mxu0 %v7977_v23  ;;  %6019 = vmatprep.subr.bf16.mxu1 %v7979_v7  ;;  %v8996_v23 = vld [vmem:[#allocation30_spill] sm:$0xff]  ;;  %v8997_v7 = vld [vmem:[#allocation31_spill] sm:$0xff] }
 0x882   :  { %5989 = vmatpush1.bf16.msra.mxu0 %v7983_v43  ;;  %6021 = vmatpush1.bf16.msra.mxu1 %v7985_v41  ;;  %v8998_v43 = vld [vmem:[#allocation32_spill] sm:$0xff]  ;;  %v8999_v41 = vld [vmem:[#allocation33_spill] sm:$0xff] }
 0x883   :  { %5991 = vmatprep.subr.bf16.mxu0 %v7989_v50  ;;  %6023 = vmatprep.subr.bf16.mxu1 %v7991_v32  ;;  %v9000_v50 = vld [vmem:[#allocation34_spill] sm:$0xff]  ;;  %v9001_v32 = vld [vmem:[#allocation35_spill] sm:$0xff] }
 0x886   :  { %5993 = vmatpush1.bf16.msra.mxu0 %v7995_v3  ;;  %6025 = vmatpush1.bf16.msra.mxu1 %v7997_v22  ;;  %v9002_v3 = vld [vmem:[#allocation36_spill] sm:$0xff]  ;;  %v9003_v22 = vld [vmem:[#allocation37_spill] sm:$0xff] }
 0x887   :  { %5995 = vmatprep.subr.bf16.mxu0 %v8001_v36  ;;  %6027 = vmatprep.subr.bf16.mxu1 %v8003_v63  ;;  %v9004_v36 = vld [vmem:[#allocation38_spill] sm:$0xff]  ;;  %v9005_v63 = vld [vmem:[#allocation39_spill] sm:$0xff] }
 0x88a   :  { %5997 = vmatpush1.bf16.msra.mxu0 %v8007_v38  ;;  %6029 = vmatpush1.bf16.msra.mxu1 %v8009_v46  ;;  %v9006_v38 = vld [vmem:[#allocation40_spill] sm:$0xff]  ;;  %v9007_v46 = vld [vmem:[#allocation41_spill] sm:$0xff] }
 0x88b   :  { %5999 = vmatprep.subr.bf16.mxu0 %v8013_v25  ;;  %6031 = vmatprep.subr.bf16.mxu1 %v8015_v2  ;;  %v9008_v25 = vld [vmem:[#allocation42_spill] sm:$0xff]  ;;  %v9009_v2 = vld [vmem:[#allocation43_spill] sm:$0xff] }
 0x88e   :  { %6001 = vmatpush1.bf16.msra.mxu0 %v8019_v14  ;;  %6033 = vmatpush1.bf16.msra.mxu1 %v8021_v59  ;;  %v9010_v14 = vld [vmem:[#allocation44_spill] sm:$0xff]  ;;  %v9011_v59 = vld [vmem:[#allocation45_spill] sm:$0xff] }
 0x88f   :  { %6003 = vmatprep.subr.bf16.mxu0 %v8025_v16  ;;  %6035 = vmatprep.subr.bf16.mxu1 %v8027_v29  ;;  %v9012_v16 = vld [vmem:[#allocation46_spill] sm:$0xff]  ;;  %v9013_v29 = vld [vmem:[#allocation47_spill] sm:$0xff] }
 0x892   :  { %6005 = vmatpush1.bf16.msra.mxu0 %v8031_v12  ;;  %6037 = vmatpush1.bf16.msra.mxu1 %v8033_v53  ;;  %v9014_v12 = vld [vmem:[#allocation48_spill] sm:$0xff]  ;;  %v9015_v53 = vld [vmem:[#allocation49_spill] sm:$0xff] }
 0x893   :  { %6039 = vmatprep.subr.bf16.mxu0 %v8041_v44  ;;  %6103 = vmatprep.subr.bf16.mxu1 %v8043_v13  ;;  %v9016_v44 = vld [vmem:[#allocation50_spill] sm:$0xff]  ;;  %v9017_v13 = vld [vmem:[#allocation51_spill] sm:$0xff] }
 0x895   :  { %4136 = vmatmul.mubr.f32.vlgmr.msra.gmra.mrb[28].mxu0 %v3708_v30  ;;  %4207 = vmatmul.mubr.f32.vlgmr.msra.gmra.mrb[28].mxu1 %v3708_v30  ;;  %v9034_v30 = vld [vmem:[#allocation68_spill] sm:$0xff] }
 0x896   :  { %6041 = vmatpush1.bf16.msra.mxu0 %v8984_v5  ;;  %6105 = vmatpush1.bf16.msra.mxu1 %v8985_v48  ;;  %v9035_v5 = vld [vmem:[#allocation69_spill] sm:$0xff]  ;;  %v9037_v48 = vld [vmem:[#allocation15_spill] sm:$0xff] }
 0x897   :  { %6043 = vmatprep.subr.bf16.mxu0 %v8986_v0  ;;  %6107 = vmatprep.subr.bf16.mxu1 %v8987_v17 }
 0x89a   :  { %6045 = vmatpush1.bf16.msra.mxu0 %v8988_v54  ;;  %6109 = vmatpush1.bf16.msra.mxu1 %v8989_v10  ;;  %v9039_v10 = vld [vmem:[#allocation17_spill] sm:$0xff] }
 0x89b   :  { %6047 = vmatprep.subr.bf16.mxu0 %v8990_v52  ;;  %6111 = vmatprep.subr.bf16.mxu1 %v8991_v1 }
 0x89e   :  { %6049 = vmatpush1.bf16.msra.mxu0 %v8992_v19  ;;  %6113 = vmatpush1.bf16.msra.mxu1 %v8993_v11 }
 0x89f   :  { %6051 = vmatprep.subr.bf16.mxu0 %v8994_v49  ;;  %6115 = vmatprep.subr.bf16.mxu1 %v8995_v57 }
 0x8a2   :  { %6053 = vmatpush1.bf16.msra.mxu0 %v8996_v23  ;;  %6117 = vmatpush1.bf16.msra.mxu1 %v8997_v7 }
 0x8a3   :  { %6055 = vmatprep.subr.bf16.mxu0 %v8998_v43  ;;  %6119 = vmatprep.subr.bf16.mxu1 %v8999_v41 }
 0x8a6   :  { %6057 = vmatpush1.bf16.msra.mxu0 %v9000_v50  ;;  %6121 = vmatpush1.bf16.msra.mxu1 %v9001_v32 }
 0x8a7   :  { %6059 = vmatprep.subr.bf16.mxu0 %v9002_v3  ;;  %6123 = vmatprep.subr.bf16.mxu1 %v9003_v22 }
 0x8aa   :  { %6061 = vmatpush1.bf16.msra.mxu0 %v9004_v36  ;;  %6125 = vmatpush1.bf16.msra.mxu1 %v9005_v63 }
 0x8ab   :  { %6063 = vmatprep.subr.bf16.mxu0 %v9006_v38  ;;  %6127 = vmatprep.subr.bf16.mxu1 %v9007_v46 }
 0x8ae   :  { %6065 = vmatpush1.bf16.msra.mxu0 %v9008_v25  ;;  %6129 = vmatpush1.bf16.msra.mxu1 %v9009_v2 }
 0x8af   :  { %6067 = vmatprep.subr.bf16.mxu0 %v9010_v14  ;;  %6131 = vmatprep.subr.bf16.mxu1 %v9011_v59  ;;  %v4006_v59 = vld [vmem:[#allocation2 + $0x38] sm:$0xff] }
 0x8b2   :  { %6069 = vmatpush1.bf16.msra.mxu0 %v9012_v16  ;;  %6133 = vmatpush1.bf16.msra.mxu1 %v9013_v29 }
 0x8b3   :  { %6071 = vmatprep.subr.bf16.mxu0 %v9014_v12  ;;  %6135 = vmatprep.subr.bf16.mxu1 %v9015_v53 }
 0x8b6   :  { %6073 = vmatpush1.bf16.msra.mxu0 %v9016_v44  ;;  %6137 = vmatpush1.bf16.msra.mxu1 %v9017_v13 }
 0x8b7   :  { %6075 = vmatprep.subr.bf16.mxu0 %v9018_v37  ;;  %6139 = vmatprep.subr.bf16.mxu1 %v9019_v45 }
 0x8ba   :  { %6077 = vmatpush1.bf16.msra.mxu0 %v9020_v24  ;;  %6141 = vmatpush1.bf16.msra.mxu1 %v9021_v18 }
 0x8bb   :  { %6079 = vmatprep.subr.bf16.mxu0 %v9022_v56  ;;  %6143 = vmatprep.subr.bf16.mxu1 %v9023_v42 }
 0x8be   :  { %6081 = vmatpush1.bf16.msra.mxu0 %v9024_v62  ;;  %6145 = vmatpush1.bf16.msra.mxu1 %v9025_v4 }
 0x8bf   :  { %6083 = vmatprep.subr.bf16.mxu0 %v9026_v26  ;;  %6147 = vmatprep.subr.bf16.mxu1 %v9027_v35 }
 0x8c2   :  { %6085 = vmatpush1.bf16.msra.mxu0 %v9028_v55  ;;  %6149 = vmatpush1.bf16.msra.mxu1 %v9029_v21 }
 0x8c3   :  { %6087 = vmatprep.subr.bf16.mxu0 %v9030_v31  ;;  %6151 = vmatprep.subr.bf16.mxu1 %v9031_v27 }
 0x8c6   :  { %6089 = vmatpush1.bf16.msra.mxu0 %v9032_v39  ;;  %6153 = vmatpush1.bf16.msra.mxu1 %v9033_v51 }
 0x8c7   :  { %6091 = vmatprep.subr.bf16.mxu0 %v8195_v8  ;;  %6155 = vmatprep.subr.bf16.mxu1 %v8197_v61  ;;  %v9036_v8 = vld [vmem:[#allocation70_spill] sm:$0xff] }
 0x8ca   :  { %6093 = vmatpush1.bf16.msra.mxu0 %v8201_v34  ;;  %6157 = vmatpush1.bf16.msra.mxu1 %v8203_v6 }
 0x8cb   :  { %6095 = vmatprep.subr.bf16.mxu0 %v8207_v60  ;;  %6159 = vmatprep.subr.bf16.mxu1 %v8209_v20 }
 0x8ce   :  { %6097 = vmatpush1.bf16.msra.mxu0 %v8213_v15  ;;  %6161 = vmatpush1.bf16.msra.mxu1 %v8215_v47  ;;  %v9038_v47 = vld [vmem:[#allocation16_spill] sm:$0xff] }
 0x8cf   :  { %6099 = vmatprep.subr.bf16.mxu0 %v8219_v33  ;;  %6163 = vmatprep.subr.bf16.mxu1 %v9034_v30 }
 0x8d2   :  { %6101 = vmatpush1.bf16.msra.mxu0 %v9035_v5  ;;  %6165 = vmatpush1.bf16.msra.mxu1 %v9036_v8 }
 0x948   :  { %v3903_v61 = vpop.f32.mrb[26].mxu0  ;;  %v3974_v34 = vpop.f32.mrb[26].mxu1 }
 0x949   :  { %v3904_v6 = vadd.f32 %v3903_v61, %v9037_v48  ;;  %v3905_v0 = vpop.f32.mrb[27].mxu0  ;;  %v3976_v60 = vpop.f32.mrb[27].mxu1  ;;  %v3975_v52 = vadd.f32 %v3974_v34, %v9039_v10 }
 0x94a   :  { %v3906_v20 = vadd.f32 %v3905_v0, %v7078_v9  ;;  %v3977_v33 = vadd.f32 %v3976_v60, %v9038_v47 }
 0x94b   :  { %v4621_v17 = vmul.f32 -1.442695, %v3904_v6 }
 0x94c   :  { %v4622_v15 = vmul.f32 -1.442695, %v3906_v20  ;;  %v4623_v54 = vmul.f32 -1.442695, %v3977_v33 }
 0x94d   :  { %6386 = vpow2.f32 %v4621_v17 }
 0x94e   :  { %6388 = vpow2.f32 %v4622_v15 }
 0x94f   :  { %6390 = vpow2.f32 %v4623_v54 }
 0x950   :  { %6392 = vtanh.f32 %v3975_v52 }
 0x957   :  { %v6387_v1 = vpop.eup %6386 }
 0x958   :  { %v6389_v19 = vpop.eup %6388  ;;  %v3982_v11 = vadd.f32 1.0, %v6387_v1 }
 0x959   :  { %v3988_v49 = vadd.f32 1.0, %v6389_v19  ;;  %v6391_v57 = vpop.eup %6390 }
 0x95a   :  { %6394 = vrcp.f32 %v3982_v11  ;;  %v6393_v23 = vpop.eup %6392  ;;  %v3995_v50 = vadd.f32 1.0, %v6391_v57 }
 0x95b   :  { %6396 = vrcp.f32 %v3988_v49 }
 0x95c   :  { %6398 = vrcp.f32 %v3995_v50 }
 0x964   :  { %v6395_v7 = vpop.eup %6394 }
 0x965   :  { %v6397_v43 = vpop.eup %6396  ;;  %v3999_v41 = vmul.f32 %v6395_v7, %v6393_v23 }
 0x966   :  { %v3998_v32 = vmul.f32 %v6397_v43, %v8240_v40  ;;  %v6399_v53 = vpop.eup %6398 }
 0x968   :  { %v4137_v3 = vpop.f32.mrb[28].mxu0  ;;  %v4208_v22 = vpop.f32.mrb[28].mxu1  ;;  %v8350_v36 = vadd.f32 %v3999_v41, %v3998_v32 }
 0x969   :  { %v4139_v63 = vpop.f32.mrb[29].mxu0  ;;  %v4210_v38 = vpop.f32.mrb[29].mxu1 }
 0x96a   :  { %v4217_v46 = vcombine.low %v4137_v3, %v4139_v63  ;;  %v4218_v25 = vcombine.low %v4208_v22, %v4210_v38  ;;  %6400 = vtanh.f32 %v8350_v36 }
 0x96c   :  { %v4225_v2 = vrot.slane %v4217_v46, %v6962_v28  ;;  %v4232_v14 = vrot.slane %v4218_v25, %v6962_v28 }
 0x96e   :  { %v4233_v16 = vcombine.low %v4225_v2, %v4232_v14 }
 0x970   :  { %v4235_v29 = vadd.f32 %v4233_v16, %v4006_v59 }
 0x972   :  { %v4624_v12 = vmul.f32 -1.442695, %v4235_v29  ;;  %v4243_v40 = vrot.slane %v4235_v29, 2  ;;  %v4254_v45 = vrot.slane %v4235_v29, 6  ;;  %v4251_v56 = vrot.slane %v4235_v29, 4 }
 0x974   :  { %v6401_v44 = vpop.eup %6400  ;;  %6402 = vpow2.f32 %v4624_v12  ;;  %v4625_v13 = vmul.f32 -1.442695, %v4243_v40  ;;  %v4626_v24 = vmul.f32 -1.442695, %v4254_v45 }
 0x975   :  { %v4002_v37 = vmul.f32 %v6401_v44, %v6399_v53 }
 0x976   :  { %6404 = vpow2.f32 %v4625_v13 }
 0x977   :  { %4004 = vst [vmem:[#allocation10 + $0xc] sm:$0x3] %v4002_v37  ;;  %4459 = vmatprep.mubr.f32.mxu0 %v4002_v37  ;;  %4530 = vmatprep.mubr.f32.mxu1 %v4002_v37  ;;  %6406 = vpow2.f32 %v4626_v24 }
 0x97e   :  { %v6403_v18 = vpop.eup %6402 }
 0x97f   :  { %v4239_v42 = vadd.f32 1.0, %v6403_v18 }
 0x980   :  { %v6405_v28 = vpop.eup %6404 }
 0x981   :  { %6408 = vrcp.f32 %v4239_v42  ;;  %v4248_v62 = vadd.f32 1.0, %v6405_v28  ;;  %v6407_v4 = vpop.eup %6406 }
 0x982   :  { %6410 = vtanh.f32 %v4251_v56  ;;  %v4259_v21 = vadd.f32 1.0, %v6407_v4 }
 0x983   :  { %6412 = vrcp.f32 %v4248_v62 }
 0x984   :  { %6414 = vrcp.f32 %v4259_v21 }
 0x98b   :  { %v6409_v26 = vpop.eup %6408 }
 0x98c   :  { %v6411_v35 = vpop.eup %6410 }
 0x98d   :  { %v6413_v55 = vpop.eup %6412  ;;  %v4263_v27 = vmul.f32 %v6411_v35, %v6409_v26 }
 0x98e   :  { %v4262_v31 = vmul.f32 %v6413_v55, %v8246_v58  ;;  %v6415_v51 = vpop.eup %6414 }
 0x990   :  { %v4264_v39 = vadd.f32 %v4263_v27, %v4262_v31 }
 0x992   :  { %6416 = vtanh.f32 %v4264_v39 }
 0x99c   :  { %v6417_v30 = vpop.eup %6416 }
 0x99d   :  { %v4266_v5 = vmul.f32 %v6417_v30, %v6415_v51 }
 0x99f   :  { %4460 = vmatmul.mubr.f32.vlgmr.msra.gmra.mrb[30].mxu0 %v4266_v5  ;;  %4531 = vmatmul.mubr.f32.vlgmr.msra.gmra.mrb[30].mxu1 %v4266_v5 }
 0xa72   :  { %v4461_v8 = vpop.f32.mrb[30].mxu0  ;;  %v4532_v61 = vpop.f32.mrb[30].mxu1 }
 0xa73   :  { %v4462_v34 = vadd.f32 %v4461_v8, %v9037_v48  ;;  %v4463_v6 = vpop.f32.mrb[31].mxu0  ;;  %v4534_v0 = vpop.f32.mrb[31].mxu1  ;;  %v4533_v33 = vadd.f32 %v4532_v61, %v9039_v10 }
 0xa74   :  { %v4464_v60 = vadd.f32 %v4463_v6, %v7078_v9  ;;  %v4535_v58 = vadd.f32 %v4534_v0, %v9038_v47 }
 0xa75   :  { %v4627_v20 = vmul.f32 -1.442695, %v4462_v34 }
 0xa76   :  { %v4628_v17 = vmul.f32 -1.442695, %v4464_v60  ;;  %v4629_v15 = vmul.f32 -1.442695, %v4535_v58 }
 0xa77   :  { %6418 = vpow2.f32 %v4627_v20 }
 0xa78   :  { %6420 = vpow2.f32 %v4628_v17 }
 0xa79   :  { %6422 = vpow2.f32 %v4629_v15 }
 0xa7a   :  { %6424 = vtanh.f32 %v4533_v33 }
 0xa81   :  { %v6419_v54 = vpop.eup %6418 }
 0xa82   :  { %v6421_v52 = vpop.eup %6420  ;;  %v4540_v1 = vadd.f32 1.0, %v6419_v54 }
 0xa83   :  { %v4546_v19 = vadd.f32 1.0, %v6421_v52  ;;  %v6423_v48 = vpop.eup %6422 }
 0xa84   :  { %6426 = vrcp.f32 %v4540_v1  ;;  %v6425_v11 = vpop.eup %6424  ;;  %v4553_v23 = vadd.f32 1.0, %v6423_v48 }
 0xa85   :  { %6428 = vrcp.f32 %v4546_v19 }
 0xa86   :  { %6430 = vrcp.f32 %v4553_v23 }
 0xa8e   :  { %v6427_v9 = vpop.eup %6426 }
 0xa8f   :  { %v6429_v49 = vpop.eup %6428  ;;  %v4557_v57 = vmul.f32 %v6427_v9, %v6425_v11 }
 0xa90   :  { %v4556_v7 = vmul.f32 %v6429_v49, %v8350_v36  ;;  %v6431_v10 = vpop.eup %6430 }
 0xa92   :  { %v4558_v47 = vadd.f32 %v4557_v57, %v4556_v7 }
 0xa94   :  { %6432 = vtanh.f32 %v4558_v47 }
 0xa9e   :  { %v6433_v43 = vpop.eup %6432 }
 0xa9f   :  { %v4560_v41 = vmul.f32 %v6433_v43, %v6431_v10 }
 0xaa1   :  { %4562 = vst [vmem:[#allocation10 + $0xe] sm:$0x3] %v4560_v41 }
 0xaa2   :  { %6533 = shalt.err (!%p6530_p8)
}
 0xaa3   :  { %s6534_s25 = scalar_lea.hbm %s8381_s6, 256 }
 0xaa4   :  { %p6535_p9 = scmp.ne.s32.totalorder %s8381_s6, %s6534_s25  ;;  %p6538_p10 = scmp.lt.u32.totalorder %s6534_s25, %s8381_s6 }
 0xaa6   :  { %p6540_p11 = pnand %p6538_p10, %p6535_p9 }
 0xaa8   :  { %6543 = shalt.err (!%p6540_p11)
}
 0xaa9   :  { %s6563_s29 = smov 2  }
 0xaaa   :  { %4574 = dma.vmem_to_hbm [thread:$0]  %s4569_s21, 256, %s8381_s6, [#allocation4], %s6554_s7, %s6554_s7, %s6563_s29  }
 0xaab   :  { %6550 = dma.done.wait [#allocation4], 256  }
 0xaac   :  { %6551 = vsyncadd [#allocation4], 4294967040 }
 0xaad   :  { %4578 = vsyncpa [#allocation3], 1 }
 0xaae   :  { %4579 = vsyncpa [#allocation6], 1 }
 0xaaf   :  { %4580 = vsyncpa [#allocation9], 1 }
 0xab0   :  { %4581 = vsyncpa [#allocation4], 1 }

</bundles_post_ra>
